<compile_context>
chip_gen: v7x
topology: tpu7x:2x2x1
jax: 0.10.0
libtpu: 0.0.40
codegen_flags: <defaults>
</compile_context>

<pallas_src>
import math
import numpy as np

import jax
import jax.numpy as jnp
from jax import lax
from jax.experimental import pallas as pl
from jax.experimental.pallas import tpu as pltpu

WINDOW_SIZE = 11
SIGMA = 10.0  # matches create_window(): gaussian(window_size, 10)


def gaussian_1d(window_size, sigma):
    # Matches the PyTorch `gaussian` helper exactly (center at window_size/2
    # = 5.5 -> taps are NOT symmetric, so no symmetric-pair folding).
    g = np.array(
        [math.exp(-(x - window_size / 2) ** 2 / float(2 * sigma ** 2))
         for x in range(window_size)],
        dtype=np.float32,
    )
    return (g / g.sum()).astype(np.float32)


def _pick_group_size(NC, Hp, Wp, budget_bytes=8 * 1024 * 1024):
    """How many padded planes to pack along the lane axis per grid step.

    Keeps roughly 16 live (Hp, G*Wp) f32 slabs (double-buffered inputs, the 5
    conv inputs/outputs and intermediates) under a conservative VMEM budget.
    G is forced to divide NC so no remainder handling is needed.
    """
    per_plane = Hp * Wp * 4  # f32 bytes
    g = max(1, min(NC, budget_bytes // (16 * per_plane)))
    while NC % g:
        g -= 1
    return g


def make_ssim_kernel(n_groups, K, H, Wv, w1d, inv_total):
    """Kernel body; Gaussian taps are baked in as static f32 constants."""
    wvals = [float(v) for v in w1d]
    C1 = 0.01 ** 2
    C2 = 0.03 ** 2

    def sepconv(a):
        # a: (Hp, Gw) packed padded slab. Cross-correlation (no flip), exactly
        # like F.conv2d with the separable outer-product window.
        # Row (lane) pass: (Hp, Gw) -> (Hp, Wv)
        rows = wvals[0] * a[:, 0:Wv]
        for j in range(1, K):
            rows = rows + wvals[j] * a[:, j:j + Wv]
        # Column (sublane) pass: (Hp, Wv) -> (H, Wv)
        cols = wvals[0] * rows[0:H, :]
        for i in range(1, K):
            cols = cols + wvals[i] * rows[i:i + H, :]
        return cols

    def kernel(mask_ref, x_ref, y_ref, out_ref, acc_ref):
        g = pl.program_id(0)

        @pl.when(g == 0)
        def _():
            acc_ref[...] = jnp.zeros_like(acc_ref)
            out_ref[...] = jnp.zeros_like(out_ref)

        xp = x_ref[0]  # (Hp, Gw) packed padded img1 planes
        yp = y_ref[0]  # (Hp, Gw) packed padded img2 planes

        mu1 = sepconv(xp)
        mu2 = sepconv(yp)
        ex2 = sepconv(xp * xp)
        ey2 = sepconv(yp * yp)
        exy = sepconv(xp * yp)

        mu1_sq = mu1 * mu1
        mu2_sq = mu2 * mu2
        mu1_mu2 = mu1 * mu2
        sigma1_sq = ex2 - mu1_sq
        sigma2_sq = ey2 - mu2_sq
        sigma12 = exy - mu1_mu2

        num = (2.0 * mu1_mu2 + C1) * (2.0 * sigma12 + C2)
        den = (mu1_sq + mu2_sq + C1) * (sigma1_sq + sigma2_sq + C2)
        # Exact divide (approximate reciprocal would endanger the tolerance).
        ssim_map = num / den

        # Element-wise accumulate the masked map; valid output columns only.
        acc_ref[...] += ssim_map * mask_ref[...]

        @pl.when(g == n_groups - 1)
        def _():
            out_ref[...] += jnp.sum(acc_ref[...]) * inv_total

    return kernel


def ssim_pallas(img1, img2, window_size=WINDOW_SIZE, size_average=True):
    """Forward pass of the SSIM module. Returns a scalar float32."""
    assert size_average, "only size_average=True (module default) is implemented"
    N, C, H, W = img1.shape
    K = window_size
    pad = K // 2
    Hp, Wp = H + 2 * pad, W + 2 * pad
    NC = N * C

    w1d = gaussian_1d(K, SIGMA)

    G = _pick_group_size(NC, Hp, Wp)
    n_groups = NC // G
    Gw = G * Wp
    Wv = Gw - (K - 1)  # row-pass output width on the packed slab

    # Pad each plane (SAME padding) and pack G planes side-by-side along the
    # lane axis. Products of zero-padded inputs equal zero-padded products, so
    # padding once before the kernel is exact. The pad-wide halos between
    # planes guarantee no 11-tap window straddles two planes.
    def pack(img):
        x = img.reshape(NC, H, W).astype(jnp.float32)
        x = jnp.pad(x, ((0, 0), (pad, pad), (pad, pad)))          # (NC, Hp, Wp)
        x = x.reshape(n_groups, G, Hp, Wp)
        x = jnp.transpose(x, (0, 2, 1, 3))                        # (ng, Hp, G, Wp)
        return x.reshape(n_groups, Hp, Gw)

    xpk = pack(img1)
    ypk = pack(img2)

    # mask[h, c] = 1 where packed output column c is a real SSIM pixel
    # (position within its plane's padded block is < W), else 0.
    col = np.arange(Wv)
    mask_row = ((col % Wp) < W).astype(np.float32)
    mask = jnp.asarray(np.tile(mask_row[None, :], (H, 1)))

    inv_total = 1.0 / float(NC * H * W)
    kernel = make_ssim_kernel(n_groups, K, H, Wv, w1d, inv_total)

    out = pl.pallas_call(
        kernel,
        out_shape=jax.ShapeDtypeStruct((1, 1), jnp.float32),
        grid_spec=pltpu.PrefetchScalarGridSpec(
            num_scalar_prefetch=0,
            grid=(n_groups,),
            in_specs=[
                pl.BlockSpec((H, Wv), lambda g: (0, 0)),        # mask (shared)
                pl.BlockSpec((1, Hp, Gw), lambda g: (g, 0, 0)),  # packed img1
                pl.BlockSpec((1, Hp, Gw), lambda g: (g, 0, 0)),  # packed img2
            ],
            # Same output block every step -> resident accumulator across grid.
            out_specs=pl.BlockSpec((1, 1), lambda g: (0, 0)),
            scratch_shapes=[pltpu.VMEM((H, Wv), jnp.float32)],   # map accumulator
        ),
        compiler_params=pltpu.CompilerParams(
            dimension_semantics=("arbitrary",),
            vmem_limit_bytes=32 * 1024 * 1024,
        ),
    )(mask, xpk, ypk)
    return out[0, 0]


def ssim_reference(img1, img2, window_size=WINDOW_SIZE):
    """Pure-JAX reference mirroring the PyTorch _ssim (depthwise conv via lax)."""
    N, C, H, W = img1.shape
    w1d = gaussian_1d(window_size, SIGMA)
    w2d = jnp.asarray(np.outer(w1d, w1d), dtype=jnp.float32)
    window = jnp.broadcast_to(w2d[None, None], (C, 1, window_size, window_size))
    pad = window_size // 2

    def conv(x):
        return lax.conv_general_dilated(
            x.astype(jnp.float32), window, window_strides=(1, 1),
            padding=[(pad, pad), (pad, pad)],
            dimension_numbers=("NCHW", "OIHW", "NCHW"),
            feature_group_count=C)

    mu1 = conv(img1)
    mu2 = conv(img2)
    mu1_sq, mu2_sq, mu1_mu2 = mu1 * mu1, mu2 * mu2, mu1 * mu2
    sigma1_sq = conv(img1 * img1) - mu1_sq
    sigma2_sq = conv(img2 * img2) - mu2_sq
    sigma12 = conv(img1 * img2) - mu1_mu2
    C1, C2 = 0.01 ** 2, 0.03 ** 2
    ssim_map = ((2 * mu1_mu2 + C1) * (2 * sigma12 + C2)
                / ((mu1_sq + mu2_sq + C1) * (sigma1_sq + sigma2_sq + C2)))
    return jnp.mean(ssim_map)


if __name__ == "__main__":
    key = jax.random.PRNGKey(0)
    k1, k2 = jax.random.split(key)
    img1 = jax.random.uniform(k1, (2, 4, 16, 16), dtype=jnp.float32)
    img2 = jax.random.uniform(k2, (2, 4, 16, 16), dtype=jnp.float32)

    out = ssim_pallas(img1, img2)
    out = jax.block_until_ready(out)

    ref = ssim_reference(img1, img2)
    assert np.allclose(np.asarray(out), np.asarray(ref), rtol=1e-4, atol=1e-5), (out, ref)

    print("KERNEL_OK")
</pallas_src>

<mosaic_0001>
module attributes {stable_mosaic.version = 11 : i64} {
  func.func @kernel(%arg0: i32, %arg1: memref<16x198xf32, #tpu.memory_space<vmem>>, %arg2: memref<1x26x208xf32, #tpu.memory_space<vmem>>, %arg3: memref<1x26x208xf32, #tpu.memory_space<vmem>>, %arg4: memref<1x1xf32, #tpu.memory_space<vmem>>, %arg5: memref<16x198xf32, #tpu.memory_space<vmem>>) attributes {dimension_semantics = [#tpu.dimension_semantics<arbitrary>], iteration_bounds = array<i64: 1>, scalar_prefetch = 0 : i64, scratch_operands = 1 : i64, tpu.core_type = #tpu.core_type<tc>, window_params = [{pipeline_mode = #tpu.pipeline_mode<synchronous>, transform_indices = @transform_0, window_bounds = array<i64: 16, 198>}, {transform_indices = @transform_1, window_bounds = array<i64: 1, 26, 208>}, {transform_indices = @transform_2, window_bounds = array<i64: 1, 26, 208>}, {pipeline_mode = #tpu.pipeline_mode<synchronous>, transform_indices = @transform_3, window_bounds = array<i64: 1, 1>}]} {
    %c0_i32 = arith.constant 0 : i32
    %0 = arith.cmpi eq, %arg0, %c0_i32 : i32
    %1 = arith.extui %0 : i1 to i32
    %c0_i32_0 = arith.constant 0 : i32
    %2 = arith.cmpi ne, %1, %c0_i32_0 : i32
    scf.if %2 {
      %cst_129 = arith.constant 0.000000e+00 : f32
      %471 = vector.broadcast %cst_129 : f32 to vector<16x198xf32>
      %c0_130 = arith.constant 0 : index
      %c0_131 = arith.constant 0 : index
      %472 = vector.load %arg5[%c0_130, %c0_131] : memref<16x198xf32, #tpu.memory_space<vmem>>, vector<16x198xf32>
      tpu.vector_store %arg5[%c0_130, %c0_131], %471 {strides = array<i32>} : memref<16x198xf32, #tpu.memory_space<vmem>>, vector<16x198xf32>,
      %cst_132 = arith.constant 0.000000e+00 : f32
      %473 = vector.broadcast %cst_132 : f32 to vector<1x1xf32>
      %c0_133 = arith.constant 0 : index
      %c0_134 = arith.constant 0 : index
      %474 = vector.load %arg4[%c0_133, %c0_134] : memref<1x1xf32, #tpu.memory_space<vmem>>, vector<1x1xf32>
      tpu.vector_store %arg4[%c0_133, %c0_134], %473 {strides = array<i32>} : memref<1x1xf32, #tpu.memory_space<vmem>>, vector<1x1xf32>,
    } else {
    }
    %c0 = arith.constant 0 : index
    %c0_1 = arith.constant 0 : index
    %c0_2 = arith.constant 0 : index
    %3 = vector.load %arg2[%c0, %c0_1, %c0_2] : memref<1x26x208xf32, #tpu.memory_space<vmem>>, vector<1x26x208xf32>
    %4 = vector.shape_cast %3 : vector<1x26x208xf32> to vector<26x208xf32>
    %c0_3 = arith.constant 0 : index
    %c0_4 = arith.constant 0 : index
    %c0_5 = arith.constant 0 : index
    %5 = vector.load %arg3[%c0_3, %c0_4, %c0_5] : memref<1x26x208xf32, #tpu.memory_space<vmem>>, vector<1x26x208xf32>
    %6 = vector.shape_cast %5 : vector<1x26x208xf32> to vector<26x208xf32>
    %7 = vector.extract_strided_slice %4 {offsets = [0, 0], sizes = [26, 198], strides = [1, 1]} : vector<26x208xf32> to vector<26x198xf32>
    %cst = arith.constant 0.0821685865 : f32
    %8 = vector.broadcast %cst : f32 to vector<26x198xf32>
    %9 = arith.mulf %8, %7 : vector<26x198xf32>
    %10 = vector.extract_strided_slice %4 {offsets = [0, 1], sizes = [26, 198], strides = [1, 1]} : vector<26x208xf32> to vector<26x198xf32>
    %cst_6 = arith.constant 0.0863814577 : f32
    %11 = vector.broadcast %cst_6 : f32 to vector<26x198xf32>
    %12 = arith.mulf %11, %10 : vector<26x198xf32>
    %13 = arith.addf %9, %12 : vector<26x198xf32>
    %14 = vector.extract_strided_slice %4 {offsets = [0, 2], sizes = [26, 198], strides = [1, 1]} : vector<26x208xf32> to vector<26x198xf32>
    %cst_7 = arith.constant 0.0899067521 : f32
    %15 = vector.broadcast %cst_7 : f32 to vector<26x198xf32>
    %16 = arith.mulf %15, %14 : vector<26x198xf32>
    %17 = arith.addf %13, %16 : vector<26x198xf32>
    %18 = vector.extract_strided_slice %4 {offsets = [0, 3], sizes = [26, 198], strides = [1, 1]} : vector<26x208xf32> to vector<26x198xf32>
    %cst_8 = arith.constant 0.0926448181 : f32
    %19 = vector.broadcast %cst_8 : f32 to vector<26x198xf32>
    %20 = arith.mulf %19, %18 : vector<26x198xf32>
    %21 = arith.addf %17, %20 : vector<26x198xf32>
    %22 = vector.extract_strided_slice %4 {offsets = [0, 4], sizes = [26, 198], strides = [1, 1]} : vector<26x208xf32> to vector<26x198xf32>
    %cst_9 = arith.constant 0.0945163741 : f32
    %23 = vector.broadcast %cst_9 : f32 to vector<26x198xf32>
    %24 = arith.mulf %23, %22 : vector<26x198xf32>
    %25 = arith.addf %21, %24 : vector<26x198xf32>
    %26 = vector.extract_strided_slice %4 {offsets = [0, 5], sizes = [26, 198], strides = [1, 1]} : vector<26x208xf32> to vector<26x198xf32>
    %cst_10 = arith.constant 0.0954662784 : f32
    %27 = vector.broadcast %cst_10 : f32 to vector<26x198xf32>
    %28 = arith.mulf %27, %26 : vector<26x198xf32>
    %29 = arith.addf %25, %28 : vector<26x198xf32>
    %30 = vector.extract_strided_slice %4 {offsets = [0, 6], sizes = [26, 198], strides = [1, 1]} : vector<26x208xf32> to vector<26x198xf32>
    %cst_11 = arith.constant 0.0954662784 : f32
    %31 = vector.broadcast %cst_11 : f32 to vector<26x198xf32>
    %32 = arith.mulf %31, %30 : vector<26x198xf32>
    %33 = arith.addf %29, %32 : vector<26x198xf32>
    %34 = vector.extract_strided_slice %4 {offsets = [0, 7], sizes = [26, 198], strides = [1, 1]} : vector<26x208xf32> to vector<26x198xf32>
    %cst_12 = arith.constant 0.0945163741 : f32
    %35 = vector.broadcast %cst_12 : f32 to vector<26x198xf32>
    %36 = arith.mulf %35, %34 : vector<26x198xf32>
    %37 = arith.addf %33, %36 : vector<26x198xf32>
    %38 = vector.extract_strided_slice %4 {offsets = [0, 8], sizes = [26, 198], strides = [1, 1]} : vector<26x208xf32> to vector<26x198xf32>
    %cst_13 = arith.constant 0.0926448181 : f32
    %39 = vector.broadcast %cst_13 : f32 to vector<26x198xf32>
    %40 = arith.mulf %39, %38 : vector<26x198xf32>
    %41 = arith.addf %37, %40 : vector<26x198xf32>
    %42 = vector.extract_strided_slice %4 {offsets = [0, 9], sizes = [26, 198], strides = [1, 1]} : vector<26x208xf32> to vector<26x198xf32>
    %cst_14 = arith.constant 0.0899067521 : f32
    %43 = vector.broadcast %cst_14 : f32 to vector<26x198xf32>
    %44 = arith.mulf %43, %42 : vector<26x198xf32>
    %45 = arith.addf %41, %44 : vector<26x198xf32>
    %46 = vector.extract_strided_slice %4 {offsets = [0, 10], sizes = [26, 198], strides = [1, 1]} : vector<26x208xf32> to vector<26x198xf32>
    %cst_15 = arith.constant 0.0863814577 : f32
    %47 = vector.broadcast %cst_15 : f32 to vector<26x198xf32>
    %48 = arith.mulf %47, %46 : vector<26x198xf32>
    %49 = arith.addf %45, %48 : vector<26x198xf32>
    %50 = vector.extract_strided_slice %49 {offsets = [0, 0], sizes = [16, 198], strides = [1, 1]} : vector<26x198xf32> to vector<16x198xf32>
    %cst_16 = arith.constant 0.0821685865 : f32
    %51 = vector.broadcast %cst_16 : f32 to vector<16x198xf32>
    %52 = arith.mulf %51, %50 : vector<16x198xf32>
    %53 = vector.extract_strided_slice %49 {offsets = [1, 0], sizes = [16, 198], strides = [1, 1]} : vector<26x198xf32> to vector<16x198xf32>
    %cst_17 = arith.constant 0.0863814577 : f32
    %54 = vector.broadcast %cst_17 : f32 to vector<16x198xf32>
    %55 = arith.mulf %54, %53 : vector<16x198xf32>
    %56 = arith.addf %52, %55 : vector<16x198xf32>
    %57 = vector.extract_strided_slice %49 {offsets = [2, 0], sizes = [16, 198], strides = [1, 1]} : vector<26x198xf32> to vector<16x198xf32>
    %cst_18 = arith.constant 0.0899067521 : f32
    %58 = vector.broadcast %cst_18 : f32 to vector<16x198xf32>
    %59 = arith.mulf %58, %57 : vector<16x198xf32>
    %60 = arith.addf %56, %59 : vector<16x198xf32>
    %61 = vector.extract_strided_slice %49 {offsets = [3, 0], sizes = [16, 198], strides = [1, 1]} : vector<26x198xf32> to vector<16x198xf32>
    %cst_19 = arith.constant 0.0926448181 : f32
    %62 = vector.broadcast %cst_19 : f32 to vector<16x198xf32>
    %63 = arith.mulf %62, %61 : vector<16x198xf32>
    %64 = arith.addf %60, %63 : vector<16x198xf32>
    %65 = vector.extract_strided_slice %49 {offsets = [4, 0], sizes = [16, 198], strides = [1, 1]} : vector<26x198xf32> to vector<16x198xf32>
    %cst_20 = arith.constant 0.0945163741 : f32
    %66 = vector.broadcast %cst_20 : f32 to vector<16x198xf32>
    %67 = arith.mulf %66, %65 : vector<16x198xf32>
    %68 = arith.addf %64, %67 : vector<16x198xf32>
    %69 = vector.extract_strided_slice %49 {offsets = [5, 0], sizes = [16, 198], strides = [1, 1]} : vector<26x198xf32> to vector<16x198xf32>
    %cst_21 = arith.constant 0.0954662784 : f32
    %70 = vector.broadcast %cst_21 : f32 to vector<16x198xf32>
    %71 = arith.mulf %70, %69 : vector<16x198xf32>
    %72 = arith.addf %68, %71 : vector<16x198xf32>
    %73 = vector.extract_strided_slice %49 {offsets = [6, 0], sizes = [16, 198], strides = [1, 1]} : vector<26x198xf32> to vector<16x198xf32>
    %cst_22 = arith.constant 0.0954662784 : f32
    %74 = vector.broadcast %cst_22 : f32 to vector<16x198xf32>
    %75 = arith.mulf %74, %73 : vector<16x198xf32>
    %76 = arith.addf %72, %75 : vector<16x198xf32>
    %77 = vector.extract_strided_slice %49 {offsets = [7, 0], sizes = [16, 198], strides = [1, 1]} : vector<26x198xf32> to vector<16x198xf32>
    %cst_23 = arith.constant 0.0945163741 : f32
    %78 = vector.broadcast %cst_23 : f32 to vector<16x198xf32>
    %79 = arith.mulf %78, %77 : vector<16x198xf32>
    %80 = arith.addf %76, %79 : vector<16x198xf32>
    %81 = vector.extract_strided_slice %49 {offsets = [8, 0], sizes = [16, 198], strides = [1, 1]} : vector<26x198xf32> to vector<16x198xf32>
    %cst_24 = arith.constant 0.0926448181 : f32
    %82 = vector.broadcast %cst_24 : f32 to vector<16x198xf32>
    %83 = arith.mulf %82, %81 : vector<16x198xf32>
    %84 = arith.addf %80, %83 : vector<16x198xf32>
    %85 = vector.extract_strided_slice %49 {offsets = [9, 0], sizes = [16, 198], strides = [1, 1]} : vector<26x198xf32> to vector<16x198xf32>
    %cst_25 = arith.constant 0.0899067521 : f32
    %86 = vector.broadcast %cst_25 : f32 to vector<16x198xf32>
    %87 = arith.mulf %86, %85 : vector<16x198xf32>
    %88 = arith.addf %84, %87 : vector<16x198xf32>
    %89 = vector.extract_strided_slice %49 {offsets = [10, 0], sizes = [16, 198], strides = [1, 1]} : vector<26x198xf32> to vector<16x198xf32>
    %cst_26 = arith.constant 0.0863814577 : f32
    %90 = vector.broadcast %cst_26 : f32 to vector<16x198xf32>
    %91 = arith.mulf %90, %89 : vector<16x198xf32>
    %92 = arith.addf %88, %91 : vector<16x198xf32>
    %93 = vector.extract_strided_slice %6 {offsets = [0, 0], sizes = [26, 198], strides = [1, 1]} : vector<26x208xf32> to vector<26x198xf32>
    %cst_27 = arith.constant 0.0821685865 : f32
    %94 = vector.broadcast %cst_27 : f32 to vector<26x198xf32>
    %95 = arith.mulf %94, %93 : vector<26x198xf32>
    %96 = vector.extract_strided_slice %6 {offsets = [0, 1], sizes = [26, 198], strides = [1, 1]} : vector<26x208xf32> to vector<26x198xf32>
    %cst_28 = arith.constant 0.0863814577 : f32
    %97 = vector.broadcast %cst_28 : f32 to vector<26x198xf32>
    %98 = arith.mulf %97, %96 : vector<26x198xf32>
    %99 = arith.addf %95, %98 : vector<26x198xf32>
    %100 = vector.extract_strided_slice %6 {offsets = [0, 2], sizes = [26, 198], strides = [1, 1]} : vector<26x208xf32> to vector<26x198xf32>
    %cst_29 = arith.constant 0.0899067521 : f32
    %101 = vector.broadcast %cst_29 : f32 to vector<26x198xf32>
    %102 = arith.mulf %101, %100 : vector<26x198xf32>
    %103 = arith.addf %99, %102 : vector<26x198xf32>
    %104 = vector.extract_strided_slice %6 {offsets = [0, 3], sizes = [26, 198], strides = [1, 1]} : vector<26x208xf32> to vector<26x198xf32>
    %cst_30 = arith.constant 0.0926448181 : f32
    %105 = vector.broadcast %cst_30 : f32 to vector<26x198xf32>
    %106 = arith.mulf %105, %104 : vector<26x198xf32>
    %107 = arith.addf %103, %106 : vector<26x198xf32>
    %108 = vector.extract_strided_slice %6 {offsets = [0, 4], sizes = [26, 198], strides = [1, 1]} : vector<26x208xf32> to vector<26x198xf32>
    %cst_31 = arith.constant 0.0945163741 : f32
    %109 = vector.broadcast %cst_31 : f32 to vector<26x198xf32>
    %110 = arith.mulf %109, %108 : vector<26x198xf32>
    %111 = arith.addf %107, %110 : vector<26x198xf32>
    %112 = vector.extract_strided_slice %6 {offsets = [0, 5], sizes = [26, 198], strides = [1, 1]} : vector<26x208xf32> to vector<26x198xf32>
    %cst_32 = arith.constant 0.0954662784 : f32
    %113 = vector.broadcast %cst_32 : f32 to vector<26x198xf32>
    %114 = arith.mulf %113, %112 : vector<26x198xf32>
    %115 = arith.addf %111, %114 : vector<26x198xf32>
    %116 = vector.extract_strided_slice %6 {offsets = [0, 6], sizes = [26, 198], strides = [1, 1]} : vector<26x208xf32> to vector<26x198xf32>
    %cst_33 = arith.constant 0.0954662784 : f32
    %117 = vector.broadcast %cst_33 : f32 to vector<26x198xf32>
    %118 = arith.mulf %117, %116 : vector<26x198xf32>
    %119 = arith.addf %115, %118 : vector<26x198xf32>
    %120 = vector.extract_strided_slice %6 {offsets = [0, 7], sizes = [26, 198], strides = [1, 1]} : vector<26x208xf32> to vector<26x198xf32>
    %cst_34 = arith.constant 0.0945163741 : f32
    %121 = vector.broadcast %cst_34 : f32 to vector<26x198xf32>
    %122 = arith.mulf %121, %120 : vector<26x198xf32>
    %123 = arith.addf %119, %122 : vector<26x198xf32>
    %124 = vector.extract_strided_slice %6 {offsets = [0, 8], sizes = [26, 198], strides = [1, 1]} : vector<26x208xf32> to vector<26x198xf32>
    %cst_35 = arith.constant 0.0926448181 : f32
    %125 = vector.broadcast %cst_35 : f32 to vector<26x198xf32>
    %126 = arith.mulf %125, %124 : vector<26x198xf32>
    %127 = arith.addf %123, %126 : vector<26x198xf32>
    %128 = vector.extract_strided_slice %6 {offsets = [0, 9], sizes = [26, 198], strides = [1, 1]} : vector<26x208xf32> to vector<26x198xf32>
    %cst_36 = arith.constant 0.0899067521 : f32
    %129 = vector.broadcast %cst_36 : f32 to vector<26x198xf32>
    %130 = arith.mulf %129, %128 : vector<26x198xf32>
    %131 = arith.addf %127, %130 : vector<26x198xf32>
    %132 = vector.extract_strided_slice %6 {offsets = [0, 10], sizes = [26, 198], strides = [1, 1]} : vector<26x208xf32> to vector<26x198xf32>
    %cst_37 = arith.constant 0.0863814577 : f32
    %133 = vector.broadcast %cst_37 : f32 to vector<26x198xf32>
    %134 = arith.mulf %133, %132 : vector<26x198xf32>
    %135 = arith.addf %131, %134 : vector<26x198xf32>
    %136 = vector.extract_strided_slice %135 {offsets = [0, 0], sizes = [16, 198], strides = [1, 1]} : vector<26x198xf32> to vector<16x198xf32>
    %cst_38 = arith.constant 0.0821685865 : f32
    %137 = vector.broadcast %cst_38 : f32 to vector<16x198xf32>
    %138 = arith.mulf %137, %136 : vector<16x198xf32>
    %139 = vector.extract_strided_slice %135 {offsets = [1, 0], sizes = [16, 198], strides = [1, 1]} : vector<26x198xf32> to vector<16x198xf32>
    %cst_39 = arith.constant 0.0863814577 : f32
    %140 = vector.broadcast %cst_39 : f32 to vector<16x198xf32>
    %141 = arith.mulf %140, %139 : vector<16x198xf32>
    %142 = arith.addf %138, %141 : vector<16x198xf32>
    %143 = vector.extract_strided_slice %135 {offsets = [2, 0], sizes = [16, 198], strides = [1, 1]} : vector<26x198xf32> to vector<16x198xf32>
    %cst_40 = arith.constant 0.0899067521 : f32
    %144 = vector.broadcast %cst_40 : f32 to vector<16x198xf32>
    %145 = arith.mulf %144, %143 : vector<16x198xf32>
    %146 = arith.addf %142, %145 : vector<16x198xf32>
    %147 = vector.extract_strided_slice %135 {offsets = [3, 0], sizes = [16, 198], strides = [1, 1]} : vector<26x198xf32> to vector<16x198xf32>
    %cst_41 = arith.constant 0.0926448181 : f32
    %148 = vector.broadcast %cst_41 : f32 to vector<16x198xf32>
    %149 = arith.mulf %148, %147 : vector<16x198xf32>
    %150 = arith.addf %146, %149 : vector<16x198xf32>
    %151 = vector.extract_strided_slice %135 {offsets = [4, 0], sizes = [16, 198], strides = [1, 1]} : vector<26x198xf32> to vector<16x198xf32>
    %cst_42 = arith.constant 0.0945163741 : f32
    %152 = vector.broadcast %cst_42 : f32 to vector<16x198xf32>
    %153 = arith.mulf %152, %151 : vector<16x198xf32>
    %154 = arith.addf %150, %153 : vector<16x198xf32>
    %155 = vector.extract_strided_slice %135 {offsets = [5, 0], sizes = [16, 198], strides = [1, 1]} : vector<26x198xf32> to vector<16x198xf32>
    %cst_43 = arith.constant 0.0954662784 : f32
    %156 = vector.broadcast %cst_43 : f32 to vector<16x198xf32>
    %157 = arith.mulf %156, %155 : vector<16x198xf32>
    %158 = arith.addf %154, %157 : vector<16x198xf32>
    %159 = vector.extract_strided_slice %135 {offsets = [6, 0], sizes = [16, 198], strides = [1, 1]} : vector<26x198xf32> to vector<16x198xf32>
    %cst_44 = arith.constant 0.0954662784 : f32
    %160 = vector.broadcast %cst_44 : f32 to vector<16x198xf32>
    %161 = arith.mulf %160, %159 : vector<16x198xf32>
    %162 = arith.addf %158, %161 : vector<16x198xf32>
    %163 = vector.extract_strided_slice %135 {offsets = [7, 0], sizes = [16, 198], strides = [1, 1]} : vector<26x198xf32> to vector<16x198xf32>
    %cst_45 = arith.constant 0.0945163741 : f32
    %164 = vector.broadcast %cst_45 : f32 to vector<16x198xf32>
    %165 = arith.mulf %164, %163 : vector<16x198xf32>
    %166 = arith.addf %162, %165 : vector<16x198xf32>
    %167 = vector.extract_strided_slice %135 {offsets = [8, 0], sizes = [16, 198], strides = [1, 1]} : vector<26x198xf32> to vector<16x198xf32>
    %cst_46 = arith.constant 0.0926448181 : f32
    %168 = vector.broadcast %cst_46 : f32 to vector<16x198xf32>
    %169 = arith.mulf %168, %167 : vector<16x198xf32>
    %170 = arith.addf %166, %169 : vector<16x198xf32>
    %171 = vector.extract_strided_slice %135 {offsets = [9, 0], sizes = [16, 198], strides = [1, 1]} : vector<26x198xf32> to vector<16x198xf32>
    %cst_47 = arith.constant 0.0899067521 : f32
    %172 = vector.broadcast %cst_47 : f32 to vector<16x198xf32>
    %173 = arith.mulf %172, %171 : vector<16x198xf32>
    %174 = arith.addf %170, %173 : vector<16x198xf32>
    %175 = vector.extract_strided_slice %135 {offsets = [10, 0], sizes = [16, 198], strides = [1, 1]} : vector<26x198xf32> to vector<16x198xf32>
    %cst_48 = arith.constant 0.0863814577 : f32
    %176 = vector.broadcast %cst_48 : f32 to vector<16x198xf32>
    %177 = arith.mulf %176, %175 : vector<16x198xf32>
    %178 = arith.addf %174, %177 : vector<16x198xf32>
    %179 = arith.mulf %4, %4 : vector<26x208xf32>
    %180 = vector.extract_strided_slice %179 {offsets = [0, 0], sizes = [26, 198], strides = [1, 1]} : vector<26x208xf32> to vector<26x198xf32>
    %cst_49 = arith.constant 0.0821685865 : f32
    %181 = vector.broadcast %cst_49 : f32 to vector<26x198xf32>
    %182 = arith.mulf %181, %180 : vector<26x198xf32>
    %183 = vector.extract_strided_slice %179 {offsets = [0, 1], sizes = [26, 198], strides = [1, 1]} : vector<26x208xf32> to vector<26x198xf32>
    %cst_50 = arith.constant 0.0863814577 : f32
    %184 = vector.broadcast %cst_50 : f32 to vector<26x198xf32>
    %185 = arith.mulf %184, %183 : vector<26x198xf32>
    %186 = arith.addf %182, %185 : vector<26x198xf32>
    %187 = vector.extract_strided_slice %179 {offsets = [0, 2], sizes = [26, 198], strides = [1, 1]} : vector<26x208xf32> to vector<26x198xf32>
    %cst_51 = arith.constant 0.0899067521 : f32
    %188 = vector.broadcast %cst_51 : f32 to vector<26x198xf32>
    %189 = arith.mulf %188, %187 : vector<26x198xf32>
    %190 = arith.addf %186, %189 : vector<26x198xf32>
    %191 = vector.extract_strided_slice %179 {offsets = [0, 3], sizes = [26, 198], strides = [1, 1]} : vector<26x208xf32> to vector<26x198xf32>
    %cst_52 = arith.constant 0.0926448181 : f32
    %192 = vector.broadcast %cst_52 : f32 to vector<26x198xf32>
    %193 = arith.mulf %192, %191 : vector<26x198xf32>
    %194 = arith.addf %190, %193 : vector<26x198xf32>
    %195 = vector.extract_strided_slice %179 {offsets = [0, 4], sizes = [26, 198], strides = [1, 1]} : vector<26x208xf32> to vector<26x198xf32>
    %cst_53 = arith.constant 0.0945163741 : f32
    %196 = vector.broadcast %cst_53 : f32 to vector<26x198xf32>
    %197 = arith.mulf %196, %195 : vector<26x198xf32>
    %198 = arith.addf %194, %197 : vector<26x198xf32>
    %199 = vector.extract_strided_slice %179 {offsets = [0, 5], sizes = [26, 198], strides = [1, 1]} : vector<26x208xf32> to vector<26x198xf32>
    %cst_54 = arith.constant 0.0954662784 : f32
    %200 = vector.broadcast %cst_54 : f32 to vector<26x198xf32>
    %201 = arith.mulf %200, %199 : vector<26x198xf32>
    %202 = arith.addf %198, %201 : vector<26x198xf32>
    %203 = vector.extract_strided_slice %179 {offsets = [0, 6], sizes = [26, 198], strides = [1, 1]} : vector<26x208xf32> to vector<26x198xf32>
    %cst_55 = arith.constant 0.0954662784 : f32
    %204 = vector.broadcast %cst_55 : f32 to vector<26x198xf32>
    %205 = arith.mulf %204, %203 : vector<26x198xf32>
    %206 = arith.addf %202, %205 : vector<26x198xf32>
    %207 = vector.extract_strided_slice %179 {offsets = [0, 7], sizes = [26, 198], strides = [1, 1]} : vector<26x208xf32> to vector<26x198xf32>
    %cst_56 = arith.constant 0.0945163741 : f32
    %208 = vector.broadcast %cst_56 : f32 to vector<26x198xf32>
    %209 = arith.mulf %208, %207 : vector<26x198xf32>
    %210 = arith.addf %206, %209 : vector<26x198xf32>
    %211 = vector.extract_strided_slice %179 {offsets = [0, 8], sizes = [26, 198], strides = [1, 1]} : vector<26x208xf32> to vector<26x198xf32>
    %cst_57 = arith.constant 0.0926448181 : f32
    %212 = vector.broadcast %cst_57 : f32 to vector<26x198xf32>
    %213 = arith.mulf %212, %211 : vector<26x198xf32>
    %214 = arith.addf %210, %213 : vector<26x198xf32>
    %215 = vector.extract_strided_slice %179 {offsets = [0, 9], sizes = [26, 198], strides = [1, 1]} : vector<26x208xf32> to vector<26x198xf32>
    %cst_58 = arith.constant 0.0899067521 : f32
    %216 = vector.broadcast %cst_58 : f32 to vector<26x198xf32>
    %217 = arith.mulf %216, %215 : vector<26x198xf32>
    %218 = arith.addf %214, %217 : vector<26x198xf32>
    %219 = vector.extract_strided_slice %179 {offsets = [0, 10], sizes = [26, 198], strides = [1, 1]} : vector<26x208xf32> to vector<26x198xf32>
    %cst_59 = arith.constant 0.0863814577 : f32
    %220 = vector.broadcast %cst_59 : f32 to vector<26x198xf32>
    %221 = arith.mulf %220, %219 : vector<26x198xf32>
    %222 = arith.addf %218, %221 : vector<26x198xf32>
    %223 = vector.extract_strided_slice %222 {offsets = [0, 0], sizes = [16, 198], strides = [1, 1]} : vector<26x198xf32> to vector<16x198xf32>
    %cst_60 = arith.constant 0.0821685865 : f32
    %224 = vector.broadcast %cst_60 : f32 to vector<16x198xf32>
    %225 = arith.mulf %224, %223 : vector<16x198xf32>
    %226 = vector.extract_strided_slice %222 {offsets = [1, 0], sizes = [16, 198], strides = [1, 1]} : vector<26x198xf32> to vector<16x198xf32>
    %cst_61 = arith.constant 0.0863814577 : f32
    %227 = vector.broadcast %cst_61 : f32 to vector<16x198xf32>
    %228 = arith.mulf %227, %226 : vector<16x198xf32>
    %229 = arith.addf %225, %228 : vector<16x198xf32>
    %230 = vector.extract_strided_slice %222 {offsets = [2, 0], sizes = [16, 198], strides = [1, 1]} : vector<26x198xf32> to vector<16x198xf32>
    %cst_62 = arith.constant 0.0899067521 : f32
    %231 = vector.broadcast %cst_62 : f32 to vector<16x198xf32>
    %232 = arith.mulf %231, %230 : vector<16x198xf32>
    %233 = arith.addf %229, %232 : vector<16x198xf32>
    %234 = vector.extract_strided_slice %222 {offsets = [3, 0], sizes = [16, 198], strides = [1, 1]} : vector<26x198xf32> to vector<16x198xf32>
    %cst_63 = arith.constant 0.0926448181 : f32
    %235 = vector.broadcast %cst_63 : f32 to vector<16x198xf32>
    %236 = arith.mulf %235, %234 : vector<16x198xf32>
    %237 = arith.addf %233, %236 : vector<16x198xf32>
    %238 = vector.extract_strided_slice %222 {offsets = [4, 0], sizes = [16, 198], strides = [1, 1]} : vector<26x198xf32> to vector<16x198xf32>
    %cst_64 = arith.constant 0.0945163741 : f32
    %239 = vector.broadcast %cst_64 : f32 to vector<16x198xf32>
    %240 = arith.mulf %239, %238 : vector<16x198xf32>
    %241 = arith.addf %237, %240 : vector<16x198xf32>
    %242 = vector.extract_strided_slice %222 {offsets = [5, 0], sizes = [16, 198], strides = [1, 1]} : vector<26x198xf32> to vector<16x198xf32>
    %cst_65 = arith.constant 0.0954662784 : f32
    %243 = vector.broadcast %cst_65 : f32 to vector<16x198xf32>
    %244 = arith.mulf %243, %242 : vector<16x198xf32>
    %245 = arith.addf %241, %244 : vector<16x198xf32>
    %246 = vector.extract_strided_slice %222 {offsets = [6, 0], sizes = [16, 198], strides = [1, 1]} : vector<26x198xf32> to vector<16x198xf32>
    %cst_66 = arith.constant 0.0954662784 : f32
    %247 = vector.broadcast %cst_66 : f32 to vector<16x198xf32>
    %248 = arith.mulf %247, %246 : vector<16x198xf32>
    %249 = arith.addf %245, %248 : vector<16x198xf32>
    %250 = vector.extract_strided_slice %222 {offsets = [7, 0], sizes = [16, 198], strides = [1, 1]} : vector<26x198xf32> to vector<16x198xf32>
    %cst_67 = arith.constant 0.0945163741 : f32
    %251 = vector.broadcast %cst_67 : f32 to vector<16x198xf32>
    %252 = arith.mulf %251, %250 : vector<16x198xf32>
    %253 = arith.addf %249, %252 : vector<16x198xf32>
    %254 = vector.extract_strided_slice %222 {offsets = [8, 0], sizes = [16, 198], strides = [1, 1]} : vector<26x198xf32> to vector<16x198xf32>
    %cst_68 = arith.constant 0.0926448181 : f32
    %255 = vector.broadcast %cst_68 : f32 to vector<16x198xf32>
    %256 = arith.mulf %255, %254 : vector<16x198xf32>
    %257 = arith.addf %253, %256 : vector<16x198xf32>
    %258 = vector.extract_strided_slice %222 {offsets = [9, 0], sizes = [16, 198], strides = [1, 1]} : vector<26x198xf32> to vector<16x198xf32>
    %cst_69 = arith.constant 0.0899067521 : f32
    %259 = vector.broadcast %cst_69 : f32 to vector<16x198xf32>
    %260 = arith.mulf %259, %258 : vector<16x198xf32>
    %261 = arith.addf %257, %260 : vector<16x198xf32>
    %262 = vector.extract_strided_slice %222 {offsets = [10, 0], sizes = [16, 198], strides = [1, 1]} : vector<26x198xf32> to vector<16x198xf32>
    %cst_70 = arith.constant 0.0863814577 : f32
    %263 = vector.broadcast %cst_70 : f32 to vector<16x198xf32>
    %264 = arith.mulf %263, %262 : vector<16x198xf32>
    %265 = arith.addf %261, %264 : vector<16x198xf32>
    %266 = arith.mulf %6, %6 : vector<26x208xf32>
    %267 = vector.extract_strided_slice %266 {offsets = [0, 0], sizes = [26, 198], strides = [1, 1]} : vector<26x208xf32> to vector<26x198xf32>
    %cst_71 = arith.constant 0.0821685865 : f32
    %268 = vector.broadcast %cst_71 : f32 to vector<26x198xf32>
    %269 = arith.mulf %268, %267 : vector<26x198xf32>
    %270 = vector.extract_strided_slice %266 {offsets = [0, 1], sizes = [26, 198], strides = [1, 1]} : vector<26x208xf32> to vector<26x198xf32>
    %cst_72 = arith.constant 0.0863814577 : f32
    %271 = vector.broadcast %cst_72 : f32 to vector<26x198xf32>
    %272 = arith.mulf %271, %270 : vector<26x198xf32>
    %273 = arith.addf %269, %272 : vector<26x198xf32>
    %274 = vector.extract_strided_slice %266 {offsets = [0, 2], sizes = [26, 198], strides = [1, 1]} : vector<26x208xf32> to vector<26x198xf32>
    %cst_73 = arith.constant 0.0899067521 : f32
    %275 = vector.broadcast %cst_73 : f32 to vector<26x198xf32>
    %276 = arith.mulf %275, %274 : vector<26x198xf32>
    %277 = arith.addf %273, %276 : vector<26x198xf32>
    %278 = vector.extract_strided_slice %266 {offsets = [0, 3], sizes = [26, 198], strides = [1, 1]} : vector<26x208xf32> to vector<26x198xf32>
    %cst_74 = arith.constant 0.0926448181 : f32
    %279 = vector.broadcast %cst_74 : f32 to vector<26x198xf32>
    %280 = arith.mulf %279, %278 : vector<26x198xf32>
    %281 = arith.addf %277, %280 : vector<26x198xf32>
    %282 = vector.extract_strided_slice %266 {offsets = [0, 4], sizes = [26, 198], strides = [1, 1]} : vector<26x208xf32> to vector<26x198xf32>
    %cst_75 = arith.constant 0.0945163741 : f32
    %283 = vector.broadcast %cst_75 : f32 to vector<26x198xf32>
    %284 = arith.mulf %283, %282 : vector<26x198xf32>
    %285 = arith.addf %281, %284 : vector<26x198xf32>
    %286 = vector.extract_strided_slice %266 {offsets = [0, 5], sizes = [26, 198], strides = [1, 1]} : vector<26x208xf32> to vector<26x198xf32>
    %cst_76 = arith.constant 0.0954662784 : f32
    %287 = vector.broadcast %cst_76 : f32 to vector<26x198xf32>
    %288 = arith.mulf %287, %286 : vector<26x198xf32>
    %289 = arith.addf %285, %288 : vector<26x198xf32>
    %290 = vector.extract_strided_slice %266 {offsets = [0, 6], sizes = [26, 198], strides = [1, 1]} : vector<26x208xf32> to vector<26x198xf32>
    %cst_77 = arith.constant 0.0954662784 : f32
    %291 = vector.broadcast %cst_77 : f32 to vector<26x198xf32>
    %292 = arith.mulf %291, %290 : vector<26x198xf32>
    %293 = arith.addf %289, %292 : vector<26x198xf32>
    %294 = vector.extract_strided_slice %266 {offsets = [0, 7], sizes = [26, 198], strides = [1, 1]} : vector<26x208xf32> to vector<26x198xf32>
    %cst_78 = arith.constant 0.0945163741 : f32
    %295 = vector.broadcast %cst_78 : f32 to vector<26x198xf32>
    %296 = arith.mulf %295, %294 : vector<26x198xf32>
    %297 = arith.addf %293, %296 : vector<26x198xf32>
    %298 = vector.extract_strided_slice %266 {offsets = [0, 8], sizes = [26, 198], strides = [1, 1]} : vector<26x208xf32> to vector<26x198xf32>
    %cst_79 = arith.constant 0.0926448181 : f32
    %299 = vector.broadcast %cst_79 : f32 to vector<26x198xf32>
    %300 = arith.mulf %299, %298 : vector<26x198xf32>
    %301 = arith.addf %297, %300 : vector<26x198xf32>
    %302 = vector.extract_strided_slice %266 {offsets = [0, 9], sizes = [26, 198], strides = [1, 1]} : vector<26x208xf32> to vector<26x198xf32>
    %cst_80 = arith.constant 0.0899067521 : f32
    %303 = vector.broadcast %cst_80 : f32 to vector<26x198xf32>
    %304 = arith.mulf %303, %302 : vector<26x198xf32>
    %305 = arith.addf %301, %304 : vector<26x198xf32>
    %306 = vector.extract_strided_slice %266 {offsets = [0, 10], sizes = [26, 198], strides = [1, 1]} : vector<26x208xf32> to vector<26x198xf32>
    %cst_81 = arith.constant 0.0863814577 : f32
    %307 = vector.broadcast %cst_81 : f32 to vector<26x198xf32>
    %308 = arith.mulf %307, %306 : vector<26x198xf32>
    %309 = arith.addf %305, %308 : vector<26x198xf32>
    %310 = vector.extract_strided_slice %309 {offsets = [0, 0], sizes = [16, 198], strides = [1, 1]} : vector<26x198xf32> to vector<16x198xf32>
    %cst_82 = arith.constant 0.0821685865 : f32
    %311 = vector.broadcast %cst_82 : f32 to vector<16x198xf32>
    %312 = arith.mulf %311, %310 : vector<16x198xf32>
    %313 = vector.extract_strided_slice %309 {offsets = [1, 0], sizes = [16, 198], strides = [1, 1]} : vector<26x198xf32> to vector<16x198xf32>
    %cst_83 = arith.constant 0.0863814577 : f32
    %314 = vector.broadcast %cst_83 : f32 to vector<16x198xf32>
    %315 = arith.mulf %314, %313 : vector<16x198xf32>
    %316 = arith.addf %312, %315 : vector<16x198xf32>
    %317 = vector.extract_strided_slice %309 {offsets = [2, 0], sizes = [16, 198], strides = [1, 1]} : vector<26x198xf32> to vector<16x198xf32>
    %cst_84 = arith.constant 0.0899067521 : f32
    %318 = vector.broadcast %cst_84 : f32 to vector<16x198xf32>
    %319 = arith.mulf %318, %317 : vector<16x198xf32>
    %320 = arith.addf %316, %319 : vector<16x198xf32>
    %321 = vector.extract_strided_slice %309 {offsets = [3, 0], sizes = [16, 198], strides = [1, 1]} : vector<26x198xf32> to vector<16x198xf32>
    %cst_85 = arith.constant 0.0926448181 : f32
    %322 = vector.broadcast %cst_85 : f32 to vector<16x198xf32>
    %323 = arith.mulf %322, %321 : vector<16x198xf32>
    %324 = arith.addf %320, %323 : vector<16x198xf32>
    %325 = vector.extract_strided_slice %309 {offsets = [4, 0], sizes = [16, 198], strides = [1, 1]} : vector<26x198xf32> to vector<16x198xf32>
    %cst_86 = arith.constant 0.0945163741 : f32
    %326 = vector.broadcast %cst_86 : f32 to vector<16x198xf32>
    %327 = arith.mulf %326, %325 : vector<16x198xf32>
    %328 = arith.addf %324, %327 : vector<16x198xf32>
    %329 = vector.extract_strided_slice %309 {offsets = [5, 0], sizes = [16, 198], strides = [1, 1]} : vector<26x198xf32> to vector<16x198xf32>
    %cst_87 = arith.constant 0.0954662784 : f32
    %330 = vector.broadcast %cst_87 : f32 to vector<16x198xf32>
    %331 = arith.mulf %330, %329 : vector<16x198xf32>
    %332 = arith.addf %328, %331 : vector<16x198xf32>
    %333 = vector.extract_strided_slice %309 {offsets = [6, 0], sizes = [16, 198], strides = [1, 1]} : vector<26x198xf32> to vector<16x198xf32>
    %cst_88 = arith.constant 0.0954662784 : f32
    %334 = vector.broadcast %cst_88 : f32 to vector<16x198xf32>
    %335 = arith.mulf %334, %333 : vector<16x198xf32>
    %336 = arith.addf %332, %335 : vector<16x198xf32>
    %337 = vector.extract_strided_slice %309 {offsets = [7, 0], sizes = [16, 198], strides = [1, 1]} : vector<26x198xf32> to vector<16x198xf32>
    %cst_89 = arith.constant 0.0945163741 : f32
    %338 = vector.broadcast %cst_89 : f32 to vector<16x198xf32>
    %339 = arith.mulf %338, %337 : vector<16x198xf32>
    %340 = arith.addf %336, %339 : vector<16x198xf32>
    %341 = vector.extract_strided_slice %309 {offsets = [8, 0], sizes = [16, 198], strides = [1, 1]} : vector<26x198xf32> to vector<16x198xf32>
    %cst_90 = arith.constant 0.0926448181 : f32
    %342 = vector.broadcast %cst_90 : f32 to vector<16x198xf32>
    %343 = arith.mulf %342, %341 : vector<16x198xf32>
    %344 = arith.addf %340, %343 : vector<16x198xf32>
    %345 = vector.extract_strided_slice %309 {offsets = [9, 0], sizes = [16, 198], strides = [1, 1]} : vector<26x198xf32> to vector<16x198xf32>
    %cst_91 = arith.constant 0.0899067521 : f32
    %346 = vector.broadcast %cst_91 : f32 to vector<16x198xf32>
    %347 = arith.mulf %346, %345 : vector<16x198xf32>
    %348 = arith.addf %344, %347 : vector<16x198xf32>
    %349 = vector.extract_strided_slice %309 {offsets = [10, 0], sizes = [16, 198], strides = [1, 1]} : vector<26x198xf32> to vector<16x198xf32>
    %cst_92 = arith.constant 0.0863814577 : f32
    %350 = vector.broadcast %cst_92 : f32 to vector<16x198xf32>
    %351 = arith.mulf %350, %349 : vector<16x198xf32>
    %352 = arith.addf %348, %351 : vector<16x198xf32>
    %353 = arith.mulf %4, %6 : vector<26x208xf32>
    %354 = vector.extract_strided_slice %353 {offsets = [0, 0], sizes = [26, 198], strides = [1, 1]} : vector<26x208xf32> to vector<26x198xf32>
    %cst_93 = arith.constant 0.0821685865 : f32
    %355 = vector.broadcast %cst_93 : f32 to vector<26x198xf32>
    %356 = arith.mulf %355, %354 : vector<26x198xf32>
    %357 = vector.extract_strided_slice %353 {offsets = [0, 1], sizes = [26, 198], strides = [1, 1]} : vector<26x208xf32> to vector<26x198xf32>
    %cst_94 = arith.constant 0.0863814577 : f32
    %358 = vector.broadcast %cst_94 : f32 to vector<26x198xf32>
    %359 = arith.mulf %358, %357 : vector<26x198xf32>
    %360 = arith.addf %356, %359 : vector<26x198xf32>
    %361 = vector.extract_strided_slice %353 {offsets = [0, 2], sizes = [26, 198], strides = [1, 1]} : vector<26x208xf32> to vector<26x198xf32>
    %cst_95 = arith.constant 0.0899067521 : f32
    %362 = vector.broadcast %cst_95 : f32 to vector<26x198xf32>
    %363 = arith.mulf %362, %361 : vector<26x198xf32>
    %364 = arith.addf %360, %363 : vector<26x198xf32>
    %365 = vector.extract_strided_slice %353 {offsets = [0, 3], sizes = [26, 198], strides = [1, 1]} : vector<26x208xf32> to vector<26x198xf32>
    %cst_96 = arith.constant 0.0926448181 : f32
    %366 = vector.broadcast %cst_96 : f32 to vector<26x198xf32>
    %367 = arith.mulf %366, %365 : vector<26x198xf32>
    %368 = arith.addf %364, %367 : vector<26x198xf32>
    %369 = vector.extract_strided_slice %353 {offsets = [0, 4], sizes = [26, 198], strides = [1, 1]} : vector<26x208xf32> to vector<26x198xf32>
    %cst_97 = arith.constant 0.0945163741 : f32
    %370 = vector.broadcast %cst_97 : f32 to vector<26x198xf32>
    %371 = arith.mulf %370, %369 : vector<26x198xf32>
    %372 = arith.addf %368, %371 : vector<26x198xf32>
    %373 = vector.extract_strided_slice %353 {offsets = [0, 5], sizes = [26, 198], strides = [1, 1]} : vector<26x208xf32> to vector<26x198xf32>
    %cst_98 = arith.constant 0.0954662784 : f32
    %374 = vector.broadcast %cst_98 : f32 to vector<26x198xf32>
    %375 = arith.mulf %374, %373 : vector<26x198xf32>
    %376 = arith.addf %372, %375 : vector<26x198xf32>
    %377 = vector.extract_strided_slice %353 {offsets = [0, 6], sizes = [26, 198], strides = [1, 1]} : vector<26x208xf32> to vector<26x198xf32>
    %cst_99 = arith.constant 0.0954662784 : f32
    %378 = vector.broadcast %cst_99 : f32 to vector<26x198xf32>
    %379 = arith.mulf %378, %377 : vector<26x198xf32>
    %380 = arith.addf %376, %379 : vector<26x198xf32>
    %381 = vector.extract_strided_slice %353 {offsets = [0, 7], sizes = [26, 198], strides = [1, 1]} : vector<26x208xf32> to vector<26x198xf32>
    %cst_100 = arith.constant 0.0945163741 : f32
    %382 = vector.broadcast %cst_100 : f32 to vector<26x198xf32>
    %383 = arith.mulf %382, %381 : vector<26x198xf32>
    %384 = arith.addf %380, %383 : vector<26x198xf32>
    %385 = vector.extract_strided_slice %353 {offsets = [0, 8], sizes = [26, 198], strides = [1, 1]} : vector<26x208xf32> to vector<26x198xf32>
    %cst_101 = arith.constant 0.0926448181 : f32
    %386 = vector.broadcast %cst_101 : f32 to vector<26x198xf32>
    %387 = arith.mulf %386, %385 : vector<26x198xf32>
    %388 = arith.addf %384, %387 : vector<26x198xf32>
    %389 = vector.extract_strided_slice %353 {offsets = [0, 9], sizes = [26, 198], strides = [1, 1]} : vector<26x208xf32> to vector<26x198xf32>
    %cst_102 = arith.constant 0.0899067521 : f32
    %390 = vector.broadcast %cst_102 : f32 to vector<26x198xf32>
    %391 = arith.mulf %390, %389 : vector<26x198xf32>
    %392 = arith.addf %388, %391 : vector<26x198xf32>
    %393 = vector.extract_strided_slice %353 {offsets = [0, 10], sizes = [26, 198], strides = [1, 1]} : vector<26x208xf32> to vector<26x198xf32>
    %cst_103 = arith.constant 0.0863814577 : f32
    %394 = vector.broadcast %cst_103 : f32 to vector<26x198xf32>
    %395 = arith.mulf %394, %393 : vector<26x198xf32>
    %396 = arith.addf %392, %395 : vector<26x198xf32>
    %397 = vector.extract_strided_slice %396 {offsets = [0, 0], sizes = [16, 198], strides = [1, 1]} : vector<26x198xf32> to vector<16x198xf32>
    %cst_104 = arith.constant 0.0821685865 : f32
    %398 = vector.broadcast %cst_104 : f32 to vector<16x198xf32>
    %399 = arith.mulf %398, %397 : vector<16x198xf32>
    %400 = vector.extract_strided_slice %396 {offsets = [1, 0], sizes = [16, 198], strides = [1, 1]} : vector<26x198xf32> to vector<16x198xf32>
    %cst_105 = arith.constant 0.0863814577 : f32
    %401 = vector.broadcast %cst_105 : f32 to vector<16x198xf32>
    %402 = arith.mulf %401, %400 : vector<16x198xf32>
    %403 = arith.addf %399, %402 : vector<16x198xf32>
    %404 = vector.extract_strided_slice %396 {offsets = [2, 0], sizes = [16, 198], strides = [1, 1]} : vector<26x198xf32> to vector<16x198xf32>
    %cst_106 = arith.constant 0.0899067521 : f32
    %405 = vector.broadcast %cst_106 : f32 to vector<16x198xf32>
    %406 = arith.mulf %405, %404 : vector<16x198xf32>
    %407 = arith.addf %403, %406 : vector<16x198xf32>
    %408 = vector.extract_strided_slice %396 {offsets = [3, 0], sizes = [16, 198], strides = [1, 1]} : vector<26x198xf32> to vector<16x198xf32>
    %cst_107 = arith.constant 0.0926448181 : f32
    %409 = vector.broadcast %cst_107 : f32 to vector<16x198xf32>
    %410 = arith.mulf %409, %408 : vector<16x198xf32>
    %411 = arith.addf %407, %410 : vector<16x198xf32>
    %412 = vector.extract_strided_slice %396 {offsets = [4, 0], sizes = [16, 198], strides = [1, 1]} : vector<26x198xf32> to vector<16x198xf32>
    %cst_108 = arith.constant 0.0945163741 : f32
    %413 = vector.broadcast %cst_108 : f32 to vector<16x198xf32>
    %414 = arith.mulf %413, %412 : vector<16x198xf32>
    %415 = arith.addf %411, %414 : vector<16x198xf32>
    %416 = vector.extract_strided_slice %396 {offsets = [5, 0], sizes = [16, 198], strides = [1, 1]} : vector<26x198xf32> to vector<16x198xf32>
    %cst_109 = arith.constant 0.0954662784 : f32
    %417 = vector.broadcast %cst_109 : f32 to vector<16x198xf32>
    %418 = arith.mulf %417, %416 : vector<16x198xf32>
    %419 = arith.addf %415, %418 : vector<16x198xf32>
    %420 = vector.extract_strided_slice %396 {offsets = [6, 0], sizes = [16, 198], strides = [1, 1]} : vector<26x198xf32> to vector<16x198xf32>
    %cst_110 = arith.constant 0.0954662784 : f32
    %421 = vector.broadcast %cst_110 : f32 to vector<16x198xf32>
    %422 = arith.mulf %421, %420 : vector<16x198xf32>
    %423 = arith.addf %419, %422 : vector<16x198xf32>
    %424 = vector.extract_strided_slice %396 {offsets = [7, 0], sizes = [16, 198], strides = [1, 1]} : vector<26x198xf32> to vector<16x198xf32>
    %cst_111 = arith.constant 0.0945163741 : f32
    %425 = vector.broadcast %cst_111 : f32 to vector<16x198xf32>
    %426 = arith.mulf %425, %424 : vector<16x198xf32>
    %427 = arith.addf %423, %426 : vector<16x198xf32>
    %428 = vector.extract_strided_slice %396 {offsets = [8, 0], sizes = [16, 198], strides = [1, 1]} : vector<26x198xf32> to vector<16x198xf32>
    %cst_112 = arith.constant 0.0926448181 : f32
    %429 = vector.broadcast %cst_112 : f32 to vector<16x198xf32>
    %430 = arith.mulf %429, %428 : vector<16x198xf32>
    %431 = arith.addf %427, %430 : vector<16x198xf32>
    %432 = vector.extract_strided_slice %396 {offsets = [9, 0], sizes = [16, 198], strides = [1, 1]} : vector<26x198xf32> to vector<16x198xf32>
    %cst_113 = arith.constant 0.0899067521 : f32
    %433 = vector.broadcast %cst_113 : f32 to vector<16x198xf32>
    %434 = arith.mulf %433, %432 : vector<16x198xf32>
    %435 = arith.addf %431, %434 : vector<16x198xf32>
    %436 = vector.extract_strided_slice %396 {offsets = [10, 0], sizes = [16, 198], strides = [1, 1]} : vector<26x198xf32> to vector<16x198xf32>
    %cst_114 = arith.constant 0.0863814577 : f32
    %437 = vector.broadcast %cst_114 : f32 to vector<16x198xf32>
    %438 = arith.mulf %437, %436 : vector<16x198xf32>
    %439 = arith.addf %435, %438 : vector<16x198xf32>
    %440 = arith.mulf %92, %92 : vector<16x198xf32>
    %441 = arith.mulf %178, %178 : vector<16x198xf32>
    %442 = arith.mulf %92, %178 : vector<16x198xf32>
    %443 = arith.subf %265, %440 : vector<16x198xf32>
    %444 = arith.subf %352, %441 : vector<16x198xf32>
    %445 = arith.subf %439, %442 : vector<16x198xf32>
    %cst_115 = arith.constant 2.000000e+00 : f32
    %446 = vector.broadcast %cst_115 : f32 to vector<16x198xf32>
    %447 = arith.mulf %446, %442 : vector<16x198xf32>
    %cst_116 = arith.constant 9.99999974E-5 : f32
    %448 = vector.broadcast %cst_116 : f32 to vector<16x198xf32>
    %449 = arith.addf %447, %448 : vector<16x198xf32>
    %cst_117 = arith.constant 2.000000e+00 : f32
    %450 = vector.broadcast %cst_117 : f32 to vector<16x198xf32>
    %451 = arith.mulf %450, %445 : vector<16x198xf32>
    %cst_118 = arith.constant 8.99999984E-4 : f32
    %452 = vector.broadcast %cst_118 : f32 to vector<16x198xf32>
    %453 = arith.addf %451, %452 : vector<16x198xf32>
    %454 = arith.mulf %449, %453 : vector<16x198xf32>
    %455 = arith.addf %440, %441 : vector<16x198xf32>
    %cst_119 = arith.constant 9.99999974E-5 : f32
    %456 = vector.broadcast %cst_119 : f32 to vector<16x198xf32>
    %457 = arith.addf %455, %456 : vector<16x198xf32>
    %458 = arith.addf %443, %444 : vector<16x198xf32>
    %cst_120 = arith.constant 8.99999984E-4 : f32
    %459 = vector.broadcast %cst_120 : f32 to vector<16x198xf32>
    %460 = arith.addf %458, %459 : vector<16x198xf32>
    %461 = arith.mulf %457, %460 : vector<16x198xf32>
    %462 = arith.divf %454, %461 : vector<16x198xf32>
    %c0_121 = arith.constant 0 : index
    %c0_122 = arith.constant 0 : index
    %463 = vector.load %arg5[%c0_121, %c0_122] : memref<16x198xf32, #tpu.memory_space<vmem>>, vector<16x198xf32>
    %c0_123 = arith.constant 0 : index
    %c0_124 = arith.constant 0 : index
    %464 = vector.load %arg1[%c0_123, %c0_124] : memref<16x198xf32, #tpu.memory_space<vmem>>, vector<16x198xf32>
    %465 = arith.mulf %462, %464 : vector<16x198xf32>
    %466 = arith.addf %463, %465 : vector<16x198xf32>
    %c0_125 = arith.constant 0 : index
    %c0_126 = arith.constant 0 : index
    %467 = vector.load %arg5[%c0_125, %c0_126] : memref<16x198xf32, #tpu.memory_space<vmem>>, vector<16x198xf32>
    tpu.vector_store %arg5[%c0_125, %c0_126], %466 {strides = array<i32>} : memref<16x198xf32, #tpu.memory_space<vmem>>, vector<16x198xf32>,
    %c0_i32_127 = arith.constant 0 : i32
    %468 = arith.cmpi eq, %arg0, %c0_i32_127 : i32
    %469 = arith.extui %468 : i1 to i32
    %c0_i32_128 = arith.constant 0 : i32
    %470 = arith.cmpi ne, %469, %c0_i32_128 : i32
    scf.if %470 {
      %c0_129 = arith.constant 0 : index
      %c0_130 = arith.constant 0 : index
      %471 = vector.load %arg4[%c0_129, %c0_130] : memref<1x1xf32, #tpu.memory_space<vmem>>, vector<1x1xf32>
      %c0_131 = arith.constant 0 : index
      %c0_132 = arith.constant 0 : index
      %472 = vector.load %arg5[%c0_131, %c0_132] : memref<16x198xf32, #tpu.memory_space<vmem>>, vector<16x198xf32>
      %473 = vector.shape_cast %472 : vector<16x198xf32> to vector<1x16x198xf32>
      %cst_133 = arith.constant dense<0.000000e+00> : vector<1xf32>
      %474 = vector.multi_reduction <add>, %473, %cst_133 [1, 2] : vector<1x16x198xf32> to vector<1xf32>
      %475 = vector.shape_cast %474 : vector<1xf32> to vector<1x1x1xf32>
      %476 = vector.extract %475[0, 0, 0] : f32 from vector<1x1x1xf32>
      %cst_134 = arith.constant 4.8828125E-4 : f32
      %477 = arith.mulf %476, %cst_134 : f32
      %478 = vector.broadcast %477 : f32 to vector<1x1xf32>
      %479 = arith.addf %471, %478 : vector<1x1xf32>
      %c0_135 = arith.constant 0 : index
      %c0_136 = arith.constant 0 : index
      %480 = vector.load %arg4[%c0_135, %c0_136] : memref<1x1xf32, #tpu.memory_space<vmem>>, vector<1x1xf32>
      tpu.vector_store %arg4[%c0_135, %c0_136], %479 {strides = array<i32>} : memref<1x1xf32, #tpu.memory_space<vmem>>, vector<1x1xf32>,
    } else {
    }
    return
  }
  func.func @transform_0(%arg0: i32) -> (i32, i32) {
    %c0_i32 = arith.constant 0 : i32
    %c0_i32_0 = arith.constant 0 : i32
    %c0_i32_1 = arith.constant 0 : i32
    return %c0_i32, %c0_i32_0 : i32, i32
  }
  func.func @transform_1(%arg0: i32) -> (i32, i32, i32) {
    %c0_i32 = arith.constant 0 : i32
    %c0_i32_0 = arith.constant 0 : i32
    %c0_i32_1 = arith.constant 0 : i32
    return %arg0, %c0_i32, %c0_i32_0 : i32, i32, i32
  }
  func.func @transform_2(%arg0: i32) -> (i32, i32, i32) {
    %c0_i32 = arith.constant 0 : i32
    %c0_i32_0 = arith.constant 0 : i32
    %c0_i32_1 = arith.constant 0 : i32
    return %arg0, %c0_i32, %c0_i32_0 : i32, i32, i32
  }
  func.func @transform_3(%arg0: i32) -> (i32, i32) {
    %c0_i32 = arith.constant 0 : i32
    %c0_i32_0 = arith.constant 0 : i32
    %c0_i32_1 = arith.constant 0 : i32
    return %c0_i32, %c0_i32_0 : i32, i32
  }
}

</mosaic_0001>

<bundles_post_ra>
// kernel: tpu_custom_call.1
= control target key start
LH: loop header
LB: loop body
LE: loop exit
PB: predicated region body
PF: predicated region fallthrough
CT: control target
= control target key end

     0   :  { %s3713_s20 = smov 127   ;;  %s3714_s29 = smov 126   ;;  %s8108_s0 = inlined_call_operand.vmem [shape: f32[16,198], index: 0, kind: input, shape index: {}]   ;;  %s8109_s1 = inlined_call_operand.vmem [shape: f32[1,26,208], index: 1, kind: input, shape index: {}]   ;;  %s8110_s2 = inlined_call_operand.vmem [shape: f32[1,26,208], index: 2, kind: input, shape index: {}]   ;;  %s8111_s3 = inlined_call_operand.hbm [shape: f32[1,1], index: 3, kind: output, shape index: {}]  }
   0x1   :  { %v3748_v0 = vld [vmem:[%s8109_s1 + $0x10] sm:$0xff]  ;;  %v3753_v1 = vld [vmem:[%s8109_s1] sm:$0xff]  ;;  %v3758_v2 = vld [vmem:[%s8109_s1 + $0x18] sm:$0xff] }
   0x2   :  { %v3761_v3 = vmul.f32 0.08638146, %v3748_v0  ;;  %v3764_v4 = vmul.f32 0.08638146, %v3753_v1  ;;  %v3769_v5 = vld [vmem:[%s8109_s1 + $0x8] sm:$0xff]  ;;  %v3789_v9 = vld [vmem:[%s8109_s1 + $0x20] sm:$0xff] }
   0x3   :  { %v3776_v6 = vmul.f32 0.08638146, %v3758_v2  ;;  %v3779_v7 = vmul.f32 0.08638146, %v3769_v5  ;;  %v3784_v8 = vld [vmem:[%s8109_s1 + $0x28] sm:$0xff] }
   0x4   :  { %70 = vrot.lane.b32.xlu1 %v3761_v3, %s3713_s20  ;;  %66 = vrot.lane.b32.xlu0 %v3764_v4, %s3713_s20  ;;  %v3796_v10 = vmul.f32 0.08638146, %v3784_v8  ;;  %v3799_v11 = vmul.f32 0.08638146, %v3789_v9  ;;  %v3804_v12 = vld [vmem:[%s8109_s1 + $0x38] sm:$0x3] }
   0x5   :  { %v3809_v13 = vld [vmem:[%s8109_s1 + $0x30] sm:$0x3]  ;;  %v3816_v14 = vmul.f32 0.08638146, %v3804_v12  ;;  %v3826_v16 = vmul.f32 0.08990675, %v3769_v5 }
   0x6   :  { %v3819_v15 = vmul.f32 0.08638146, %v3809_v13  ;;  %v3829_v17 = vmul.f32 0.08990675, %v3753_v1  ;;  %v3836_v18 = vmul.f32 0.08990675, %v3758_v2 }
   0x7   :  { %v3839_v19 = vmul.f32 0.08990675, %v3748_v0 }
   0x8   :  { %72 = vrot.lane.b32.xlu1 %v3776_v6, %s3713_s20  ;;  %68 = vrot.lane.b32.xlu0 %v3779_v7, %s3713_s20 }
   0xc   :  { %76 = vrot.lane.b32.xlu1 %v3796_v10, %s3713_s20  ;;  %74 = vrot.lane.b32.xlu0 %v3799_v11, %s3713_s20 }
  0x10   :  { %80 = vrot.lane.b32.xlu1 %v3816_v14, %s3713_s20  ;;  %78 = vrot.lane.b32.xlu0 %v3819_v15, %s3713_s20 }
  0x14   :  { %121 = vrot.lane.b32.xlu1 %v3826_v16, %s3714_s29  ;;  %119 = vrot.lane.b32.xlu0 %v3829_v17, %s3714_s29 }
  0x15   :  { %8 = vsyncpa [#allocation4], 0  ;;  %v3846_v20 = vmul.f32 0.08990675, %v3784_v8  ;;  %v3849_v21 = vmul.f32 0.08990675, %v3789_v9 }
  0x16   :  { %v3856_v22 = vmul.f32 0.08990675, %v3804_v12  ;;  %v3859_v23 = vmul.f32 0.08990675, %v3809_v13  ;;  %v3866_v24 = vmul.f32 0.09264482, %v3769_v5 }
  0x17   :  { %v3869_v25 = vmul.f32 0.09264482, %v3753_v1  ;;  %s3715_s30 = smov 125   ;;  %v3876_v26 = vmul.f32 0.09264482, %v3758_v2  ;;  %s3716_s4 = smov 124  }
  0x18   :  { %125 = vrot.lane.b32.xlu1 %v3836_v18, %s3714_s29  ;;  %123 = vrot.lane.b32.xlu0 %v3839_v19, %s3714_s29  ;;  %v3879_v27 = vmul.f32 0.09264482, %v3748_v0  ;;  %v3886_v28 = vmul.f32 0.09264482, %v3784_v8  ;;  %v3889_v29 = vmul.f32 0.09264482, %v3789_v9 }
  0x19   :  { %v3896_v30 = vmul.f32 0.09264482, %v3804_v12  ;;  %v3899_v31 = vmul.f32 0.09264482, %v3809_v13  ;;  %v210_v32 = vmul.f32 0.094516374, %v3769_v5 }
  0x1a   :  { %v209_v33 = vmul.f32 0.094516374, %v3753_v1  ;;  %v212_v34 = vmul.f32 0.094516374, %v3758_v2  ;;  %v211_v35 = vmul.f32 0.094516374, %v3748_v0 }
  0x1b   :  { %v214_v36 = vmul.f32 0.094516374, %v3784_v8  ;;  %v213_v37 = vmul.f32 0.094516374, %v3789_v9  ;;  %v216_v38 = vmul.f32 0.094516374, %v3804_v12 }
  0x1c   :  { %129 = vrot.lane.b32.xlu1 %v3846_v20, %s3714_s29  ;;  %127 = vrot.lane.b32.xlu0 %v3849_v21, %s3714_s29  ;;  %v215_v39 = vmul.f32 0.094516374, %v3809_v13  ;;  %v263_v40 = vmul.f32 0.09546628, %v3769_v5  ;;  %v262_v41 = vmul.f32 0.09546628, %v3753_v1 }
  0x1d   :  { %s3717_s5 = smov 123   ;;  %v265_v42 = vmul.f32 0.09546628, %v3758_v2  ;;  %v264_v43 = vmul.f32 0.09546628, %v3748_v0  ;;  %s3718_s6 = smov 122  }
  0x1e   :  { %v267_v44 = vmul.f32 0.09546628, %v3784_v8  ;;  %v266_v45 = vmul.f32 0.09546628, %v3789_v9  ;;  %v269_v46 = vmul.f32 0.09546628, %v3804_v12 }
  0x1f   :  { %v268_v47 = vmul.f32 0.09546628, %v3809_v13  ;;  %s3719_s7 = smov 121   ;;  %s3720_s8 = smov 120   ;;  %vm82_vm0 = vcmask 1039360   ;;  %vm135_vm1 = vcmask 1031168  }
  0x20   :  { %133 = vrot.lane.b32.xlu1 %v3856_v22, %s3714_s29  ;;  %131 = vrot.lane.b32.xlu0 %v3859_v23, %s3714_s29  ;;  %s3721_s9 = smov 119   ;;  %s3722_s10 = smov 118   ;;  %vm188_vm2 = vcmask 1022976   ;;  %vm241_vm3 = vcmask 1014784   ;;  %vm8286_vm4 = vcmask 1006592   ;;  %vm8285_vm5 = vcmask 998400  }
  0x21   :  { %vm368_vm6 = vcmask 990208   ;;  %vm405_vm7 = vcmask 982016   ;;  %vm8266_vm8 = vcmask 973824   ;;  %vm479_vm9 = vcmask 965632  }
  0x22   :  { %vm516_vm10 = vcmask 1046528   ;;  %vm547_vm11 = vcmask 1045504   ;;  %vm578_vm12 = vcmask 1044480   ;;  %vm609_vm13 = vcmask 1043456  }
  0x23   :  { %vm640_vm14 = vcmask 1042432   ;;  %vm659_vm15 = vcmask 1041408  }
  0x24   :  { %174 = vrot.lane.b32.xlu1 %v3866_v24, %s3715_s30  ;;  %172 = vrot.lane.b32.xlu0 %v3869_v25, %s3715_s30 }
  0x28   :  { %178 = vrot.lane.b32.xlu1 %v3876_v26, %s3715_s30  ;;  %176 = vrot.lane.b32.xlu0 %v3879_v27, %s3715_s30 }
  0x2c   :  { %182 = vrot.lane.b32.xlu1 %v3886_v28, %s3715_s30  ;;  %180 = vrot.lane.b32.xlu0 %v3889_v29, %s3715_s30 }
  0x30   :  { %186 = vrot.lane.b32.xlu1 %v3896_v30, %s3715_s30  ;;  %184 = vrot.lane.b32.xlu0 %v3899_v31, %s3715_s30 }
  0x34   :  { %227 = vrot.lane.b32.xlu1 %v210_v32, %s3716_s4  ;;  %225 = vrot.lane.b32.xlu0 %v209_v33, %s3716_s4 }
  0x38   :  { %231 = vrot.lane.b32.xlu1 %v212_v34, %s3716_s4  ;;  %229 = vrot.lane.b32.xlu0 %v211_v35, %s3716_s4 }
  0x3c   :  { %235 = vrot.lane.b32.xlu1 %v214_v36, %s3716_s4  ;;  %233 = vrot.lane.b32.xlu0 %v213_v37, %s3716_s4 }
  0x40   :  { %239 = vrot.lane.b32.xlu1 %v216_v38, %s3716_s4  ;;  %237 = vrot.lane.b32.xlu0 %v215_v39, %s3716_s4 }
  0x44   :  { %280 = vrot.lane.b32.xlu1 %v263_v40, %s3717_s5  ;;  %278 = vrot.lane.b32.xlu0 %v262_v41, %s3717_s5 }
  0x48   :  { %284 = vrot.lane.b32.xlu1 %v265_v42, %s3717_s5  ;;  %282 = vrot.lane.b32.xlu0 %v264_v43, %s3717_s5 }
  0x4c   :  { %288 = vrot.lane.b32.xlu1 %v267_v44, %s3717_s5  ;;  %286 = vrot.lane.b32.xlu0 %v266_v45, %s3717_s5 }
  0x50   :  { %292 = vrot.lane.b32.xlu1 %v269_v46, %s3717_s5  ;;  %290 = vrot.lane.b32.xlu0 %v268_v47, %s3717_s5 }
  0x54   :  { %317 = vrot.lane.b32.xlu1 %v263_v40, %s3718_s6  ;;  %315 = vrot.lane.b32.xlu0 %v262_v41, %s3718_s6 }
  0x58   :  { %321 = vrot.lane.b32.xlu1 %v265_v42, %s3718_s6  ;;  %319 = vrot.lane.b32.xlu0 %v264_v43, %s3718_s6 }
  0x5c   :  { %325 = vrot.lane.b32.xlu1 %v267_v44, %s3718_s6  ;;  %323 = vrot.lane.b32.xlu0 %v266_v45, %s3718_s6 }
  0x60   :  { %329 = vrot.lane.b32.xlu1 %v269_v46, %s3718_s6  ;;  %327 = vrot.lane.b32.xlu0 %v268_v47, %s3718_s6 }
  0x64   :  { %354 = vrot.lane.b32.xlu1 %v210_v32, %s3719_s7  ;;  %352 = vrot.lane.b32.xlu0 %v209_v33, %s3719_s7 }
  0x68   :  { %358 = vrot.lane.b32.xlu1 %v212_v34, %s3719_s7  ;;  %356 = vrot.lane.b32.xlu0 %v211_v35, %s3719_s7 }
  0x6c   :  { %362 = vrot.lane.b32.xlu1 %v214_v36, %s3719_s7  ;;  %360 = vrot.lane.b32.xlu0 %v213_v37, %s3719_s7 }
  0x70   :  { %366 = vrot.lane.b32.xlu1 %v216_v38, %s3719_s7  ;;  %364 = vrot.lane.b32.xlu0 %v215_v39, %s3719_s7 }
  0x74   :  { %391 = vrot.lane.b32.xlu1 %v3866_v24, %s3720_s8  ;;  %389 = vrot.lane.b32.xlu0 %v3869_v25, %s3720_s8  ;;  %v4088_v24 = vld [vmem:[%s8110_s2 + $0x28] sm:$0xff]  ;;  %v4093_v25 = vld [vmem:[%s8110_s2 + $0x20] sm:$0xff] }
  0x75   :  { %v4170_v46 = vmul.f32 0.08990675, %v4088_v24  ;;  %v4173_v47 = vmul.f32 0.08990675, %v4093_v25 }
  0x76   :  { %v3957_v48 = vpop.permute.xlu1 %70  ;;  %v3959_v49 = vpop.permute.xlu0 %66 }
  0x77   :  { %8402 = vst [vmem:[#allocation6_spill] sm:$0xff] %v3959_v49 }
  0x78   :  { %395 = vrot.lane.b32.xlu1 %v3876_v26, %s3720_s8  ;;  %393 = vrot.lane.b32.xlu0 %v3879_v27, %s3720_s8 }
  0x7a   :  { %v3965_v50 = vpop.permute.xlu1 %72  ;;  %v3967_v51 = vpop.permute.xlu0 %68 }
  0x7b   :  { %8403 = vst [vmem:[#allocation7_spill] sm:$0xff] %v3967_v51 }
  0x7c   :  { %399 = vrot.lane.b32.xlu1 %v3886_v28, %s3720_s8  ;;  %397 = vrot.lane.b32.xlu0 %v3889_v29, %s3720_s8  ;;  %v4104_v28 = vmul.f32 0.08638146, %v4088_v24  ;;  %v4107_v29 = vmul.f32 0.08638146, %v4093_v25 }
  0x7e   :  { %v3973_v52 = vpop.permute.xlu1 %76  ;;  %v3975_v53 = vpop.permute.xlu0 %74 }
  0x7f   :  { %8404 = vst [vmem:[#allocation8_spill] sm:$0xff] %v3973_v52  ;;  %8405 = vst [vmem:[#allocation9_spill] sm:$0xff] %v3975_v53 }
  0x80   :  { %403 = vrot.lane.b32.xlu1 %v3896_v30, %s3720_s8  ;;  %401 = vrot.lane.b32.xlu0 %v3899_v31, %s3720_s8  ;;  %v4112_v30 = vld [vmem:[%s8110_s2 + $0x38] sm:$0x3]  ;;  %v4117_v31 = vld [vmem:[%s8110_s2 + $0x30] sm:$0x3] }
  0x81   :  { %v4128_v34 = vmul.f32 0.08638146, %v4112_v30  ;;  %v4131_v35 = vmul.f32 0.08638146, %v4117_v31 }
  0x82   :  { %v3981_v54 = vpop.permute.xlu1 %80  ;;  %v3983_v55 = vpop.permute.xlu0 %78 }
  0x83   :  { %8406 = vst [vmem:[#allocation10_spill] sm:$0xff] %v3981_v54  ;;  %8407 = vst [vmem:[#allocation11_spill] sm:$0xff] %v3983_v55 }
  0x84   :  { %428 = vrot.lane.b32.xlu1 %v3826_v16, %s3721_s9  ;;  %426 = vrot.lane.b32.xlu0 %v3829_v17, %s3721_s9 }
  0x86   :  { %v3989_v56 = vpop.permute.xlu1 %121  ;;  %v3991_v57 = vpop.permute.xlu0 %119 }
  0x87   :  { %8408 = vst [vmem:[#allocation12_spill] sm:$0xff] %v3989_v56  ;;  %8409 = vst [vmem:[#allocation13_spill] sm:$0xff] %v3991_v57 }
  0x88   :  { %432 = vrot.lane.b32.xlu1 %v3836_v18, %s3721_s9  ;;  %430 = vrot.lane.b32.xlu0 %v3839_v19, %s3721_s9 }
  0x8a   :  { %v3997_v58 = vpop.permute.xlu1 %125  ;;  %v3999_v59 = vpop.permute.xlu0 %123 }
  0x8b   :  { %8410 = vst [vmem:[#allocation14_spill] sm:$0xff] %v3997_v58  ;;  %8411 = vst [vmem:[#allocation15_spill] sm:$0xff] %v3999_v59 }
  0x8c   :  { %436 = vrot.lane.b32.xlu1 %v3846_v20, %s3721_s9  ;;  %434 = vrot.lane.b32.xlu0 %v3849_v21, %s3721_s9  ;;  %v4064_v20 = vld [vmem:[%s8110_s2 + $0x18] sm:$0xff]  ;;  %v4069_v21 = vld [vmem:[%s8110_s2 + $0x10] sm:$0xff] }
  0x8d   :  { %v4156_v42 = vmul.f32 0.08990675, %v4064_v20  ;;  %v4159_v43 = vmul.f32 0.08990675, %v4069_v21 }
  0x8e   :  { %v4005_v60 = vpop.permute.xlu1 %129  ;;  %v4007_v61 = vpop.permute.xlu0 %127 }
  0x8f   :  { %8412 = vst [vmem:[#allocation16_spill] sm:$0xff] %v4005_v60  ;;  %8413 = vst [vmem:[#allocation17_spill] sm:$0xff] %v4007_v61 }
  0x90   :  { %440 = vrot.lane.b32.xlu1 %v3856_v22, %s3721_s9  ;;  %438 = vrot.lane.b32.xlu0 %v3859_v23, %s3721_s9  ;;  %v4083_v23 = vmul.f32 0.08638146, %v4069_v21 }
  0x92   :  { %v4013_v62 = vpop.permute.xlu1 %133  ;;  %v4015_v63 = vpop.permute.xlu0 %131 }
  0x93   :  { %8414 = vst [vmem:[#allocation18_spill] sm:$0xff] %v4013_v62  ;;  %8415 = vst [vmem:[#allocation19_spill] sm:$0xff] %v4015_v63 }
  0x94   :  { %465 = vrot.lane.b32.xlu1 %v3779_v7, %s3722_s10  ;;  %463 = vrot.lane.b32.xlu0 %v3764_v4, %s3722_s10  ;;  %v4040_v4 = vld [vmem:[%s8110_s2 + $0x8] sm:$0xff] }
  0x95   :  { %v4142_v38 = vmul.f32 0.08990675, %v4040_v4 }
  0x96   :  { %v4021_v16 = vpop.permute.xlu1 %174  ;;  %v4023_v17 = vpop.permute.xlu0 %172 }
  0x97   :  { %8416 = vst [vmem:[#allocation20_spill] sm:$0xff] %v4021_v16  ;;  %8417 = vst [vmem:[#allocation21_spill] sm:$0xff] %v4023_v17 }
  0x98   :  { %469 = vrot.lane.b32.xlu1 %v3776_v6, %s3722_s10  ;;  %467 = vrot.lane.b32.xlu0 %v3761_v3, %s3722_s10  ;;  %v4045_v6 = vld [vmem:[%s8110_s2] sm:$0xff] }
  0x99   :  { %v4145_v39 = vmul.f32 0.08990675, %v4045_v6 }
  0x9a   :  { %v4029_v18 = vpop.permute.xlu1 %178  ;;  %v4031_v19 = vpop.permute.xlu0 %176 }
  0x9b   :  { %8418 = vst [vmem:[#allocation22_spill] sm:$0xff] %v4029_v18  ;;  %8419 = vst [vmem:[#allocation23_spill] sm:$0xff] %v4031_v19 }
  0x9c   :  { %473 = vrot.lane.b32.xlu1 %v3796_v10, %s3722_s10  ;;  %471 = vrot.lane.b32.xlu0 %v3799_v11, %s3722_s10  ;;  %v4056_v10 = vmul.f32 0.08638146, %v4040_v4  ;;  %v4059_v11 = vmul.f32 0.08638146, %v4045_v6 }
  0x9e   :  { %v4047_v3 = vpop.permute.xlu1 %182  ;;  %v4049_v7 = vpop.permute.xlu0 %180 }
  0x9f   :  { %8420 = vst [vmem:[#allocation24_spill] sm:$0xff] %v4047_v3  ;;  %8421 = vst [vmem:[#allocation25_spill] sm:$0xff] %v4049_v7 }
  0xa0   :  { %477 = vrot.lane.b32.xlu1 %v3816_v14, %s3722_s10  ;;  %475 = vrot.lane.b32.xlu0 %v3819_v15, %s3722_s10  ;;  %v4080_v15 = vmul.f32 0.08638146, %v4064_v20 }
  0xa2   :  { %v4071_v14 = vpop.permute.xlu1 %186  ;;  %v4073_v22 = vpop.permute.xlu0 %184 }
  0xa3   :  { %8422 = vst [vmem:[#allocation26_spill] sm:$0xff] %v4071_v14  ;;  %8423 = vst [vmem:[#allocation27_spill] sm:$0xff] %v4073_v22 }
  0xa4   :  { %771 = vrot.lane.b32.xlu1 %v4056_v10, %s3713_s20  ;;  %769 = vrot.lane.b32.xlu0 %v4059_v11, %s3713_s20 }
  0xa6   :  { %v4095_v26 = vpop.permute.xlu1 %227  ;;  %v4097_v27 = vpop.permute.xlu0 %225 }
  0xa7   :  { %8424 = vst [vmem:[#allocation28_spill] sm:$0xff] %v4095_v26  ;;  %8425 = vst [vmem:[#allocation29_spill] sm:$0xff] %v4097_v27 }
  0xa8   :  { %775 = vrot.lane.b32.xlu1 %v4080_v15, %s3713_s20  ;;  %773 = vrot.lane.b32.xlu0 %v4083_v23, %s3713_s20 }
  0xaa   :  { %v4119_v32 = vpop.permute.xlu1 %231  ;;  %v4121_v33 = vpop.permute.xlu0 %229 }
  0xab   :  { %8426 = vst [vmem:[#allocation30_spill] sm:$0xff] %v4119_v32  ;;  %8427 = vst [vmem:[#allocation31_spill] sm:$0xff] %v4121_v33 }
  0xac   :  { %779 = vrot.lane.b32.xlu1 %v4104_v28, %s3713_s20  ;;  %777 = vrot.lane.b32.xlu0 %v4107_v29, %s3713_s20 }
  0xae   :  { %v4133_v36 = vpop.permute.xlu1 %235  ;;  %v4135_v37 = vpop.permute.xlu0 %233 }
  0xaf   :  { %8428 = vst [vmem:[#allocation32_spill] sm:$0xff] %v4133_v36  ;;  %8429 = vst [vmem:[#allocation33_spill] sm:$0xff] %v4135_v37 }
  0xb0   :  { %783 = vrot.lane.b32.xlu1 %v4128_v34, %s3713_s20  ;;  %781 = vrot.lane.b32.xlu0 %v4131_v35, %s3713_s20 }
  0xb2   :  { %v4147_v40 = vpop.permute.xlu1 %239  ;;  %v4149_v41 = vpop.permute.xlu0 %237 }
  0xb3   :  { %8430 = vst [vmem:[#allocation34_spill] sm:$0xff] %v4147_v40  ;;  %8431 = vst [vmem:[#allocation35_spill] sm:$0xff] %v4149_v41 }
  0xb4   :  { %823 = vrot.lane.b32.xlu1 %v4142_v38, %s3714_s29  ;;  %821 = vrot.lane.b32.xlu0 %v4145_v39, %s3714_s29 }
  0xb6   :  { %v4161_v44 = vpop.permute.xlu1 %280  ;;  %v4163_v45 = vpop.permute.xlu0 %278 }
  0xb7   :  { %8432 = vst [vmem:[#allocation36_spill] sm:$0xff] %v4161_v44  ;;  %8433 = vst [vmem:[#allocation37_spill] sm:$0xff] %v4163_v45  ;;  %v4184_v45 = vmul.f32 0.08990675, %v4112_v30  ;;  %v4187_v44 = vmul.f32 0.08990675, %v4117_v31 }
  0xb8   :  { %827 = vrot.lane.b32.xlu1 %v4156_v42, %s3714_s29  ;;  %825 = vrot.lane.b32.xlu0 %v4159_v43, %s3714_s29 }
  0xba   :  { %v4175_v41 = vpop.permute.xlu1 %284  ;;  %v4177_v40 = vpop.permute.xlu0 %282 }
  0xbb   :  { %8434 = vst [vmem:[#allocation38_spill] sm:$0xff] %v4175_v41  ;;  %8435 = vst [vmem:[#allocation39_spill] sm:$0xff] %v4177_v40  ;;  %v4198_v40 = vmul.f32 0.09264482, %v4040_v4  ;;  %v4201_v41 = vmul.f32 0.09264482, %v4045_v6 }
  0xbc   :  { %831 = vrot.lane.b32.xlu1 %v4170_v46, %s3714_s29  ;;  %829 = vrot.lane.b32.xlu0 %v4173_v47, %s3714_s29 }
  0xbe   :  { %v4189_v37 = vpop.permute.xlu1 %288  ;;  %v4191_v36 = vpop.permute.xlu0 %286 }
  0xbf   :  { %8436 = vst [vmem:[#allocation40_spill] sm:$0xff] %v4189_v37  ;;  %8437 = vst [vmem:[#allocation41_spill] sm:$0xff] %v4191_v36  ;;  %v4212_v36 = vmul.f32 0.09264482, %v4064_v20  ;;  %v4215_v37 = vmul.f32 0.09264482, %v4069_v21 }
  0xc0   :  { %835 = vrot.lane.b32.xlu1 %v4184_v45, %s3714_s29  ;;  %833 = vrot.lane.b32.xlu0 %v4187_v44, %s3714_s29 }
  0xc2   :  { %v4203_v33 = vpop.permute.xlu1 %292  ;;  %v4205_v32 = vpop.permute.xlu0 %290 }
  0xc3   :  { %8438 = vst [vmem:[#allocation42_spill] sm:$0xff] %v4203_v33  ;;  %8439 = vst [vmem:[#allocation43_spill] sm:$0xff] %v4205_v32  ;;  %v4226_v32 = vmul.f32 0.09264482, %v4088_v24  ;;  %v4229_v33 = vmul.f32 0.09264482, %v4093_v25 }
  0xc4   :  { %875 = vrot.lane.b32.xlu1 %v4198_v40, %s3715_s30  ;;  %873 = vrot.lane.b32.xlu0 %v4201_v41, %s3715_s30 }
  0xc6   :  { %v4217_v27 = vpop.permute.xlu1 %317  ;;  %v4219_v26 = vpop.permute.xlu0 %315 }
  0xc7   :  { %8440 = vst [vmem:[#allocation44_spill] sm:$0xff] %v4217_v27  ;;  %8441 = vst [vmem:[#allocation45_spill] sm:$0xff] %v4219_v26  ;;  %v4240_v26 = vmul.f32 0.09264482, %v4112_v30  ;;  %v4243_v27 = vmul.f32 0.09264482, %v4117_v31 }
  0xc8   :  { %879 = vrot.lane.b32.xlu1 %v4212_v36, %s3715_s30  ;;  %877 = vrot.lane.b32.xlu0 %v4215_v37, %s3715_s30 }
  0xca   :  { %v4231_v22 = vpop.permute.xlu1 %321  ;;  %v4233_v14 = vpop.permute.xlu0 %319 }
  0xcb   :  { %8442 = vst [vmem:[#allocation46_spill] sm:$0xff] %v4231_v22  ;;  %8443 = vst [vmem:[#allocation47_spill] sm:$0xff] %v4233_v14  ;;  %v4254_v14 = vmul.f32 0.094516374, %v4040_v4  ;;  %v4257_v22 = vmul.f32 0.094516374, %v4045_v6 }
  0xcc   :  { %883 = vrot.lane.b32.xlu1 %v4226_v32, %s3715_s30  ;;  %881 = vrot.lane.b32.xlu0 %v4229_v33, %s3715_s30 }
  0xce   :  { %v4245_v7 = vpop.permute.xlu1 %325  ;;  %v4247_v3 = vpop.permute.xlu0 %323 }
  0xcf   :  { %8444 = vst [vmem:[#allocation48_spill] sm:$0xff] %v4245_v7  ;;  %8445 = vst [vmem:[#allocation49_spill] sm:$0xff] %v4247_v3  ;;  %v4268_v3 = vmul.f32 0.094516374, %v4064_v20  ;;  %v4271_v7 = vmul.f32 0.094516374, %v4069_v21 }
  0xd0   :  { %887 = vrot.lane.b32.xlu1 %v4240_v26, %s3715_s30  ;;  %885 = vrot.lane.b32.xlu0 %v4243_v27, %s3715_s30 }
  0xd2   :  { %v4259_v19 = vpop.permute.xlu1 %329  ;;  %v4261_v18 = vpop.permute.xlu0 %327 }
  0xd3   :  { %8446 = vst [vmem:[#allocation50_spill] sm:$0xff] %v4259_v19  ;;  %8447 = vst [vmem:[#allocation51_spill] sm:$0xff] %v4261_v18  ;;  %v914_v18 = vmul.f32 0.094516374, %v4088_v24  ;;  %v913_v19 = vmul.f32 0.094516374, %v4093_v25 }
  0xd4   :  { %927 = vrot.lane.b32.xlu1 %v4254_v14, %s3716_s4  ;;  %925 = vrot.lane.b32.xlu0 %v4257_v22, %s3716_s4 }
  0xd6   :  { %v4273_v17 = vpop.permute.xlu1 %354  ;;  %v4275_v16 = vpop.permute.xlu0 %352 }
  0xd7   :  { %8448 = vst [vmem:[#allocation52_spill] sm:$0xff] %v4273_v17  ;;  %8449 = vst [vmem:[#allocation53_spill] sm:$0xff] %v4275_v16  ;;  %v916_v16 = vmul.f32 0.094516374, %v4112_v30  ;;  %v915_v17 = vmul.f32 0.094516374, %v4117_v31 }
  0xd8   :  { %931 = vrot.lane.b32.xlu1 %v4268_v3, %s3716_s4  ;;  %929 = vrot.lane.b32.xlu0 %v4271_v7, %s3716_s4 }
  0xda   :  { %v4283_v63 = vpop.permute.xlu1 %358  ;;  %v4285_v62 = vpop.permute.xlu0 %356 }
  0xdb   :  { %8450 = vst [vmem:[#allocation54_spill] sm:$0xff] %v4283_v63  ;;  %8451 = vst [vmem:[#allocation55_spill] sm:$0xff] %v4285_v62  ;;  %v962_v63 = vmul.f32 0.09546628, %v4040_v4  ;;  %v961_v62 = vmul.f32 0.09546628, %v4045_v6 }
  0xdc   :  { %935 = vrot.lane.b32.xlu1 %v914_v18, %s3716_s4  ;;  %933 = vrot.lane.b32.xlu0 %v913_v19, %s3716_s4 }
  0xde   :  { %v4291_v61 = vpop.permute.xlu1 %362  ;;  %v4293_v60 = vpop.permute.xlu0 %360 }
  0xdf   :  { %8452 = vst [vmem:[#allocation56_spill] sm:$0xff] %v4291_v61  ;;  %8453 = vst [vmem:[#allocation57_spill] sm:$0xff] %v4293_v60  ;;  %v964_v61 = vmul.f32 0.09546628, %v4064_v20  ;;  %v963_v60 = vmul.f32 0.09546628, %v4069_v21 }
  0xe0   :  { %939 = vrot.lane.b32.xlu1 %v916_v16, %s3716_s4  ;;  %937 = vrot.lane.b32.xlu0 %v915_v17, %s3716_s4 }
  0xe2   :  { %v4299_v59 = vpop.permute.xlu1 %366  ;;  %v4301_v58 = vpop.permute.xlu0 %364 }
  0xe3   :  { %8454 = vst [vmem:[#allocation58_spill] sm:$0xff] %v4299_v59  ;;  %8455 = vst [vmem:[#allocation59_spill] sm:$0xff] %v4301_v58  ;;  %v966_v59 = vmul.f32 0.09546628, %v4088_v24  ;;  %v965_v58 = vmul.f32 0.09546628, %v4093_v25 }
  0xe4   :  { %979 = vrot.lane.b32.xlu1 %v962_v63, %s3717_s5  ;;  %977 = vrot.lane.b32.xlu0 %v961_v62, %s3717_s5 }
  0xe6   :  { %v4307_v57 = vpop.permute.xlu1 %391  ;;  %v4309_v56 = vpop.permute.xlu0 %389 }
  0xe7   :  { %8456 = vst [vmem:[#allocation60_spill] sm:$0xff] %v4307_v57  ;;  %8457 = vst [vmem:[#allocation61_spill] sm:$0xff] %v4309_v56  ;;  %v968_v57 = vmul.f32 0.09546628, %v4112_v30  ;;  %v967_v56 = vmul.f32 0.09546628, %v4117_v31 }
  0xe8   :  { %983 = vrot.lane.b32.xlu1 %v964_v61, %s3717_s5  ;;  %981 = vrot.lane.b32.xlu0 %v963_v60, %s3717_s5 }
  0xea   :  { %v4315_v55 = vpop.permute.xlu1 %395  ;;  %v4317_v54 = vpop.permute.xlu0 %393 }
  0xeb   :  { %8458 = vst [vmem:[#allocation62_spill] sm:$0xff] %v4315_v55  ;;  %8459 = vst [vmem:[#allocation63_spill] sm:$0xff] %v4317_v54 }
  0xec   :  { %987 = vrot.lane.b32.xlu1 %v966_v59, %s3717_s5  ;;  %985 = vrot.lane.b32.xlu0 %v965_v58, %s3717_s5 }
  0xee   :  { %v4323_v53 = vpop.permute.xlu1 %399  ;;  %v4325_v52 = vpop.permute.xlu0 %397 }
  0xef   :  { %8460 = vst [vmem:[#allocation64_spill] sm:$0xff] %v4323_v53  ;;  %8461 = vst [vmem:[#allocation65_spill] sm:$0xff] %v4325_v52 }
  0xf0   :  { %991 = vrot.lane.b32.xlu1 %v968_v57, %s3717_s5  ;;  %989 = vrot.lane.b32.xlu0 %v967_v56, %s3717_s5 }
  0xf2   :  { %v4329_v49 = vpop.permute.xlu1 %403  ;;  %v4331_v55 = vpop.permute.xlu0 %401 }
  0xf3   :  { %8462 = vst [vmem:[#allocation66_spill] sm:$0xff] %v4329_v49  ;;  %8463 = vst [vmem:[#allocation67_spill] sm:$0xff] %v4331_v55 }
  0xf4   :  { %1015 = vrot.lane.b32.xlu1 %v962_v63, %s3718_s6  ;;  %1013 = vrot.lane.b32.xlu0 %v961_v62, %s3718_s6 }
  0xf6   :  { %v4335_v54 = vpop.permute.xlu1 %428  ;;  %v4337_v51 = vpop.permute.xlu0 %426 }
  0xf8   :  { %1019 = vrot.lane.b32.xlu1 %v964_v61, %s3718_s6  ;;  %1017 = vrot.lane.b32.xlu0 %v963_v60, %s3718_s6 }
  0xfa   :  { %v4341_v52 = vpop.permute.xlu1 %432  ;;  %v4343_v53 = vpop.permute.xlu0 %430 }
  0xfc   :  { %1023 = vrot.lane.b32.xlu1 %v966_v59, %s3718_s6  ;;  %1021 = vrot.lane.b32.xlu0 %v965_v58, %s3718_s6 }
  0xfe   :  { %v4347_v55 = vpop.permute.xlu1 %436  ;;  %v4349_v63 = vpop.permute.xlu0 %434 }
  0xff   :  { %8464 = vst [vmem:[#allocation68_spill] sm:$0xff] %v4349_v63 }
 0x100   :  { %1027 = vrot.lane.b32.xlu1 %v968_v57, %s3718_s6  ;;  %1025 = vrot.lane.b32.xlu0 %v967_v56, %s3718_s6 }
 0x102   :  { %v4353_v62 = vpop.permute.xlu1 %440  ;;  %v4355_v61 = vpop.permute.xlu0 %438 }
 0x103   :  { %8465 = vst [vmem:[#allocation69_spill] sm:$0xff] %v4353_v62  ;;  %8466 = vst [vmem:[#allocation70_spill] sm:$0xff] %v4355_v61 }
 0x104   :  { %1051 = vrot.lane.b32.xlu1 %v4254_v14, %s3719_s7  ;;  %1049 = vrot.lane.b32.xlu0 %v4257_v22, %s3719_s7 }
 0x106   :  { %v4361_v59 = vpop.permute.xlu1 %465  ;;  %v4363_v58 = vpop.permute.xlu0 %463 }
 0x107   :  { %8467 = vst [vmem:[#allocation71_spill] sm:$0xff] %v4361_v59  ;;  %8468 = vst [vmem:[#allocation72_spill] sm:$0xff] %v4363_v58 }
 0x108   :  { %1055 = vrot.lane.b32.xlu1 %v4268_v3, %s3719_s7  ;;  %1053 = vrot.lane.b32.xlu0 %v4271_v7, %s3719_s7 }
 0x10a   :  { %v4369_v56 = vpop.permute.xlu1 %469  ;;  %v4371_v57 = vpop.permute.xlu0 %467 }
 0x10b   :  { %8469 = vst [vmem:[#allocation73_spill] sm:$0xff] %v4371_v57 }
 0x10c   :  { %1059 = vrot.lane.b32.xlu1 %v914_v18, %s3719_s7  ;;  %1057 = vrot.lane.b32.xlu0 %v913_v19, %s3719_s7 }
 0x10e   :  { %v4375_v60 = vpop.permute.xlu1 %473  ;;  %v4377_v14 = vpop.permute.xlu0 %471 }
 0x10f   :  { %8470 = vst [vmem:[#allocation74_spill] sm:$0xff] %v4375_v60  ;;  %8471 = vst [vmem:[#allocation75_spill] sm:$0xff] %v4377_v14 }
 0x110   :  { %1063 = vrot.lane.b32.xlu1 %v916_v16, %s3719_s7  ;;  %1061 = vrot.lane.b32.xlu0 %v915_v17, %s3719_s7 }
 0x112   :  { %v4381_v3 = vpop.permute.xlu1 %477  ;;  %v4383_v22 = vpop.permute.xlu0 %475 }
 0x113   :  { %8472 = vst [vmem:[#allocation76_spill] sm:$0xff] %v4381_v3  ;;  %8473 = vst [vmem:[#allocation77_spill] sm:$0xff] %v4383_v22 }
 0x114   :  { %1087 = vrot.lane.b32.xlu1 %v4198_v40, %s3720_s8  ;;  %1085 = vrot.lane.b32.xlu0 %v4201_v41, %s3720_s8 }
 0x116   :  { %v4389_v18 = vpop.permute.xlu1 %771  ;;  %v4391_v19 = vpop.permute.xlu0 %769 }
 0x117   :  { %8474 = vst [vmem:[#allocation78_spill] sm:$0xff] %v4389_v18  ;;  %8475 = vst [vmem:[#allocation79_spill] sm:$0xff] %v4391_v19 }
 0x118   :  { %1091 = vrot.lane.b32.xlu1 %v4212_v36, %s3720_s8  ;;  %1089 = vrot.lane.b32.xlu0 %v4215_v37, %s3720_s8 }
 0x11a   :  { %v4397_v16 = vpop.permute.xlu1 %775  ;;  %v4399_v17 = vpop.permute.xlu0 %773 }
 0x11b   :  { %8476 = vst [vmem:[#allocation80_spill] sm:$0xff] %v4397_v16  ;;  %8477 = vst [vmem:[#allocation81_spill] sm:$0xff] %v4399_v17 }
 0x11c   :  { %1095 = vrot.lane.b32.xlu1 %v4226_v32, %s3720_s8  ;;  %1093 = vrot.lane.b32.xlu0 %v4229_v33, %s3720_s8 }
 0x11e   :  { %v4405_v7 = vpop.permute.xlu1 %779  ;;  %v4407_v40 = vpop.permute.xlu0 %777 }
 0x11f   :  { %8478 = vst [vmem:[#allocation82_spill] sm:$0xff] %v4405_v7  ;;  %8479 = vst [vmem:[#allocation83_spill] sm:$0xff] %v4407_v40 }
 0x120   :  { %1099 = vrot.lane.b32.xlu1 %v4240_v26, %s3720_s8  ;;  %1097 = vrot.lane.b32.xlu0 %v4243_v27, %s3720_s8 }
 0x122   :  { %v4413_v36 = vpop.permute.xlu1 %783  ;;  %v4415_v37 = vpop.permute.xlu0 %781 }
 0x123   :  { %8480 = vst [vmem:[#allocation84_spill] sm:$0xff] %v4413_v36  ;;  %8481 = vst [vmem:[#allocation85_spill] sm:$0xff] %v4415_v37 }
 0x124   :  { %1123 = vrot.lane.b32.xlu1 %v4142_v38, %s3721_s9  ;;  %1121 = vrot.lane.b32.xlu0 %v4145_v39, %s3721_s9 }
 0x126   :  { %v4421_v32 = vpop.permute.xlu1 %823  ;;  %v4423_v33 = vpop.permute.xlu0 %821 }
 0x127   :  { %8482 = vst [vmem:[#allocation86_spill] sm:$0xff] %v4421_v32  ;;  %8483 = vst [vmem:[#allocation87_spill] sm:$0xff] %v4423_v33 }
 0x128   :  { %1127 = vrot.lane.b32.xlu1 %v4156_v42, %s3721_s9  ;;  %1125 = vrot.lane.b32.xlu0 %v4159_v43, %s3721_s9 }
 0x12a   :  { %v4429_v26 = vpop.permute.xlu1 %827  ;;  %v4431_v27 = vpop.permute.xlu0 %825 }
 0x12b   :  { %8484 = vst [vmem:[#allocation88_spill] sm:$0xff] %v4429_v26  ;;  %8485 = vst [vmem:[#allocation89_spill] sm:$0xff] %v4431_v27 }
 0x12c   :  { %1131 = vrot.lane.b32.xlu1 %v4170_v46, %s3721_s9  ;;  %1129 = vrot.lane.b32.xlu0 %v4173_v47, %s3721_s9 }
 0x12e   :  { %v4437_v38 = vpop.permute.xlu1 %831  ;;  %v4439_v39 = vpop.permute.xlu0 %829 }
 0x12f   :  { %8486 = vst [vmem:[#allocation90_spill] sm:$0xff] %v4437_v38  ;;  %8487 = vst [vmem:[#allocation91_spill] sm:$0xff] %v4439_v39 }
 0x130   :  { %1135 = vrot.lane.b32.xlu1 %v4184_v45, %s3721_s9  ;;  %1133 = vrot.lane.b32.xlu0 %v4187_v44, %s3721_s9 }
 0x132   :  { %v4445_v41 = vpop.permute.xlu1 %835  ;;  %v4447_v42 = vpop.permute.xlu0 %833 }
 0x133   :  { %8488 = vst [vmem:[#allocation92_spill] sm:$0xff] %v4445_v41  ;;  %8489 = vst [vmem:[#allocation93_spill] sm:$0xff] %v4447_v42 }
 0x134   :  { %1159 = vrot.lane.b32.xlu1 %v4056_v10, %s3722_s10  ;;  %1157 = vrot.lane.b32.xlu0 %v4059_v11, %s3722_s10  ;;  %v4469_v10 = vmul.f32 %v3769_v5, %v3769_v5  ;;  %v4475_v11 = vmul.f32 %v3753_v1, %v3753_v1  ;;  %v4488_v5 = vmul.f32 %v3758_v2, %v3758_v2 }
 0x136   :  { %v4453_v43 = vpop.permute.xlu1 %875  ;;  %v4455_v46 = vpop.permute.xlu0 %873  ;;  %8494 = vst [vmem:[#allocation98_spill] sm:$0xff] %v4469_v10  ;;  %8495 = vst [vmem:[#allocation99_spill] sm:$0xff] %v4475_v11  ;;  %v4493_v1 = vmul.f32 0.08638146, %v4475_v11  ;;  %v4506_v2 = vmul.f32 0.08638146, %v4488_v5 }
 0x137   :  { %8490 = vst [vmem:[#allocation94_spill] sm:$0xff] %v4453_v43  ;;  %8491 = vst [vmem:[#allocation95_spill] sm:$0xff] %v4455_v46  ;;  %v1656_v57 = vmul.f32 0.09546628, %v4469_v10  ;;  %v1658_v49 = vmul.f32 0.09546628, %v4488_v5 }
 0x138   :  { %1163 = vrot.lane.b32.xlu1 %v4080_v15, %s3722_s10  ;;  %1161 = vrot.lane.b32.xlu0 %v4083_v23, %s3722_s10  ;;  %8498 = vst [vmem:[#allocation102_spill] sm:$0xff] %v4488_v5 }
 0x13a   :  { %v4461_v44 = vpop.permute.xlu1 %879  ;;  %v4463_v45 = vpop.permute.xlu0 %877 }
 0x13b   :  { %8492 = vst [vmem:[#allocation96_spill] sm:$0xff] %v4461_v44  ;;  %8493 = vst [vmem:[#allocation97_spill] sm:$0xff] %v4463_v45 }
 0x13c   :  { %1167 = vrot.lane.b32.xlu1 %v4104_v28, %s3722_s10  ;;  %1165 = vrot.lane.b32.xlu0 %v4107_v29, %s3722_s10  ;;  %v4484_v28 = vmul.f32 0.08638146, %v4469_v10  ;;  %v4497_v29 = vmul.f32 %v3748_v0, %v3748_v0 }
 0x13e   :  { %v4477_v15 = vpop.permute.xlu1 %883  ;;  %v4479_v23 = vpop.permute.xlu0 %881  ;;  %8499 = vst [vmem:[#allocation103_spill] sm:$0xff] %v4497_v29  ;;  %v4515_v0 = vmul.f32 0.08638146, %v4497_v29 }
 0x13f   :  { %8496 = vst [vmem:[#allocation100_spill] sm:$0xff] %v4477_v15  ;;  %8497 = vst [vmem:[#allocation101_spill] sm:$0xff] %v4479_v23  ;;  %v4532_v15 = vmul.f32 %v3804_v12, %v3804_v12 }
 0x140   :  { %1171 = vrot.lane.b32.xlu1 %v4128_v34, %s3722_s10  ;;  %1169 = vrot.lane.b32.xlu0 %v4131_v35, %s3722_s10  ;;  %v4510_v35 = vmul.f32 %v3784_v8, %v3784_v8 }
 0x141   :  { %8506 = vst [vmem:[#allocation110_spill] sm:$0xff] %v4532_v15  ;;  %v4550_v12 = vmul.f32 0.08638146, %v4532_v15 }
 0x142   :  { %v4499_v47 = vpop.permute.xlu1 %887  ;;  %v4501_v34 = vpop.permute.xlu0 %885  ;;  %8502 = vst [vmem:[#allocation106_spill] sm:$0xff] %v4510_v35  ;;  %v4528_v8 = vmul.f32 0.08638146, %v4510_v35 }
 0x143   :  { %8500 = vst [vmem:[#allocation104_spill] sm:$0xff] %v4499_v47  ;;  %8501 = vst [vmem:[#allocation105_spill] sm:$0xff] %v4501_v34  ;;  %v4519_v47 = vmul.f32 %v3789_v9, %v3789_v9 }
 0x144   :  { %1465 = vrot.lane.b32.xlu1 %v4484_v28, %s3713_s20  ;;  %1463 = vrot.lane.b32.xlu0 %v4493_v1, %s3713_s20 }
 0x145   :  { %8503 = vst [vmem:[#allocation107_spill] sm:$0xff] %v4519_v47  ;;  %v4537_v9 = vmul.f32 0.08638146, %v4519_v47 }
 0x146   :  { %v4521_v34 = vpop.permute.xlu1 %927  ;;  %v4523_v23 = vpop.permute.xlu0 %925 }
 0x147   :  { %8504 = vst [vmem:[#allocation108_spill] sm:$0xff] %v4521_v34  ;;  %8505 = vst [vmem:[#allocation109_spill] sm:$0xff] %v4523_v23  ;;  %v4541_v34 = vmul.f32 %v3809_v13, %v3809_v13 }
 0x148   :  { %1469 = vrot.lane.b32.xlu1 %v4506_v2, %s3713_s20  ;;  %1467 = vrot.lane.b32.xlu0 %v4515_v0, %s3713_s20 }
 0x149   :  { %8507 = vst [vmem:[#allocation111_spill] sm:$0xff] %v4541_v34  ;;  %v4555_v44 = vmul.f32 0.08638146, %v4541_v34 }
 0x14a   :  { %v4543_v23 = vpop.permute.xlu1 %931  ;;  %v4545_v45 = vpop.permute.xlu0 %929 }
 0x14b   :  { %8508 = vst [vmem:[#allocation112_spill] sm:$0xff] %v4543_v23  ;;  %8509 = vst [vmem:[#allocation113_spill] sm:$0xff] %v4545_v45  ;;  %v4564_v45 = vmul.f32 0.08990675, %v4469_v10  ;;  %v4569_v23 = vmul.f32 0.08990675, %v4475_v11 }
 0x14c   :  { %1473 = vrot.lane.b32.xlu1 %v4528_v8, %s3713_s20  ;;  %1471 = vrot.lane.b32.xlu0 %v4537_v9, %s3713_s20 }
 0x14e   :  { %v4557_v46 = vpop.permute.xlu1 %935  ;;  %v4559_v13 = vpop.permute.xlu0 %933 }
 0x14f   :  { %8510 = vst [vmem:[#allocation114_spill] sm:$0xff] %v4557_v46  ;;  %8511 = vst [vmem:[#allocation115_spill] sm:$0xff] %v4559_v13  ;;  %v4578_v13 = vmul.f32 0.08990675, %v4488_v5  ;;  %v4583_v46 = vmul.f32 0.08990675, %v4497_v29 }
 0x150   :  { %1477 = vrot.lane.b32.xlu1 %v4550_v12, %s3713_s20  ;;  %1475 = vrot.lane.b32.xlu0 %v4555_v44, %s3713_s20 }
 0x152   :  { %v4571_v43 = vpop.permute.xlu1 %939  ;;  %v4573_v42 = vpop.permute.xlu0 %937 }
 0x153   :  { %8512 = vst [vmem:[#allocation116_spill] sm:$0xff] %v4571_v43  ;;  %8513 = vst [vmem:[#allocation117_spill] sm:$0xff] %v4573_v42  ;;  %v4592_v42 = vmul.f32 0.08990675, %v4510_v35  ;;  %v4597_v43 = vmul.f32 0.08990675, %v4519_v47 }
 0x154   :  { %1517 = vrot.lane.b32.xlu1 %v4564_v45, %s3714_s29  ;;  %1515 = vrot.lane.b32.xlu0 %v4569_v23, %s3714_s29 }
 0x156   :  { %v4585_v41 = vpop.permute.xlu1 %979  ;;  %v4587_v39 = vpop.permute.xlu0 %977 }
 0x157   :  { %8514 = vst [vmem:[#allocation118_spill] sm:$0xff] %v4585_v41  ;;  %8515 = vst [vmem:[#allocation119_spill] sm:$0xff] %v4587_v39  ;;  %v4606_v39 = vmul.f32 0.08990675, %v4532_v15  ;;  %v4611_v41 = vmul.f32 0.08990675, %v4541_v34 }
 0x158   :  { %1521 = vrot.lane.b32.xlu1 %v4578_v13, %s3714_s29  ;;  %1519 = vrot.lane.b32.xlu0 %v4583_v46, %s3714_s29 }
 0x15a   :  { %v4599_v38 = vpop.permute.xlu1 %983  ;;  %v4601_v27 = vpop.permute.xlu0 %981 }
 0x15b   :  { %8516 = vst [vmem:[#allocation120_spill] sm:$0xff] %v4599_v38  ;;  %8517 = vst [vmem:[#allocation121_spill] sm:$0xff] %v4601_v27  ;;  %v4620_v27 = vmul.f32 0.09264482, %v4469_v10  ;;  %v4625_v38 = vmul.f32 0.09264482, %v4475_v11 }
 0x15c   :  { %1525 = vrot.lane.b32.xlu1 %v4592_v42, %s3714_s29  ;;  %1523 = vrot.lane.b32.xlu0 %v4597_v43, %s3714_s29 }
 0x15e   :  { %v4613_v26 = vpop.permute.xlu1 %987  ;;  %v4615_v33 = vpop.permute.xlu0 %985 }
 0x15f   :  { %8518 = vst [vmem:[#allocation122_spill] sm:$0xff] %v4613_v26  ;;  %8519 = vst [vmem:[#allocation123_spill] sm:$0xff] %v4615_v33  ;;  %v4634_v33 = vmul.f32 0.09264482, %v4488_v5  ;;  %v4639_v26 = vmul.f32 0.09264482, %v4497_v29 }
 0x160   :  { %1529 = vrot.lane.b32.xlu1 %v4606_v39, %s3714_s29  ;;  %1527 = vrot.lane.b32.xlu0 %v4611_v41, %s3714_s29 }
 0x162   :  { %v4627_v32 = vpop.permute.xlu1 %991  ;;  %v4629_v37 = vpop.permute.xlu0 %989 }
 0x163   :  { %8520 = vst [vmem:[#allocation124_spill] sm:$0xff] %v4627_v32  ;;  %8521 = vst [vmem:[#allocation125_spill] sm:$0xff] %v4629_v37  ;;  %v4648_v37 = vmul.f32 0.09264482, %v4510_v35  ;;  %v4653_v32 = vmul.f32 0.09264482, %v4519_v47 }
 0x164   :  { %1569 = vrot.lane.b32.xlu1 %v4620_v27, %s3715_s30  ;;  %1567 = vrot.lane.b32.xlu0 %v4625_v38, %s3715_s30 }
 0x166   :  { %v4641_v36 = vpop.permute.xlu1 %1015  ;;  %v4643_v40 = vpop.permute.xlu0 %1013 }
 0x167   :  { %8522 = vst [vmem:[#allocation126_spill] sm:$0xff] %v4641_v36  ;;  %8523 = vst [vmem:[#allocation127_spill] sm:$0xff] %v4643_v40  ;;  %v4662_v40 = vmul.f32 0.09264482, %v4532_v15  ;;  %v4667_v36 = vmul.f32 0.09264482, %v4541_v34 }
 0x168   :  { %1573 = vrot.lane.b32.xlu1 %v4634_v33, %s3715_s30  ;;  %1571 = vrot.lane.b32.xlu0 %v4639_v26, %s3715_s30 }
 0x16a   :  { %v4655_v7 = vpop.permute.xlu1 %1019  ;;  %v4657_v17 = vpop.permute.xlu0 %1017 }
 0x16b   :  { %8524 = vst [vmem:[#allocation128_spill] sm:$0xff] %v4655_v7  ;;  %8525 = vst [vmem:[#allocation129_spill] sm:$0xff] %v4657_v17  ;;  %v4676_v17 = vmul.f32 0.094516374, %v4469_v10  ;;  %v4681_v7 = vmul.f32 0.094516374, %v4475_v11 }
 0x16c   :  { %1577 = vrot.lane.b32.xlu1 %v4648_v37, %s3715_s30  ;;  %1575 = vrot.lane.b32.xlu0 %v4653_v32, %s3715_s30 }
 0x16e   :  { %v4669_v16 = vpop.permute.xlu1 %1023  ;;  %v4671_v19 = vpop.permute.xlu0 %1021 }
 0x16f   :  { %8526 = vst [vmem:[#allocation130_spill] sm:$0xff] %v4669_v16  ;;  %8527 = vst [vmem:[#allocation131_spill] sm:$0xff] %v4671_v19  ;;  %v4690_v19 = vmul.f32 0.094516374, %v4488_v5  ;;  %v4695_v16 = vmul.f32 0.094516374, %v4497_v29 }
 0x170   :  { %1581 = vrot.lane.b32.xlu1 %v4662_v40, %s3715_s30  ;;  %1579 = vrot.lane.b32.xlu0 %v4667_v36, %s3715_s30 }
 0x172   :  { %v4683_v18 = vpop.permute.xlu1 %1027  ;;  %v4685_v22 = vpop.permute.xlu0 %1025 }
 0x173   :  { %8528 = vst [vmem:[#allocation132_spill] sm:$0xff] %v4683_v18  ;;  %8529 = vst [vmem:[#allocation133_spill] sm:$0xff] %v4685_v22  ;;  %v1608_v22 = vmul.f32 0.094516374, %v4510_v35  ;;  %v1607_v18 = vmul.f32 0.094516374, %v4519_v47 }
 0x174   :  { %1621 = vrot.lane.b32.xlu1 %v4676_v17, %s3716_s4  ;;  %1619 = vrot.lane.b32.xlu0 %v4681_v7, %s3716_s4 }
 0x176   :  { %v4697_v3 = vpop.permute.xlu1 %1051  ;;  %v4699_v14 = vpop.permute.xlu0 %1049 }
 0x177   :  { %8530 = vst [vmem:[#allocation134_spill] sm:$0xff] %v4697_v3  ;;  %8531 = vst [vmem:[#allocation135_spill] sm:$0xff] %v4699_v14  ;;  %v1610_v3 = vmul.f32 0.094516374, %v4532_v15  ;;  %v1609_v14 = vmul.f32 0.094516374, %v4541_v34 }
 0x178   :  { %1625 = vrot.lane.b32.xlu1 %v4690_v19, %s3716_s4  ;;  %1623 = vrot.lane.b32.xlu0 %v4695_v16, %s3716_s4 }
 0x17a   :  { %v4707_v61 = vpop.permute.xlu1 %1055  ;;  %v4709_v62 = vpop.permute.xlu0 %1053 }
 0x17b   :  { %8532 = vst [vmem:[#allocation136_spill] sm:$0xff] %v4707_v61  ;;  %8533 = vst [vmem:[#allocation137_spill] sm:$0xff] %v4709_v62  ;;  %v1655_v62 = vmul.f32 0.09546628, %v4475_v11  ;;  %v1660_v11 = vmul.f32 0.09546628, %v4510_v35 }
 0x17c   :  { %1629 = vrot.lane.b32.xlu1 %v1608_v22, %s3716_s4  ;;  %1627 = vrot.lane.b32.xlu0 %v1607_v18, %s3716_s4 }
 0x17e   :  { %v4715_v60 = vpop.permute.xlu1 %1059  ;;  %v4717_v58 = vpop.permute.xlu0 %1057 }
 0x17f   :  { %8534 = vst [vmem:[#allocation138_spill] sm:$0xff] %v4715_v60  ;;  %8535 = vst [vmem:[#allocation139_spill] sm:$0xff] %v4717_v58  ;;  %v1657_v58 = vmul.f32 0.09546628, %v4497_v29  ;;  %v1662_v29 = vmul.f32 0.09546628, %v4532_v15 }
 0x180   :  { %1633 = vrot.lane.b32.xlu1 %v1610_v3, %s3716_s4  ;;  %1631 = vrot.lane.b32.xlu0 %v1609_v14, %s3716_s4 }
 0x182   :  { %v4723_v61 = vpop.permute.xlu1 %1063  ;;  %v4725_v63 = vpop.permute.xlu0 %1061 }
 0x183   :  { %8536 = vst [vmem:[#allocation140_spill] sm:$0xff] %v4723_v61  ;;  %8537 = vst [vmem:[#allocation141_spill] sm:$0xff] %v4725_v63  ;;  %v1659_v63 = vmul.f32 0.09546628, %v4519_v47 }
 0x184   :  { %1673 = vrot.lane.b32.xlu1 %v1656_v57, %s3717_s5  ;;  %1671 = vrot.lane.b32.xlu0 %v1655_v62, %s3717_s5 }
 0x186   :  { %v4731_v60 = vpop.permute.xlu1 %1087  ;;  %v4733_v59 = vpop.permute.xlu0 %1085 }
 0x187   :  { %8538 = vst [vmem:[#allocation142_spill] sm:$0xff] %v4731_v60  ;;  %8539 = vst [vmem:[#allocation143_spill] sm:$0xff] %v4733_v59  ;;  %v1661_v59 = vmul.f32 0.09546628, %v4541_v34  ;;  %v8688_v34 = vld [vmem:[#allocation46_spill] sm:$0xff] }
 0x188   :  { %1677 = vrot.lane.b32.xlu1 %v1658_v49, %s3717_s5  ;;  %1675 = vrot.lane.b32.xlu0 %v1657_v58, %s3717_s5 }
 0x18a   :  { %v4739_v61 = vpop.permute.xlu1 %1091  ;;  %v4741_v10 = vpop.permute.xlu0 %1089 }
 0x18b   :  { %8540 = vst [vmem:[#allocation144_spill] sm:$0xff] %v4739_v61  ;;  %8541 = vst [vmem:[#allocation145_spill] sm:$0xff] %v4741_v10 }
 0x18c   :  { %1681 = vrot.lane.b32.xlu1 %v1660_v11, %s3717_s5  ;;  %1679 = vrot.lane.b32.xlu0 %v1659_v63, %s3717_s5 }
 0x18e   :  { %v4747_v60 = vpop.permute.xlu1 %1095  ;;  %v4749_v5 = vpop.permute.xlu0 %1093 }
 0x18f   :  { %8542 = vst [vmem:[#allocation146_spill] sm:$0xff] %v4747_v60  ;;  %8543 = vst [vmem:[#allocation147_spill] sm:$0xff] %v4749_v5 }
 0x190   :  { %1685 = vrot.lane.b32.xlu1 %v1662_v29, %s3717_s5  ;;  %1683 = vrot.lane.b32.xlu0 %v1661_v59, %s3717_s5 }
 0x192   :  { %v4753_v47 = vpop.permute.xlu1 %1099  ;;  %v4755_v35 = vpop.permute.xlu0 %1097 }
 0x193   :  { %8544 = vst [vmem:[#allocation148_spill] sm:$0xff] %v4753_v47  ;;  %8545 = vst [vmem:[#allocation149_spill] sm:$0xff] %v4755_v35  ;;  %v8640_v47 = vld [vmem:[#allocation11_spill] sm:$0xff] }
 0x194   :  { %1709 = vrot.lane.b32.xlu1 %v1656_v57, %s3718_s6  ;;  %1707 = vrot.lane.b32.xlu0 %v1655_v62, %s3718_s6 }
 0x196   :  { %v4759_v10 = vpop.permute.xlu1 %1123  ;;  %v4761_v15 = vpop.permute.xlu0 %1121 }
 0x197   :  { %8546 = vst [vmem:[#allocation150_spill] sm:$0xff] %v4759_v10  ;;  %8547 = vst [vmem:[#allocation151_spill] sm:$0xff] %v4761_v15  ;;  %v8650_v15 = vld [vmem:[#allocation18_spill] sm:$0xff] }
 0x198   :  { %1713 = vrot.lane.b32.xlu1 %v1658_v49, %s3718_s6  ;;  %1711 = vrot.lane.b32.xlu0 %v1657_v58, %s3718_s6 }
 0x19a   :  { %v4765_v5 = vpop.permute.xlu1 %1127  ;;  %v4767_v60 = vpop.permute.xlu0 %1125 }
 0x19b   :  { %8548 = vst [vmem:[#allocation152_spill] sm:$0xff] %v4765_v5  ;;  %8549 = vst [vmem:[#allocation153_spill] sm:$0xff] %v4767_v60  ;;  %v8651_v60 = vld [vmem:[#allocation19_spill] sm:$0xff] }
 0x19c   :  { %1717 = vrot.lane.b32.xlu1 %v1660_v11, %s3718_s6  ;;  %1715 = vrot.lane.b32.xlu0 %v1659_v63, %s3718_s6  ;;  %v8689_v5 = vld [vmem:[#allocation47_spill] sm:$0xff] }
 0x19e   :  { %v4771_v35 = vpop.permute.xlu1 %1131  ;;  %v4773_v57 = vpop.permute.xlu0 %1129 }
 0x19f   :  { %8550 = vst [vmem:[#allocation154_spill] sm:$0xff] %v4771_v35  ;;  %8551 = vst [vmem:[#allocation155_spill] sm:$0xff] %v4773_v57  ;;  %v8639_v57 = vld [vmem:[#allocation10_spill] sm:$0xff]  ;;  %v8643_v35 = vld [vmem:[#allocation13_spill] sm:$0xff] }
 0x1a0   :  { %1721 = vrot.lane.b32.xlu1 %v1662_v29, %s3718_s6  ;;  %1719 = vrot.lane.b32.xlu0 %v1661_v59, %s3718_s6 }
 0x1a2   :  { %v4777_v62 = vpop.permute.xlu1 %1135  ;;  %v4779_v49 = vpop.permute.xlu0 %1133 }
 0x1a3   :  { %8552 = vst [vmem:[#allocation156_spill] sm:$0xff] %v4777_v62  ;;  %8553 = vst [vmem:[#allocation157_spill] sm:$0xff] %v4779_v49 }
 0x1a4   :  { %1745 = vrot.lane.b32.xlu1 %v4676_v17, %s3719_s7  ;;  %1743 = vrot.lane.b32.xlu0 %v4681_v7, %s3719_s7 }
 0x1a6   :  { %v4785_v58 = vpop.permute.xlu1 %1159  ;;  %v4787_v63 = vpop.permute.xlu0 %1157 }
 0x1a7   :  { %8554 = vst [vmem:[#allocation158_spill] sm:$0xff] %v4785_v58  ;;  %8555 = vst [vmem:[#allocation159_spill] sm:$0xff] %v4787_v63  ;;  %v8642_v63 = vld [vmem:[#allocation12_spill] sm:$0xff] }
 0x1a8   :  { %1749 = vrot.lane.b32.xlu1 %v4690_v19, %s3719_s7  ;;  %1747 = vrot.lane.b32.xlu0 %v4695_v16, %s3719_s7 }
 0x1aa   :  { %v4793_v59 = vpop.permute.xlu1 %1163  ;;  %v4795_v11 = vpop.permute.xlu0 %1161 }
 0x1ab   :  { %8556 = vst [vmem:[#allocation160_spill] sm:$0xff] %v4793_v59  ;;  %8557 = vst [vmem:[#allocation161_spill] sm:$0xff] %v4795_v11 }
 0x1ac   :  { %1753 = vrot.lane.b32.xlu1 %v1608_v22, %s3719_s7  ;;  %1751 = vrot.lane.b32.xlu0 %v1607_v18, %s3719_s7 }
 0x1ae   :  { %v4799_v17 = vpop.permute.xlu1 %1167  ;;  %v4801_v7 = vpop.permute.xlu0 %1165 }
 0x1af   :  { %8558 = vst [vmem:[#allocation162_spill] sm:$0xff] %v4799_v17  ;;  %8559 = vst [vmem:[#allocation163_spill] sm:$0xff] %v4801_v7 }
 0x1b0   :  { %1757 = vrot.lane.b32.xlu1 %v1610_v3, %s3719_s7  ;;  %1755 = vrot.lane.b32.xlu0 %v1609_v14, %s3719_s7 }
 0x1b2   :  { %v4805_v19 = vpop.permute.xlu1 %1171  ;;  %v4807_v29 = vpop.permute.xlu0 %1169 }
 0x1b3   :  { %8560 = vst [vmem:[#allocation164_spill] sm:$0xff] %v4805_v19  ;;  %8561 = vst [vmem:[#allocation165_spill] sm:$0xff] %v4807_v29  ;;  %v8634_v19 = vld [vmem:[#allocation6_spill] sm:$0xff] }
 0x1b4   :  { %1781 = vrot.lane.b32.xlu1 %v4620_v27, %s3720_s8  ;;  %1779 = vrot.lane.b32.xlu0 %v4625_v38, %s3720_s8 }
 0x1b6   :  { %v4813_v22 = vpop.permute.xlu1 %1465  ;;  %v4815_v18 = vpop.permute.xlu0 %1463 }
 0x1b7   :  { %8562 = vst [vmem:[#allocation166_spill] sm:$0xff] %v4813_v22  ;;  %8563 = vst [vmem:[#allocation167_spill] sm:$0xff] %v4815_v18  ;;  %v5107_v18 = vld [vmem:[%s8109_s1 + $0x20] sm:$0xff] }
 0x1b8   :  { %1785 = vrot.lane.b32.xlu1 %v4634_v33, %s3720_s8  ;;  %1783 = vrot.lane.b32.xlu0 %v4639_v26, %s3720_s8  ;;  %v46_v22 = vmul.f32 0.08216859, %v5107_v18 }
 0x1ba   :  { %v4821_v14 = vpop.permute.xlu1 %1469  ;;  %v4823_v3 = vpop.permute.xlu0 %1467 }
 0x1bb   :  { %8564 = vst [vmem:[#allocation168_spill] sm:$0xff] %v4821_v14  ;;  %8565 = vst [vmem:[#allocation169_spill] sm:$0xff] %v4823_v3 }
 0x1bc   :  { %1789 = vrot.lane.b32.xlu1 %v4648_v37, %s3720_s8  ;;  %1787 = vrot.lane.b32.xlu0 %v4653_v32, %s3720_s8 }
 0x1be   :  { %v4829_v16 = vpop.permute.xlu1 %1473  ;;  %v4831_v27 = vpop.permute.xlu0 %1471 }
 0x1bf   :  { %8566 = vst [vmem:[#allocation170_spill] sm:$0xff] %v4829_v16  ;;  %8567 = vst [vmem:[#allocation171_spill] sm:$0xff] %v4831_v27  ;;  %v5090_v27 = vld [vmem:[%s8109_s1] sm:$0xff] }
 0x1c0   :  { %1793 = vrot.lane.b32.xlu1 %v4662_v40, %s3720_s8  ;;  %1791 = vrot.lane.b32.xlu0 %v4667_v36, %s3720_s8  ;;  %v42_v16 = vmul.f32 0.08216859, %v5090_v27 }
 0x1c2   :  { %v4837_v33 = vpop.permute.xlu1 %1477  ;;  %v4839_v26 = vpop.permute.xlu0 %1475 }
 0x1c3   :  { %8568 = vst [vmem:[#allocation172_spill] sm:$0xff] %v4837_v33  ;;  %8569 = vst [vmem:[#allocation173_spill] sm:$0xff] %v4839_v26 }
 0x1c4   :  { %1817 = vrot.lane.b32.xlu1 %v4564_v45, %s3721_s9  ;;  %1815 = vrot.lane.b32.xlu0 %v4569_v23, %s3721_s9 }
 0x1c6   :  { %v4845_v37 = vpop.permute.xlu1 %1517  ;;  %v4847_v32 = vpop.permute.xlu0 %1515 }
 0x1c7   :  { %8570 = vst [vmem:[#allocation174_spill] sm:$0xff] %v4845_v37  ;;  %8571 = vst [vmem:[#allocation175_spill] sm:$0xff] %v4847_v32 }
 0x1c8   :  { %1821 = vrot.lane.b32.xlu1 %v4578_v13, %s3721_s9  ;;  %1819 = vrot.lane.b32.xlu0 %v4583_v46, %s3721_s9 }
 0x1ca   :  { %v4853_v40 = vpop.permute.xlu1 %1521  ;;  %v4855_v36 = vpop.permute.xlu0 %1519 }
 0x1cb   :  { %8572 = vst [vmem:[#allocation176_spill] sm:$0xff] %v4853_v40  ;;  %8573 = vst [vmem:[#allocation177_spill] sm:$0xff] %v4855_v36 }
 0x1cc   :  { %1825 = vrot.lane.b32.xlu1 %v4592_v42, %s3721_s9  ;;  %1823 = vrot.lane.b32.xlu0 %v4597_v43, %s3721_s9 }
 0x1ce   :  { %v4861_v38 = vpop.permute.xlu1 %1525  ;;  %v4863_v45 = vpop.permute.xlu0 %1523 }
 0x1cf   :  { %8574 = vst [vmem:[#allocation178_spill] sm:$0xff] %v4861_v38  ;;  %8575 = vst [vmem:[#allocation179_spill] sm:$0xff] %v4863_v45 }
 0x1d0   :  { %1829 = vrot.lane.b32.xlu1 %v4606_v39, %s3721_s9  ;;  %1827 = vrot.lane.b32.xlu0 %v4611_v41, %s3721_s9 }
 0x1d2   :  { %v4869_v46 = vpop.permute.xlu1 %1529  ;;  %v4871_v23 = vpop.permute.xlu0 %1527 }
 0x1d3   :  { %8576 = vst [vmem:[#allocation180_spill] sm:$0xff] %v4869_v46  ;;  %8577 = vst [vmem:[#allocation181_spill] sm:$0xff] %v4871_v23 }
 0x1d4   :  { %1853 = vrot.lane.b32.xlu1 %v4484_v28, %s3722_s10  ;;  %1851 = vrot.lane.b32.xlu0 %v4493_v1, %s3722_s10  ;;  %v4893_v28 = vmul.f32 %v4040_v4, %v4040_v4  ;;  %v4899_v1 = vmul.f32 %v4045_v6, %v4045_v6  ;;  %v4912_v4 = vmul.f32 %v4064_v20, %v4064_v20 }
 0x1d6   :  { %v4877_v42 = vpop.permute.xlu1 %1569  ;;  %v4879_v43 = vpop.permute.xlu0 %1567  ;;  %8582 = vst [vmem:[#allocation186_spill] sm:$0xff] %v4893_v28  ;;  %8583 = vst [vmem:[#allocation187_spill] sm:$0xff] %v4899_v1  ;;  %v4917_v6 = vmul.f32 0.08638146, %v4899_v1  ;;  %v4930_v20 = vmul.f32 0.08638146, %v4912_v4 }
 0x1d7   :  { %8578 = vst [vmem:[#allocation182_spill] sm:$0xff] %v4877_v42  ;;  %8579 = vst [vmem:[#allocation183_spill] sm:$0xff] %v4879_v43 }
 0x1d8   :  { %1857 = vrot.lane.b32.xlu1 %v4506_v2, %s3722_s10  ;;  %1855 = vrot.lane.b32.xlu0 %v4515_v0, %s3722_s10  ;;  %8587 = vst [vmem:[#allocation191_spill] sm:$0xff] %v4912_v4  ;;  %8588 = vst [vmem:[#allocation192_spill] sm:$0xff] %v4917_v6 }
 0x1d9   :  { %8592 = vst [vmem:[#allocation196_spill] sm:$0xff] %v4930_v20 }
 0x1da   :  { %v4885_v39 = vpop.permute.xlu1 %1573  ;;  %v4887_v41 = vpop.permute.xlu0 %1571 }
 0x1db   :  { %8580 = vst [vmem:[#allocation184_spill] sm:$0xff] %v4885_v39  ;;  %8581 = vst [vmem:[#allocation185_spill] sm:$0xff] %v4887_v41 }
 0x1dc   :  { %1861 = vrot.lane.b32.xlu1 %v4528_v8, %s3722_s10  ;;  %1859 = vrot.lane.b32.xlu0 %v4537_v9, %s3722_s10  ;;  %v4908_v8 = vmul.f32 0.08638146, %v4893_v28  ;;  %v4921_v9 = vmul.f32 %v4069_v21, %v4069_v21 }
 0x1de   :  { %v4901_v2 = vpop.permute.xlu1 %1577  ;;  %v4903_v0 = vpop.permute.xlu0 %1575  ;;  %8586 = vst [vmem:[#allocation190_spill] sm:$0xff] %v4908_v8  ;;  %8589 = vst [vmem:[#allocation193_spill] sm:$0xff] %v4921_v9  ;;  %v4939_v21 = vmul.f32 0.08638146, %v4921_v9 }
 0x1df   :  { %8584 = vst [vmem:[#allocation188_spill] sm:$0xff] %v4901_v2  ;;  %8585 = vst [vmem:[#allocation189_spill] sm:$0xff] %v4903_v0  ;;  %v4956_v2 = vmul.f32 %v4112_v30, %v4112_v30 }
 0x1e0   :  { %1865 = vrot.lane.b32.xlu1 %v4550_v12, %s3722_s10  ;;  %1863 = vrot.lane.b32.xlu0 %v4555_v44, %s3722_s10  ;;  %v4934_v44 = vmul.f32 %v4088_v24, %v4088_v24  ;;  %8594 = vst [vmem:[#allocation198_spill] sm:$0xff] %v4939_v21 }
 0x1e1   :  { %8599 = vst [vmem:[#allocation203_spill] sm:$0xff] %v4956_v2  ;;  %v4974_v30 = vmul.f32 0.08638146, %v4956_v2 }
 0x1e2   :  { %v4923_v13 = vpop.permute.xlu1 %1581  ;;  %v4925_v12 = vpop.permute.xlu0 %1579  ;;  %8593 = vst [vmem:[#allocation197_spill] sm:$0xff] %v4934_v44  ;;  %v4952_v24 = vmul.f32 0.08638146, %v4934_v44  ;;  %v5096_v3 = vmul.f32 0.09264482, %v4934_v44 }
 0x1e3   :  { %8590 = vst [vmem:[#allocation194_spill] sm:$0xff] %v4923_v13  ;;  %8591 = vst [vmem:[#allocation195_spill] sm:$0xff] %v4925_v12  ;;  %v4943_v13 = vmul.f32 %v4093_v25, %v4093_v25 }
 0x1e4   :  { %2159 = vrot.lane.b32.xlu1 %v4908_v8, %s3713_s20  ;;  %2157 = vrot.lane.b32.xlu0 %v4917_v6, %s3713_s20  ;;  %8598 = vst [vmem:[#allocation202_spill] sm:$0xff] %v4952_v24  ;;  %8604 = vst [vmem:[#allocation208_spill] sm:$0xff] %v4974_v30  ;;  %v8637_v6 = vld [vmem:[#allocation9_spill] sm:$0xff] }
 0x1e5   :  { %8595 = vst [vmem:[#allocation199_spill] sm:$0xff] %v4943_v13  ;;  %v4961_v25 = vmul.f32 0.08638146, %v4943_v13  ;;  %8631 = vst [vmem:[#allocation235_spill] sm:$0xff] %v5096_v3  ;;  %v5113_v29 = vmul.f32 0.09264482, %v4943_v13 }
 0x1e6   :  { %v4945_v12 = vpop.permute.xlu1 %1621  ;;  %v4947_v0 = vpop.permute.xlu0 %1619 }
 0x1e7   :  { %8596 = vst [vmem:[#allocation200_spill] sm:$0xff] %v4945_v12  ;;  %8597 = vst [vmem:[#allocation201_spill] sm:$0xff] %v4947_v0  ;;  %v4965_v12 = vmul.f32 %v4117_v31, %v4117_v31 }
 0x1e8   :  { %2163 = vrot.lane.b32.xlu1 %v4930_v20, %s3713_s20  ;;  %2161 = vrot.lane.b32.xlu0 %v4939_v21, %s3713_s20  ;;  %8600 = vst [vmem:[#allocation204_spill] sm:$0xff] %v4961_v25  ;;  %8632 = vst [vmem:[#allocation236_spill] sm:$0xff] %v5113_v29  ;;  %v3675_v20 = vld [vmem:[%s8109_s1 + $0x38] sm:$0x3] }
 0x1e9   :  { %8601 = vst [vmem:[#allocation205_spill] sm:$0xff] %v4965_v12  ;;  %v4979_v39 = vmul.f32 0.08638146, %v4965_v12  ;;  %v49_v8 = vmul.f32 0.08216859, %v3675_v20 }
 0x1ea   :  { %v4967_v0 = vpop.permute.xlu1 %1625  ;;  %v4969_v41 = vpop.permute.xlu0 %1623 }
 0x1eb   :  { %8602 = vst [vmem:[#allocation206_spill] sm:$0xff] %v4967_v0  ;;  %8603 = vst [vmem:[#allocation207_spill] sm:$0xff] %v4969_v41  ;;  %v4988_v41 = vmul.f32 0.08990675, %v4893_v28  ;;  %v4993_v0 = vmul.f32 0.08990675, %v4899_v1 }
 0x1ec   :  { %2167 = vrot.lane.b32.xlu1 %v4952_v24, %s3713_s20  ;;  %2165 = vrot.lane.b32.xlu0 %v4961_v25, %s3713_s20  ;;  %8605 = vst [vmem:[#allocation209_spill] sm:$0xff] %v4979_v39  ;;  %v84_v24 = vsel %vm82_vm0, %v3957_v48, %v3965_v50  ;;  %v8633_v25 = vld [vmem:[#allocation7_spill] sm:$0xff] }
 0x1ed   :  { %8608 = vst [vmem:[#allocation212_spill] sm:$0xff] %v4988_v41  ;;  %8609 = vst [vmem:[#allocation213_spill] sm:$0xff] %v4993_v0  ;;  %v83_v49 = vsel %vm82_vm0, %v8634_v19, %v8633_v25  ;;  %v3676_v48 = vld [vmem:[%s8109_s1 + $0x30] sm:$0x3] }
 0x1ee   :  { %v4981_v43 = vpop.permute.xlu1 %1629  ;;  %v4983_v31 = vpop.permute.xlu0 %1627  ;;  %v48_v7 = vmul.f32 0.08216859, %v3676_v48  ;;  %v95_v48 = vadd.f32 %v83_v49, %v42_v16 }
 0x1ef   :  { %8606 = vst [vmem:[#allocation210_spill] sm:$0xff] %v4981_v43  ;;  %8607 = vst [vmem:[#allocation211_spill] sm:$0xff] %v4983_v31  ;;  %v5002_v31 = vmul.f32 0.08990675, %v4912_v4 }
 0x1f0   :  { %2171 = vrot.lane.b32.xlu1 %v4974_v30, %s3713_s20  ;;  %2169 = vrot.lane.b32.xlu0 %v4979_v39, %s3713_s20  ;;  %v5007_v30 = vmul.f32 0.08990675, %v4921_v9 }
 0x1f1   :  { %8612 = vst [vmem:[#allocation216_spill] sm:$0xff] %v5002_v31 }
 0x1f2   :  { %v4995_v42 = vpop.permute.xlu1 %1633  ;;  %v4997_v23 = vpop.permute.xlu0 %1631  ;;  %8613 = vst [vmem:[#allocation217_spill] sm:$0xff] %v5007_v30 }
 0x1f3   :  { %8610 = vst [vmem:[#allocation214_spill] sm:$0xff] %v4995_v42  ;;  %8611 = vst [vmem:[#allocation215_spill] sm:$0xff] %v4997_v23  ;;  %v5016_v23 = vmul.f32 0.08990675, %v4934_v44  ;;  %v5021_v42 = vmul.f32 0.08990675, %v4943_v13 }
 0x1f4   :  { %2211 = vrot.lane.b32.xlu1 %v4988_v41, %s3714_s29  ;;  %2209 = vrot.lane.b32.xlu0 %v4993_v0, %s3714_s29 }
 0x1f5   :  { %8616 = vst [vmem:[#allocation220_spill] sm:$0xff] %v5016_v23  ;;  %8617 = vst [vmem:[#allocation221_spill] sm:$0xff] %v5021_v42 }
 0x1f6   :  { %v5009_v39 = vpop.permute.xlu1 %1673  ;;  %v5011_v43 = vpop.permute.xlu0 %1671 }
 0x1f7   :  { %8614 = vst [vmem:[#allocation218_spill] sm:$0xff] %v5009_v39  ;;  %8615 = vst [vmem:[#allocation219_spill] sm:$0xff] %v5011_v43  ;;  %v5030_v43 = vmul.f32 0.08990675, %v4956_v2  ;;  %v5035_v39 = vmul.f32 0.08990675, %v4965_v12 }
 0x1f8   :  { %2215 = vrot.lane.b32.xlu1 %v5002_v31, %s3714_s29  ;;  %2213 = vrot.lane.b32.xlu0 %v5007_v30, %s3714_s29  ;;  %v8649_v31 = vld [vmem:[#allocation17_spill] sm:$0xff] }
 0x1f9   :  { %8620 = vst [vmem:[#allocation224_spill] sm:$0xff] %v5030_v43  ;;  %8621 = vst [vmem:[#allocation225_spill] sm:$0xff] %v5035_v39 }
 0x1fa   :  { %v5023_v46 = vpop.permute.xlu1 %1677  ;;  %v5025_v45 = vpop.permute.xlu0 %1675 }
 0x1fb   :  { %8618 = vst [vmem:[#allocation222_spill] sm:$0xff] %v5023_v46  ;;  %8619 = vst [vmem:[#allocation223_spill] sm:$0xff] %v5025_v45  ;;  %v5044_v45 = vmul.f32 0.09264482, %v4893_v28  ;;  %v5049_v46 = vmul.f32 0.09264482, %v4899_v1 }
 0x1fc   :  { %2219 = vrot.lane.b32.xlu1 %v5016_v23, %s3714_s29  ;;  %2217 = vrot.lane.b32.xlu0 %v5021_v42, %s3714_s29  ;;  %v8636_v23 = vld [vmem:[#allocation8_spill] sm:$0xff] }
 0x1fd   :  { %8624 = vst [vmem:[#allocation228_spill] sm:$0xff] %v5044_v45  ;;  %v85_v42 = vsel %vm82_vm0, %v8637_v6, %v8636_v23  ;;  %v5142_v6 = vmul.f32 0.09264482, %v4956_v2  ;;  %v8646_v2 = vld [vmem:[#allocation15_spill] sm:$0xff] }
 0x1fe   :  { %v5037_v38 = vpop.permute.xlu1 %1681  ;;  %v5039_v36 = vpop.permute.xlu0 %1679 }
 0x1ff   :  { %8622 = vst [vmem:[#allocation226_spill] sm:$0xff] %v5037_v38  ;;  %8623 = vst [vmem:[#allocation227_spill] sm:$0xff] %v5039_v36  ;;  %v5058_v36 = vmul.f32 0.09264482, %v4912_v4  ;;  %v5076_v38 = vld [vmem:[%s8109_s1 + $0x10] sm:$0xff] }
 0x200   :  { %2223 = vrot.lane.b32.xlu1 %v5030_v43, %s3714_s29  ;;  %2221 = vrot.lane.b32.xlu0 %v5035_v39, %s3714_s29  ;;  %v5063_v43 = vmul.f32 0.09264482, %v4921_v9  ;;  %v44_v37 = vmul.f32 0.08216859, %v5076_v38  ;;  %8641 = vst [vmem:[#allocation8_spill] sm:$0xff] %v5142_v6 }
 0x201   :  { %8627 = vst [vmem:[#allocation231_spill] sm:$0xff] %v5058_v36 }
 0x202   :  { %v5051_v40 = vpop.permute.xlu1 %1685  ;;  %v5053_v32 = vpop.permute.xlu0 %1683  ;;  %8628 = vst [vmem:[#allocation232_spill] sm:$0xff] %v5063_v43  ;;  %v97_v17 = vadd.f32 %v84_v24, %v44_v37  ;;  %v8648_v24 = vld [vmem:[#allocation16_spill] sm:$0xff] }
 0x203   :  { %8625 = vst [vmem:[#allocation229_spill] sm:$0xff] %v5051_v40  ;;  %8626 = vst [vmem:[#allocation230_spill] sm:$0xff] %v5053_v32  ;;  %v5070_v40 = vld [vmem:[%s8109_s1 + $0x18] sm:$0xff]  ;;  %v138_v11 = vsel %vm135_vm1, %v8649_v31, %v8648_v24  ;;  %v8656_v31 = vld [vmem:[#allocation23_spill] sm:$0xff] }
 0x204   :  { %2263 = vrot.lane.b32.xlu1 %v5044_v45, %s3715_s30  ;;  %2261 = vrot.lane.b32.xlu0 %v5049_v46, %s3715_s30  ;;  %v45_v32 = vmul.f32 0.08216859, %v5070_v40 }
 0x206   :  { %v5065_v39 = vpop.permute.xlu1 %1709  ;;  %v5079_v26 = vpop.permute.xlu0 %1707  ;;  %v98_v62 = vadd.f32 %v3965_v50, %v45_v32  ;;  %v5150_v50 = vmul.f32 0.09264482, %v4965_v12  ;;  %v102_v32 = vadd.f32 %v8639_v57, %v49_v8 }
 0x207   :  { %8629 = vst [vmem:[#allocation233_spill] sm:$0xff] %v5065_v39  ;;  %8630 = vst [vmem:[#allocation234_spill] sm:$0xff] %v5079_v26  ;;  %v5084_v39 = vld [vmem:[%s8109_s1 + $0x8] sm:$0xff] }
 0x208   :  { %v43_v33 = vmul.f32 0.08216859, %v5084_v39  ;;  %2267 = vrot.lane.b32.xlu1 %v5058_v36, %s3715_s30  ;;  %v5101_v26 = vld [vmem:[%s8109_s1 + $0x28] sm:$0xff]  ;;  %2265 = vrot.lane.b32.xlu0 %v5063_v43, %s3715_s30  ;;  %8644 = vst [vmem:[#allocation9_spill] sm:$0xff] %v5150_v50 }
 0x209   :  { %v47_v14 = vmul.f32 0.08216859, %v5101_v26 }
 0x20a   :  { %v5124_v21 = vpop.permute.xlu1 %1713  ;;  %v5132_v19 = vpop.permute.xlu0 %1711  ;;  %v96_v20 = vadd.f32 %v8633_v25, %v43_v33  ;;  %v99_v33 = vadd.f32 %v85_v42, %v46_v22  ;;  %v8645_v25 = vld [vmem:[#allocation14_spill] sm:$0xff]  ;;  %v8653_v42 = vld [vmem:[#allocation20_spill] sm:$0xff] }
 0x20b   :  { %8635 = vst [vmem:[#allocation7_spill] sm:$0xff] %v5124_v21  ;;  %8638 = vst [vmem:[#allocation6_spill] sm:$0xff] %v5132_v19  ;;  %v86_v21 = vsel %vm82_vm0, %v8640_v47, %v8639_v57  ;;  %v136_v19 = vsel %vm135_vm1, %v8643_v35, %v8642_v63  ;;  %v100_v47 = vadd.f32 %v8636_v23, %v47_v14 }
 0x20c   :  { %2271 = vrot.lane.b32.xlu1 %v5096_v3, %s3715_s30  ;;  %2269 = vrot.lane.b32.xlu0 %v5113_v29, %s3715_s30  ;;  %v137_v49 = vsel %vm135_vm1, %v8646_v2, %v8645_v25  ;;  %v101_v37 = vadd.f32 %v86_v21, %v48_v7  ;;  %v149_v35 = vadd.f32 %v8642_v63, %v96_v20  ;;  %v8654_v2 = vld [vmem:[#allocation21_spill] sm:$0xff]  ;;  %v5175_v63 = vmul.f32 0.094516374, %v4893_v28 }
 0x20d   :  { %v139_v14 = vsel %vm135_vm1, %v8651_v60, %v8650_v15  ;;  %v148_v57 = vadd.f32 %v136_v19, %v95_v48  ;;  %v151_v23 = vadd.f32 %v8645_v25, %v98_v62  ;;  %v189_v8 = vsel %vm188_vm2, %v8654_v2, %v8653_v42  ;;  %v8655_v60 = vld [vmem:[#allocation22_spill] sm:$0xff]  ;;  %v8657_v2 = vld [vmem:[#allocation24_spill] sm:$0xff] }
 0x20e   :  { %v5157_v16 = vpop.permute.xlu1 %1717  ;;  %v5166_v22 = vpop.permute.xlu0 %1715  ;;  %v150_v7 = vadd.f32 %v137_v49, %v97_v17  ;;  %v153_v21 = vadd.f32 %v8648_v24, %v100_v47  ;;  %v190_v19 = vsel %vm188_vm2, %v8656_v31, %v8655_v60  ;;  %v5184_v62 = vmul.f32 0.094516374, %v4899_v1 }
 0x20f   :  { %8647 = vst [vmem:[#allocation10_spill] sm:$0xff] %v5157_v16  ;;  %8652 = vst [vmem:[#allocation11_spill] sm:$0xff] %v5166_v22  ;;  %v152_v20 = vadd.f32 %v138_v11, %v99_v33  ;;  %v155_v48 = vadd.f32 %v8650_v15, %v102_v32  ;;  %v154_v25 = vadd.f32 %v139_v14, %v101_v37  ;;  %v8660_v22 = vld [vmem:[#allocation26_spill] sm:$0xff]  ;;  %v8663_v15 = vld [vmem:[#allocation28_spill] sm:$0xff] }
 0x210   :  { %2275 = vrot.lane.b32.xlu1 %v5142_v6, %s3715_s30  ;;  %2273 = vrot.lane.b32.xlu0 %v5150_v50, %s3715_s30  ;;  %v8658_v6 = vld [vmem:[#allocation25_spill] sm:$0xff]  ;;  %v202_v47 = vadd.f32 %v8653_v42, %v149_v35  ;;  %v201_v24 = vadd.f32 %v189_v8, %v148_v57  ;;  %v204_v31 = vadd.f32 %v8655_v60, %v151_v23  ;;  %v8661_v50 = vld [vmem:[#allocation27_spill] sm:$0xff]  ;;  %v8665_v37 = vld [vmem:[#allocation30_spill] sm:$0xff]  ;;  %v5208_v35 = vmul.f32 0.094516374, %v4912_v4 }
 0x211   :  { %v191_v17 = vsel %vm188_vm2, %v8658_v6, %v8657_v2  ;;  %v192_v16 = vsel %vm188_vm2, %v8661_v50, %v8660_v22  ;;  %v203_v11 = vadd.f32 %v190_v19, %v150_v7  ;;  %v8664_v33 = vld [vmem:[#allocation29_spill] sm:$0xff]  ;;  %v8666_v6 = vld [vmem:[#allocation31_spill] sm:$0xff]  ;;  %v206_v50 = vadd.f32 %v8657_v2, %v153_v21  ;;  %v8667_v23 = vld [vmem:[#allocation32_spill] sm:$0xff] }
 0x212   :  { %v5190_v49 = vpop.permute.xlu1 %1721  ;;  %v5197_v41 = vpop.permute.xlu0 %1719  ;;  %v242_v32 = vsel %vm241_vm3, %v8664_v33, %v8663_v15  ;;  %v243_v14 = vsel %vm241_vm3, %v8666_v6, %v8665_v37  ;;  %v205_v57 = vadd.f32 %v191_v17, %v152_v20  ;;  %v8668_v42 = vld [vmem:[#allocation33_spill] sm:$0xff]  ;;  %v5217_v7 = vmul.f32 0.094516374, %v4921_v9  ;;  %v8669_v6 = vld [vmem:[#allocation34_spill] sm:$0xff] }
 0x213   :  { %8659 = vst [vmem:[#allocation12_spill] sm:$0xff] %v5190_v49  ;;  %8662 = vst [vmem:[#allocation13_spill] sm:$0xff] %v5197_v41  ;;  %v244_v8 = vsel %vm241_vm3, %v8668_v42, %v8667_v23  ;;  %v208_v60 = vadd.f32 %v8660_v22, %v155_v48  ;;  %v207_v19 = vadd.f32 %v192_v16, %v154_v25  ;;  %v8670_v41 = vld [vmem:[#allocation35_spill] sm:$0xff]  ;;  %v8673_v16 = vld [vmem:[#allocation36_spill] sm:$0xff] }
 0x214   :  { %2315 = vrot.lane.b32.xlu1 %v5175_v63, %s3716_s4  ;;  %2313 = vrot.lane.b32.xlu0 %v5184_v62, %s3716_s4  ;;  %v255_v33 = vadd.f32 %v8663_v15, %v202_v47  ;;  %v245_v21 = vsel %vm241_vm3, %v8670_v41, %v8669_v6  ;;  %v254_v2 = vadd.f32 %v242_v32, %v201_v24  ;;  %v8674_v48 = vld [vmem:[#allocation37_spill] sm:$0xff]  ;;  %v5237_v41 = vmul.f32 0.094516374, %v4934_v44  ;;  %v8675_v24 = vld [vmem:[#allocation38_spill] sm:$0xff] }
 0x215   :  { %v257_v17 = vadd.f32 %v8665_v37, %v204_v31  ;;  %v256_v42 = vadd.f32 %v243_v14, %v203_v11  ;;  %v259_v49 = vadd.f32 %v8667_v23, %v206_v50  ;;  %v258_v58 = vadd.f32 %v244_v8, %v205_v57  ;;  %v8676_v31 = vld [vmem:[#allocation39_spill] sm:$0xff]  ;;  %v8678_v50 = vld [vmem:[#allocation40_spill] sm:$0xff]  ;;  %v8679_v57 = vld [vmem:[#allocation41_spill] sm:$0xff] }
 0x216   :  { %v5224_v20 = vpop.permute.xlu1 %1745  ;;  %v5228_v30 = vpop.permute.xlu0 %1743  ;;  %v261_v22 = vadd.f32 %v8669_v6, %v208_v60  ;;  %v295_v25 = vsel %vm8286_vm4, %v8674_v48, %v8673_v16  ;;  %v260_v47 = vadd.f32 %v245_v21, %v207_v19  ;;  %v296_v11 = vsel %vm8286_vm4, %v8676_v31, %v8675_v24  ;;  %v5245_v15 = vld [vmem:[%s8110_s2 + $0x8] sm:$0xff]  ;;  %v5262_v8 = vld [vmem:[%s8110_s2] sm:$0xff]  ;;  %v5270_v19 = vld [vmem:[%s8110_s2 + $0x18] sm:$0xff] }
 0x217   :  { %8671 = vst [vmem:[#allocation14_spill] sm:$0xff] %v5224_v20  ;;  %8672 = vst [vmem:[#allocation15_spill] sm:$0xff] %v5228_v30  ;;  %v5248_v32 = vmul.f32 0.08216859, %v5245_v15  ;;  %v5253_v37 = vmul.f32 0.094516374, %v4943_v13  ;;  %v308_v14 = vadd.f32 %v8673_v16, %v255_v33  ;;  %v297_v23 = vsel %vm8286_vm4, %v8679_v57, %v8678_v50 }
 0x218   :  { %2319 = vrot.lane.b32.xlu1 %v5208_v35, %s3716_s4  ;;  %2317 = vrot.lane.b32.xlu0 %v5217_v7, %s3716_s4  ;;  %v5265_v60 = vmul.f32 0.08216859, %v5262_v8  ;;  %v5273_v6 = vmul.f32 0.08216859, %v5270_v19  ;;  %v307_v21 = vadd.f32 %v295_v25, %v254_v2  ;;  %v310_v16 = vadd.f32 %v8675_v24, %v257_v17  ;;  %v8683_v48 = vld [vmem:[#allocation42_spill] sm:$0xff]  ;;  %v8684_v31 = vld [vmem:[#allocation43_spill] sm:$0xff] }
 0x219   :  { %8677 = vst [vmem:[#allocation16_spill] sm:$0xff] %v5248_v32  ;;  %v298_v57 = vsel %vm8286_vm4, %v8684_v31, %v8683_v48  ;;  %v8685_v30 = vld [vmem:[#allocation44_spill] sm:$0xff]  ;;  %v8686_v20 = vld [vmem:[#allocation45_spill] sm:$0xff]  ;;  %v309_v10 = vadd.f32 %v296_v11, %v256_v42  ;;  %v312_v0 = vadd.f32 %v8678_v50, %v259_v49  ;;  %v5293_v2 = vmul.f32 0.09546628, %v4899_v1 }
 0x21a   :  { %8680 = vst [vmem:[#allocation17_spill] sm:$0xff] %v5265_v60  ;;  %8681 = vst [vmem:[#allocation18_spill] sm:$0xff] %v5273_v6  ;;  %v5275_v33 = vpop.permute.xlu1 %1749  ;;  %v332_v3 = vsel %vm8285_vm5, %v8686_v20, %v8685_v30  ;;  %v5284_v59 = vpop.permute.xlu0 %1747  ;;  %v311_v17 = vadd.f32 %v297_v23, %v258_v58  ;;  %v347_v25 = vadd.f32 %v8688_v34, %v310_v16  ;;  %v8690_v20 = vld [vmem:[#allocation48_spill] sm:$0xff]  ;;  %v8691_v24 = vld [vmem:[#allocation49_spill] sm:$0xff]  ;;  %v5302_v49 = vmul.f32 0.094516374, %v4965_v12 }
 0x21b   :  { %8682 = vst [vmem:[#allocation19_spill] sm:$0xff] %v5275_v33  ;;  %8687 = vst [vmem:[#allocation20_spill] sm:$0xff] %v5284_v59  ;;  %v333_v33 = vsel %vm8285_vm5, %v8689_v5, %v8688_v34  ;;  %v334_v42 = vsel %vm8285_vm5, %v8691_v24, %v8690_v20  ;;  %v314_v5 = vadd.f32 %v8683_v48, %v261_v22  ;;  %v8694_v23 = vld [vmem:[#allocation50_spill] sm:$0xff]  ;;  %v8695_v16 = vld [vmem:[#allocation51_spill] sm:$0xff] }
 0x21c   :  { %2323 = vrot.lane.b32.xlu1 %v5237_v41, %s3716_s4  ;;  %2321 = vrot.lane.b32.xlu0 %v5253_v37, %s3716_s4  ;;  %8692 = vst [vmem:[#allocation21_spill] sm:$0xff] %v5302_v49  ;;  %v313_v11 = vadd.f32 %v298_v57, %v260_v47  ;;  %v345_v50 = vadd.f32 %v8685_v30, %v308_v14  ;;  %v8696_v59 = vld [vmem:[#allocation52_spill] sm:$0xff]  ;;  %v8697_v1 = vld [vmem:[#allocation53_spill] sm:$0xff]  ;;  %v8698_v12 = vld [vmem:[#allocation54_spill] sm:$0xff] }
 0x21d   :  { %v344_v31 = vadd.f32 %v332_v3, %v307_v21  ;;  %v346_v34 = vadd.f32 %v333_v33, %v309_v10  ;;  %v335_v24 = vsel %vm8285_vm5, %v8695_v16, %v8694_v23  ;;  %v369_v61 = vsel %vm368_vm6, %v8697_v1, %v8696_v59  ;;  %v8700_v47 = vld [vmem:[#allocation55_spill] sm:$0xff]  ;;  %v8701_v1 = vld [vmem:[#allocation56_spill] sm:$0xff]  ;;  %v8702_v33 = vld [vmem:[#allocation57_spill] sm:$0xff] }
 0x21e   :  { %v5306_v58 = vpop.permute.xlu1 %1753  ;;  %v384_v29 = vadd.f32 %v8698_v12, %v347_v25  ;;  %v5315_v36 = vpop.permute.xlu0 %1751  ;;  %v349_v22 = vadd.f32 %v8690_v20, %v312_v0  ;;  %v348_v30 = vadd.f32 %v334_v42, %v311_v17  ;;  %v382_v3 = vadd.f32 %v8696_v59, %v345_v50  ;;  %v8703_v48 = vld [vmem:[#allocation62_spill] sm:$0xff]  ;;  %v8706_v16 = vld [vmem:[#allocation61_spill] sm:$0xff] }
 0x21f   :  { %8693 = vst [vmem:[#allocation22_spill] sm:$0xff] %v5306_v58  ;;  %8699 = vst [vmem:[#allocation23_spill] sm:$0xff] %v5315_v36  ;;  %v5322_v10 = vmul.f32 0.09546628, %v4921_v9  ;;  %v370_v14 = vsel %vm368_vm6, %v8700_v47, %v8698_v12  ;;  %v371_v21 = vsel %vm368_vm6, %v8702_v33, %v8701_v1  ;;  %v5334_v59 = vmul.f32 0.09546628, %v4893_v28 }
 0x220   :  { %2365 = vrot.lane.b32.xlu1 %v5293_v2, %s3717_s5  ;;  %v421_v57 = vadd.f32 %v8703_v48, %v384_v29  ;;  %2325 = vrot.lane.b32.xlu0 %v5302_v49, %s3716_s4  ;;  %v351_v0 = vadd.f32 %v8694_v23, %v314_v5  ;;  %v350_v17 = vadd.f32 %v335_v24, %v313_v11  ;;  %v8705_v12 = vld [vmem:[#allocation60_spill] sm:$0xff]  ;;  %v8707_v47 = vld [vmem:[#allocation63_spill] sm:$0xff]  ;;  %v5354_v23 = vmul.f32 0.09546628, %v4943_v13 }
 0x221   :  { %v381_v25 = vadd.f32 %v369_v61, %v344_v31  ;;  %v386_v20 = vadd.f32 %v8701_v1, %v349_v22  ;;  %v419_v50 = vadd.f32 %v8705_v12, %v382_v3  ;;  %v406_v29 = vsel %vm405_vm7, %v8706_v16, %v8705_v12  ;;  %v8709_v11 = vld [vmem:[#allocation64_spill] sm:$0xff]  ;;  %v8711_v1 = vld [vmem:[#allocation59_spill] sm:$0xff] }
 0x222   :  { %v5338_v42 = vpop.permute.xlu1 %1757  ;;  %v407_v33 = vsel %vm405_vm7, %v8707_v47, %v8703_v48  ;;  %v458_v49 = vadd.f32 %v4341_v52, %v421_v57  ;;  %v5348_v36 = vpop.permute.xlu0 %1755  ;;  %v383_v5 = vadd.f32 %v370_v14, %v346_v34  ;;  %v385_v61 = vadd.f32 %v371_v21, %v348_v30  ;;  %v8710_v30 = vld [vmem:[#allocation58_spill] sm:$0xff] }
 0x223   :  { %8704 = vst [vmem:[#allocation24_spill] sm:$0xff] %v5338_v42  ;;  %8708 = vst [vmem:[#allocation25_spill] sm:$0xff] %v5348_v36  ;;  %v423_v31 = vadd.f32 %v8709_v11, %v386_v20  ;;  %v456_v24 = vadd.f32 %v4335_v54, %v419_v50  ;;  %v444_v22 = vsel %vm8266_vm8, %v4343_v53, %v4341_v52  ;;  %v5366_v34 = vmul.f32 0.09546628, %v4912_v4  ;;  %v8713_v52 = vld [vmem:[#allocation65_spill] sm:$0xff]  ;;  %v8716_v47 = vld [vmem:[#allocation66_spill] sm:$0xff] }
 0x224   :  { %2369 = vrot.lane.b32.xlu1 %v5322_v10, %s3717_s5  ;;  %v5361_v3 = vadd.f32 %v4369_v56, %v458_v49  ;;  %2367 = vrot.lane.b32.xlu0 %v5334_v59, %s3717_s5  ;;  %v388_v14 = vadd.f32 %v8710_v30, %v351_v0  ;;  %v372_v21 = vsel %vm368_vm6, %v8711_v1, %v8710_v30  ;;  %v8714_v0 = vld [vmem:[#allocation71_spill] sm:$0xff] }
 0x225   :  { %v418_v48 = vadd.f32 %v406_v29, %v381_v25  ;;  %v420_v57 = vadd.f32 %v407_v33, %v383_v5  ;;  %v408_v53 = vsel %vm405_vm7, %v8713_v52, %v8709_v11  ;;  %v443_v49 = vsel %vm8266_vm8, %v4337_v51, %v4335_v54  ;;  %v8717_v25 = vld [vmem:[#allocation67_spill] sm:$0xff]  ;;  %v8718_v5 = vld [vmem:[#allocation68_spill] sm:$0xff]  ;;  %v8719_v11 = vld [vmem:[#allocation73_spill] sm:$0xff] }
 0x226   :  { %v5372_v20 = vpop.permute.xlu1 %1781  ;;  %v460_v12 = vadd.f32 %v4347_v55, %v423_v31  ;;  %v493_v50 = vadd.f32 %v8714_v0, %v456_v24  ;;  %v5382_v16 = vpop.permute.xlu0 %1779  ;;  %v409_v29 = vsel %vm405_vm7, %v8717_v25, %v8716_v47  ;;  %v445_v30 = vsel %vm8266_vm8, %v8718_v5, %v4347_v55  ;;  %v8720_v51 = vld [vmem:[#allocation72_spill] sm:$0xff]  ;;  %v8721_v24 = vld [vmem:[#allocation74_spill] sm:$0xff] }
 0x227   :  { %8712 = vst [vmem:[#allocation26_spill] sm:$0xff] %v5372_v20  ;;  %8715 = vst [vmem:[#allocation27_spill] sm:$0xff] %v5382_v16  ;;  %v457_v33 = vadd.f32 %v444_v22, %v420_v57  ;;  %v481_v1 = vsel %vm479_vm9, %v8719_v11, %v4369_v56  ;;  %v480_v54 = vsel %vm479_vm9, %v8720_v51, %v8714_v0  ;;  %v5399_v31 = vmul.f32 0.08638146, %v5361_v3  ;;  %v3680_v25 = vld [vmem:[%s8110_s2 + $0x10] sm:$0xff] }
 0x228   :  { %2373 = vrot.lane.b32.xlu1 %v5354_v23, %s3717_s5  ;;  %v5402_v22 = vadd.f32 %v8721_v24, %v460_v12  ;;  %2371 = vrot.lane.b32.xlu0 %v5366_v34, %s3717_s5  ;;  %v5407_v55 = vmul.f32 0.09546628, %v4934_v44  ;;  %v387_v56 = vadd.f32 %v372_v21, %v350_v17  ;;  %v422_v57 = vadd.f32 %v408_v53, %v385_v61 }
 0x229   :  { %v455_v52 = vadd.f32 %v443_v49, %v418_v48  ;;  %v5412_v0 = vmul.f32 0.08216859, %v3680_v25  ;;  %v425_v12 = vadd.f32 %v8716_v47, %v388_v14  ;;  %v505_v11 = vmul.f32 0.08638146, %v493_v50  ;;  %v8726_v14 = vld [vmem:[#allocation69_spill] sm:$0xff] }
 0x22a   :  { %v5414_v5 = vpop.permute.xlu1 %1785  ;;  %v536_v51 = vmul.f32 0.08990675, %v493_v50  ;;  %v5417_v16 = vadd.f32 %v481_v1, %v457_v33  ;;  %v5419_v20 = vpop.permute.xlu0 %1783  ;;  %v5421_v17 = vadd.f32 %v409_v29, %v387_v56  ;;  %v459_v61 = vadd.f32 %v445_v30, %v422_v57  ;;  %v8727_v29 = vld [vmem:[#allocation70_spill] sm:$0xff] }
 0x22b   :  { %8722 = vst [vmem:[#allocation28_spill] sm:$0xff] %v5412_v0  ;;  %8723 = vst [vmem:[#allocation29_spill] sm:$0xff] %v5414_v5  ;;  %v5423_v21 = vadd.f32 %v480_v54, %v455_v52  ;;  %v5429_v48 = vmul.f32 %v5262_v8, %v5090_v27  ;;  %v5432_v53 = vadd.f32 %v8726_v14, %v425_v12  ;;  %v501_v49 = vmul.f32 0.08216859, %v493_v50 }
 0x22c   :  { %8724 = vst [vmem:[#allocation30_spill] sm:$0xff] %v5419_v20  ;;  %2401 = vrot.lane.b32.xlu1 %v5293_v2, %s3718_s6  ;;  %v521_v47 = vrot.slane %v5399_v31, 1  ;;  %v5436_v33 = vmul.f32 0.08638146, %v5402_v22  ;;  %2375 = vrot.lane.b32.xlu0 %v5407_v55, %s3717_s5  ;;  %v5443_v2 = vsel %vm8266_vm8, %v8727_v29, %v8726_v14  ;;  %v5445_v30 = vmul.f32 0.09264482, %v493_v50 }
 0x22d   :  { %8725 = vst [vmem:[#allocation31_spill] sm:$0xff] %v5429_v48  ;;  %v5447_v27 = vmul.f32 0.094516374, %v493_v50  ;;  %v5450_v8 = vmul.f32 0.08990675, %v5361_v3  ;;  %v520_v54 = vrot.slane %v505_v11, 1 }
 0x22e   :  { %v5452_v1 = vpop.permute.xlu1 %1789  ;;  %v551_v56 = vrot.slane %v536_v51, 2  ;;  %v5454_v57 = vmul.f32 0.09546628, %v493_v50  ;;  %v5457_v52 = vmul.f32 0.08638146, %v5417_v16  ;;  %v5459_v12 = vpop.permute.xlu0 %1787  ;;  %v8730_v29 = vld [vmem:[#allocation75_spill] sm:$0xff]  ;;  %v5471_v50 = vmul.f32 %v3680_v25, %v5076_v38 }
 0x22f   :  { %8728 = vst [vmem:[#allocation32_spill] sm:$0xff] %v5452_v1  ;;  %8729 = vst [vmem:[#allocation33_spill] sm:$0xff] %v5459_v12  ;;  %v504_v14 = vmul.f32 0.08638146, %v5423_v21  ;;  %v482_v20 = vsel %vm479_vm9, %v8730_v29, %v8721_v24  ;;  %v5468_v11 = vmul.f32 0.08638146, %v5429_v48  ;;  %v522_v1 = vsel %vm516_vm10, %v520_v54, %v521_v47 }
 0x230   :  { %2405 = vrot.lane.b32.xlu1 %v5322_v10, %s3718_s6  ;;  %8732 = vst [vmem:[#allocation35_spill] sm:$0xff] %v5471_v50  ;;  %v500_v51 = vmul.f32 0.08216859, %v5423_v21  ;;  %v525_v12 = vrot.slane %v5436_v33, 1  ;;  %2403 = vrot.lane.b32.xlu0 %v5334_v59, %s3718_s6  ;;  %v5480_v24 = vmul.f32 %v5245_v15, %v5084_v39  ;;  %v582_v10 = vrot.slane %v5445_v30, 3 }
 0x231   :  { %8731 = vst [vmem:[#allocation34_spill] sm:$0xff] %v5468_v11  ;;  %v552_v38 = vrot.slane %v5450_v8, 2  ;;  %v5486_v25 = vmul.f32 0.09264482, %v5361_v3  ;;  %v5493_v36 = vmul.f32 0.08990675, %v5402_v22  ;;  %v5495_v39 = vadd.f32 %v482_v20, %v459_v61 }
 0x232   :  { %8733 = vst [vmem:[#allocation36_spill] sm:$0xff] %v5480_v24  ;;  %v5488_v5 = vpop.permute.xlu1 %1793  ;;  %v5497_v15 = vpop.permute.xlu0 %1791  ;;  %v517_v30 = vrot.slane %v504_v14, 1  ;;  %v535_v29 = vmul.f32 0.08990675, %v5423_v21  ;;  %v532_v42 = vadd.f32 %v522_v1, %v501_v49  ;;  %v5506_v54 = vmul.f32 0.08990675, %v5417_v16 }
 0x233   :  { %8734 = vst [vmem:[#allocation37_spill] sm:$0xff] %v5488_v5  ;;  %8735 = vst [vmem:[#allocation38_spill] sm:$0xff] %v5497_v15  ;;  %v5503_v5 = vmul.f32 0.08638146, %v5471_v50  ;;  %v526_v59 = vsel %vm516_vm10, %v521_v47, %v525_v12  ;;  %v5512_v20 = vmul.f32 0.08638146, %v5480_v24  ;;  %v5516_v61 = vmul.f32 %v5270_v19, %v5070_v40 }
 0x234   :  { %2851 = vrot.lane.b32.xlu1 %v5468_v11, %s3713_s20  ;;  %2407 = vrot.lane.b32.xlu0 %v5366_v34, %s3718_s6  ;;  %v503_v49 = vmul.f32 0.08216859, %v5361_v3  ;;  %v553_v1 = vsel %vm547_vm11, %v551_v56, %v552_v38  ;;  %v583_v14 = vrot.slane %v5486_v25, 3  ;;  %v5522_v11 = vmul.f32 0.094516374, %v5361_v3 }
 0x235   :  { %8736 = vst [vmem:[#allocation39_spill] sm:$0xff] %v5503_v5  ;;  %8737 = vst [vmem:[#allocation40_spill] sm:$0xff] %v5512_v20  ;;  %v8740_v34 = vrot.slane %v5457_v52, 1  ;;  %v556_v15 = vrot.slane %v5493_v36, 2  ;;  %v5531_v40 = vmul.f32 0.08638146, %v5495_v39  ;;  %v563_v44 = vadd.f32 %v553_v1, %v532_v42 }
 0x236   :  { %8738 = vst [vmem:[#allocation41_spill] sm:$0xff] %v5516_v61  ;;  %v5524_v47 = vpop.permute.xlu1 %1817  ;;  %v5534_v19 = vmul.f32 0.09264482, %v5402_v22  ;;  %v5536_v56 = vpop.permute.xlu0 %1815  ;;  %v566_v13 = vmul.f32 0.09264482, %v5423_v21  ;;  %v549_v9 = vrot.slane %v5506_v54, 2  ;;  %v584_v58 = vsel %vm578_vm12, %v582_v10, %v583_v14 }
 0x237   :  { %8739 = vst [vmem:[#allocation42_spill] sm:$0xff] %v5524_v47  ;;  %v519_v12 = vsel %vm516_vm10, %v517_v30, %v8740_v34  ;;  %8741 = vst [vmem:[#allocation43_spill] sm:$0xff] %v5536_v56  ;;  %v534_v47 = vadd.f32 %v526_v59, %v503_v49  ;;  %v548_v30 = vrot.slane %v535_v29, 2  ;;  %v5543_v34 = vmul.f32 0.09546628, %v5361_v3 }
 0x238   :  { %2855 = vrot.lane.b32.xlu1 %v5503_v5, %s3713_s20  ;;  %2853 = vrot.lane.b32.xlu0 %v5512_v20, %s3713_s20  ;;  %v5549_v56 = vmul.f32 0.08638146, %v5516_v61  ;;  %v614_v42 = vrot.slane %v5522_v11, 4  ;;  %v531_v59 = vadd.f32 %v519_v12, %v500_v51  ;;  %v5554_v49 = vmul.f32 0.09264482, %v5417_v16 }
 0x239   :  { %v557_v3 = vsel %vm547_vm11, %v552_v38, %v556_v15  ;;  %v5560_v1 = vmul.f32 0.094516374, %v5402_v22  ;;  %v523_v5 = vrot.slane %v5531_v40, 1  ;;  %v587_v20 = vrot.slane %v5534_v19, 3 }
 0x23a   :  { %8742 = vst [vmem:[#allocation44_spill] sm:$0xff] %v5549_v56  ;;  %v5556_v29 = vpop.permute.xlu1 %1821  ;;  %v5564_v4 = vpop.permute.xlu0 %1819  ;;  %v5568_v51 = vmul.f32 0.094516374, %v5423_v21  ;;  %v594_v12 = vadd.f32 %v584_v58, %v563_v44  ;;  %v565_v28 = vadd.f32 %v557_v3, %v534_v47  ;;  %v579_v38 = vrot.slane %v566_v13, 3 }
 0x23b   :  { %8743 = vst [vmem:[#allocation45_spill] sm:$0xff] %v5556_v29  ;;  %8744 = vst [vmem:[#allocation46_spill] sm:$0xff] %v5564_v4  ;;  %v645_v15 = vrot.slane %v5543_v34, 5  ;;  %v550_v29 = vsel %vm547_vm11, %v548_v30, %v549_v9  ;;  %v5575_v0 = vmul.f32 0.08990675, %v5495_v39  ;;  %v8745_v10 = vrot.slane %v5447_v27, 4 }
 0x23c   :  { %2409 = vrot.lane.b32.xlu1 %v5354_v23, %s3718_s6  ;;  %2857 = vrot.lane.b32.xlu0 %v5549_v56, %s3713_s20  ;;  %v562_v58 = vadd.f32 %v550_v29, %v531_v59  ;;  %v580_v47 = vrot.slane %v5554_v49, 3  ;;  %v5584_v23 = vmul.f32 0.094516374, %v5417_v16  ;;  %v618_v30 = vrot.slane %v5560_v1, 4 }
 0x23d   :  { %v615_v44 = vsel %vm609_vm13, %v8745_v10, %v614_v42  ;;  %v5590_v3 = vmul.f32 0.09546628, %v5402_v22  ;;  %v8747_v4 = vrot.slane %v5457_v52, 1  ;;  %v588_v45 = vsel %vm578_vm12, %v583_v14, %v587_v20  ;;  %v5604_v22 = vld [vmem:[%s8110_s2 + $0x20] sm:$0xff] }
 0x23e   :  { %v5586_v13 = vpop.permute.xlu1 %1825  ;;  %v5596_v10 = vpop.permute.xlu0 %1823  ;;  %v625_v59 = vadd.f32 %v615_v44, %v594_v12  ;;  %v502_v29 = vmul.f32 0.08216859, %v5417_v16  ;;  %v596_v6 = vadd.f32 %v588_v45, %v565_v28  ;;  %vm8319_vm8 = vcmask 1040384  }
 0x23f   :  { %8746 = vst [vmem:[#allocation47_spill] sm:$0xff] %v5586_v13  ;;  %v524_v56 = vsel %vm516_vm10, %v8747_v4, %v523_v5  ;;  %8748 = vst [vmem:[#allocation48_spill] sm:$0xff] %v5596_v10  ;;  %v5608_v4 = vmul.f32 %v5604_v22, %v5107_v18  ;;  %v5611_v5 = vmul.f32 0.09546628, %v5423_v21  ;;  %v8749_v20 = vrot.slane %v5454_v57, 5 }
 0x240   :  { %2437 = vrot.lane.b32.xlu1 %v5184_v62, %s3719_s7  ;;  %v554_v28 = vrot.slane %v5575_v0, 2  ;;  %v5618_v62 = vmul.f32 0.09264482, %v5495_v39  ;;  %2411 = vrot.lane.b32.xlu0 %v5407_v55, %s3718_s6  ;;  %v581_v14 = vsel %vm578_vm12, %v579_v38, %v580_v47  ;;  %v611_v18 = vrot.slane %v5584_v23, 4 }
 0x241   :  { %v646_v45 = vsel %vm640_vm14, %v8749_v20, %v645_v15  ;;  %v5625_v12 = vmul.f32 0.09546628, %v5417_v16  ;;  %v533_v21 = vadd.f32 %v524_v56, %v502_v29  ;;  %v593_v10 = vadd.f32 %v581_v14, %v562_v58 }
 0x242   :  { %v5627_v44 = vpop.permute.xlu1 %1829  ;;  %v649_v20 = vrot.slane %v5590_v3, 5  ;;  %v619_v13 = vsel %vm609_vm13, %v614_v42, %v618_v30  ;;  %v664_v43 = vrot.slane %v5543_v34, 6  ;;  %v5632_v60 = vpop.permute.xlu0 %1827  ;;  %v610_v55 = vrot.slane %v5568_v51, 4 }
 0x243   :  { %8750 = vst [vmem:[#allocation49_spill] sm:$0xff] %v5627_v44  ;;  %8751 = vst [vmem:[#allocation50_spill] sm:$0xff] %v5632_v60  ;;  %v627_v38 = vadd.f32 %v619_v13, %v596_v6  ;;  %v656_v32 = vadd.f32 %v646_v45, %v625_v59  ;;  %v5638_v16 = vmul.f32 0.08638146, %v5608_v4  ;;  %v555_v56 = vsel %vm547_vm11, %v549_v9, %v554_v28  ;;  %v5650_v6 = vld [vmem:[%s8110_s2 + $0x28] sm:$0xff] }
 0x244   :  { %2441 = vrot.lane.b32.xlu1 %v5217_v7, %s3719_s7  ;;  %v5642_v58 = vmul.f32 0.094516374, %v5495_v39  ;;  %v585_v42 = vrot.slane %v5618_v62, 3  ;;  %2439 = vrot.lane.b32.xlu0 %v5175_v63, %s3719_s7  ;;  %v5654_v7 = vmul.f32 %v5650_v6, %v5101_v26  ;;  %v612_v34 = vsel %vm609_vm13, %v610_v55, %v611_v18 }
 0x245   :  { %8752 = vst [vmem:[#allocation51_spill] sm:$0xff] %v5638_v16  ;;  %v642_v9 = vrot.slane %v5625_v12, 5  ;;  %v668_v13 = vrot.slane %v5590_v3, 6  ;;  %v564_v30 = vadd.f32 %v555_v56, %v533_v21  ;;  %v624_v29 = vadd.f32 %v612_v34, %v593_v10  ;;  %v8759_v34 = vld [vmem:[#allocation76_spill] sm:$0xff] }
 0x246   :  { %v5659_v59 = vpop.permute.xlu1 %1853  ;;  %v650_v63 = vsel %vm640_vm14, %v645_v15, %v649_v20  ;;  %v683_v45 = vrot.slane %v5522_v11, 7  ;;  %v8754_v28 = vrot.slane %v5454_v57, 6  ;;  %v5666_v26 = vpop.permute.xlu0 %1851  ;;  %v641_v55 = vrot.slane %v5611_v5, 5 }
 0x247   :  { %8753 = vst [vmem:[#allocation52_spill] sm:$0xff] %v5659_v59  ;;  %8755 = vst [vmem:[#allocation53_spill] sm:$0xff] %v5666_v26  ;;  %v658_v60 = vadd.f32 %v650_v63, %v627_v38  ;;  %v5672_v3 = vmul.f32 0.08990675, %v5429_v48  ;;  %v616_v15 = vrot.slane %v5642_v58, 4  ;;  %v586_v57 = vsel %vm578_vm12, %v580_v47, %v585_v42 }
 0x248   :  { %v665_v14 = vsel %vm659_vm15, %v8754_v28, %v664_v43  ;;  %2859 = vrot.lane.b32.xlu1 %v5638_v16, %s3713_s20  ;;  %v5676_v11 = vmul.f32 0.09546628, %v5495_v39  ;;  %2443 = vrot.lane.b32.xlu0 %v5208_v35, %s3719_s7  ;;  %v5682_v10 = vmul.f32 0.08638146, %v5654_v7  ;;  %v687_v21 = vrot.slane %v5560_v1, 7 }
 0x249   :  { %v675_v44 = vadd.f32 %v665_v14, %v656_v32  ;;  %8756 = vst [vmem:[#allocation54_spill] sm:$0xff] %v5672_v3  ;;  %v643_v32 = vsel %vm640_vm14, %v641_v55, %v642_v9  ;;  %v595_v20 = vadd.f32 %v586_v57, %v564_v30  ;;  %v661_v38 = vrot.slane %v5625_v12, 6 }
 0x24a   :  { %8757 = vst [vmem:[#allocation55_spill] sm:$0xff] %v5682_v10  ;;  %v5687_v56 = vpop.permute.xlu1 %1857  ;;  %v669_v39 = vsel %vm659_vm15, %v664_v43, %v668_v13  ;;  %v499_v47 = vadd.f32 %v8759_v34, %v5432_v53  ;;  %v8760_v42 = vrot.slane %v5447_v27, 7  ;;  %v655_v63 = vadd.f32 %v643_v32, %v624_v29  ;;  %v5695_v28 = vpop.permute.xlu0 %1855  ;;  %v8764_v13 = vld [vmem:[#allocation77_spill] sm:$0xff] }
 0x24b   :  { %8758 = vst [vmem:[#allocation56_spill] sm:$0xff] %v5687_v56  ;;  %8761 = vst [vmem:[#allocation57_spill] sm:$0xff] %v5695_v28  ;;  %v660_v14 = vrot.slane %v5611_v5, 6  ;;  %v677_v1 = vadd.f32 %v669_v39, %v658_v60  ;;  %v5701_v12 = vmul.f32 0.08990675, %v5471_v50  ;;  %v461_v43 = vadd.f32 %v5443_v2, %v5421_v17  ;;  %v8921_v28 = vld [vmem:[#allocation198_spill] sm:$0xff] }
 0x24c   :  { %v684_v35 = vsel %vm8319_vm8, %v8760_v42, %v683_v45  ;;  %2903 = vrot.lane.b32.xlu1 %v5672_v3, %s3714_s29  ;;  %v647_v53 = vrot.slane %v5676_v11, 5  ;;  %v617_v27 = vsel %vm609_vm13, %v611_v18, %v616_v15  ;;  %2861 = vrot.lane.b32.xlu0 %v5682_v10, %s3713_s20  ;;  %v5710_v5 = vmul.f32 0.08990675, %v5480_v24  ;;  %v8847_v10 = vld [vmem:[#allocation103_spill] sm:$0xff] }
 0x24d   :  { %v694_v30 = vadd.f32 %v684_v35, %v675_v44  ;;  %8762 = vst [vmem:[#allocation62_spill] sm:$0xff] %v5701_v12  ;;  %v626_v60 = vadd.f32 %v617_v27, %v595_v20  ;;  %v680_v44 = vrot.slane %v5584_v23, 7  ;;  %v483_v29 = vsel %vm479_vm9, %v8764_v13, %v8759_v34  ;;  %v3683_v27 = vld [vmem:[%s8110_s2 + $0x38] sm:$0x3] }
 0x24e   :  { %8763 = vst [vmem:[#allocation60_spill] sm:$0xff] %v5710_v5  ;;  %v662_v55 = vsel %vm659_vm15, %v660_v14, %v661_v38  ;;  %v5717_v17 = vpop.permute.xlu1 %1861  ;;  %v688_v2 = vsel %vm8319_vm8, %v683_v45, %v687_v21  ;;  %v709_v18 = vrot.slane %v5493_v36, 1  ;;  %v702_v15 = vmul.f32 0.08990675, %v499_v47  ;;  %v5721_v32 = vpop.permute.xlu0 %1859 }
 0x24f   :  { %8765 = vst [vmem:[#allocation61_spill] sm:$0xff] %v5717_v17  ;;  %v674_v57 = vadd.f32 %v662_v55, %v655_v63  ;;  %8766 = vst [vmem:[#allocation63_spill] sm:$0xff] %v5721_v32  ;;  %v679_v20 = vrot.slane %v5568_v51, 7  ;;  %v708_v23 = vrot.slane %v5450_v8, 1  ;;  %v696_v39 = vadd.f32 %v688_v2, %v677_v1 }
 0x250   :  { %v698_v42 = vadd.f32 %v694_v30, %v5486_v25  ;;  %2907 = vrot.lane.b32.xlu1 %v5701_v12, %s3714_s29  ;;  %v666_v34 = vrot.slane %v5676_v11, 6  ;;  %v648_v45 = vsel %vm640_vm14, %v642_v9, %v647_v53  ;;  %v498_v21 = vadd.f32 %v483_v29, %v461_v43  ;;  %2905 = vrot.lane.b32.xlu0 %v5710_v5, %s3714_s29 }
 0x251   :  { %v5733_v36 = vmul.f32 0.08990675, %v5516_v61  ;;  %v724_v51 = vmul.f32 0.08638146, %v499_v47  ;;  %v657_v35 = vadd.f32 %v648_v45, %v626_v60  ;;  %v681_v8 = vsel %vm8319_vm8, %v679_v20, %v680_v44  ;;  %v8774_v45 = vld [vmem:[#allocation79_spill] sm:$0xff] }
 0x252   :  { %v750_v25 = vmul.f32 0.08216859, %v5650_v6  ;;  %v5737_v63 = vpop.permute.xlu1 %1865  ;;  %v710_v14 = vsel %vm516_vm10, %v708_v23, %v709_v18  ;;  %v731_v11 = vrot.slane %v5436_v33, 2  ;;  %v713_v9 = vrot.slane %v702_v15, 1  ;;  %v5741_v30 = vpop.permute.xlu0 %1863 }
 0x253   :  { %8767 = vst [vmem:[#allocation64_spill] sm:$0xff] %v5733_v36  ;;  %8768 = vst [vmem:[#allocation58_spill] sm:$0xff] %v5737_v63  ;;  %v693_v1 = vadd.f32 %v681_v8, %v674_v57  ;;  %v700_v43 = vadd.f32 %v696_v39, %v5534_v19  ;;  %v720_v53 = vadd.f32 %v710_v14, %v698_v42  ;;  %v749_v47 = vmul.f32 0.08216859, %v5604_v22 }
 0x254   :  { %8769 = vst [vmem:[#allocation59_spill] sm:$0xff] %v5741_v30  ;;  %v752_v6 = vmul.f32 0.08216859, %v3683_v27  ;;  %2445 = vrot.lane.b32.xlu1 %v5253_v37, %s3719_s7  ;;  %v730_v60 = vrot.slane %v5399_v31, 2  ;;  %v685_v33 = vrot.slane %v5642_v58, 7  ;;  %v667_v13 = vsel %vm659_vm15, %v661_v38, %v666_v34  ;;  %2909 = vrot.lane.b32.xlu0 %v5733_v36, %s3714_s29  ;;  %v8773_v34 = vld [vmem:[#allocation78_spill] sm:$0xff] }
 0x255   :  { %v701_v29 = vmul.f32 0.08990675, %v498_v21  ;;  %v735_v19 = vrot.slane %v724_v51, 2  ;;  %v676_v22 = vadd.f32 %v667_v13, %v657_v35  ;;  %v706_v55 = vrot.slane %v5575_v0, 1  ;;  %v3684_v0 = vld [vmem:[%s8110_s2 + $0x30] sm:$0x3] }
 0x256   :  { %v723_v2 = vmul.f32 0.08638146, %v498_v21  ;;  %v5756_v15 = vpop.permute.xlu1 %2159  ;;  %v732_v57 = vsel %vm547_vm11, %v730_v60, %v731_v11  ;;  %v714_v37 = vsel %vm516_vm10, %v709_v18, %v713_v9  ;;  %v728_v31 = vrot.slane %v5531_v40, 2  ;;  %v5762_v38 = vpop.permute.xlu0 %2157  ;;  %v8782_v60 = vld [vmem:[#allocation17_spill] sm:$0xff]  ;;  %v8783_v13 = vld [vmem:[#allocation232_spill] sm:$0xff] }
 0x257   :  { %8770 = vst [vmem:[#allocation65_spill] sm:$0xff] %v5756_v15  ;;  %v697_v58 = vadd.f32 %v693_v1, %v5554_v49  ;;  %8771 = vst [vmem:[#allocation71_spill] sm:$0xff] %v5762_v38  ;;  %v705_v20 = vrot.slane %v5506_v54, 1  ;;  %v722_v23 = vadd.f32 %v714_v37, %v700_v43  ;;  %v5765_v39 = vadd.f32 %v732_v57, %v720_v53  ;;  %v8777_v1 = vld [vmem:[#allocation80_spill] sm:$0xff]  ;;  %v8778_v43 = vld [vmem:[#allocation81_spill] sm:$0xff] }
 0x258   :  { %v751_v42 = vmul.f32 0.08216859, %v3684_v0  ;;  %2473 = vrot.lane.b32.xlu1 %v5049_v46, %s3720_s8  ;;  %v727_v18 = vrot.slane %v5457_v52, 2  ;;  %v686_v40 = vsel %vm8319_vm8, %v680_v44, %v685_v33  ;;  %v711_v49 = vrot.slane %v701_v29, 1  ;;  %2447 = vrot.lane.b32.xlu0 %v5237_v41, %s3719_s7  ;;  %v8776_v44 = vld [vmem:[#allocation16_spill] sm:$0xff]  ;;  %v8786_v57 = vld [vmem:[#allocation82_spill] sm:$0xff] }
 0x259   :  { %8772 = vst [vmem:[#allocation66_spill] sm:$0xff] %v5765_v39  ;;  %v785_v54 = vsel %vm82_vm0, %v8774_v45, %v8773_v34  ;;  %v736_v21 = vsel %vm547_vm11, %v731_v11, %v735_v19  ;;  %v695_v51 = vadd.f32 %v686_v40, %v676_v22  ;;  %v707_v35 = vsel %vm516_vm10, %v705_v20, %v706_v55  ;;  %v8785_v22 = vld [vmem:[#allocation18_spill] sm:$0xff]  ;;  %v8787_v37 = vld [vmem:[#allocation83_spill] sm:$0xff]  ;;  %v8788_v20 = vld [vmem:[#allocation84_spill] sm:$0xff] }
 0x25a   :  { %v733_v8 = vrot.slane %v723_v2, 2  ;;  %v5781_v14 = vpop.permute.xlu1 %2163  ;;  %v729_v46 = vsel %vm547_vm11, %v727_v18, %v728_v31  ;;  %v719_v52 = vadd.f32 %v707_v35, %v697_v58  ;;  %v798_v9 = vadd.f32 %v8773_v34, %v8776_v44  ;;  %v5789_v27 = vpop.permute.xlu0 %2161  ;;  %v8790_v18 = vld [vmem:[#allocation228_spill] sm:$0xff]  ;;  %v8795_v44 = vld [vmem:[#allocation86_spill] sm:$0xff]  ;;  %v8870_v15 = vld [vmem:[#allocation133_spill] sm:$0xff] }
 0x25b   :  { %8775 = vst [vmem:[#allocation67_spill] sm:$0xff] %v5781_v14  ;;  %v786_v53 = vsel %vm82_vm0, %v8778_v43, %v8777_v1  ;;  %8779 = vst [vmem:[#allocation68_spill] sm:$0xff] %v5789_v27  ;;  %v5791_v41 = vadd.f32 %v736_v21, %v722_v23  ;;  %v5795_v11 = vmul.f32 %v5765_v39, %v5765_v39  ;;  %v5801_v29 = vmul.f32 0.08990675, %v5608_v4  ;;  %v8789_v23 = vld [vmem:[#allocation85_spill] sm:$0xff]  ;;  %v8825_v39 = vld [vmem:[#allocation115_spill] sm:$0xff] }
 0x25c   :  { %v797_v33 = vadd.f32 %v785_v54, %v8782_v60  ;;  %2477 = vrot.lane.b32.xlu1 %v8783_v13, %s3720_s8  ;;  %v5804_v19 = vsel %vm516_vm10, %v706_v55, %v711_v49  ;;  %v800_v2 = vadd.f32 %v8777_v1, %v8785_v22  ;;  %v787_v58 = vsel %vm82_vm0, %v8787_v37, %v8786_v57  ;;  %v8792_v49 = vld [vmem:[#allocation28_spill] sm:$0xff]  ;;  %v8796_v1 = vld [vmem:[#allocation87_spill] sm:$0xff]  ;;  %v8804_v37 = vld [vmem:[#allocation93_spill] sm:$0xff] }
 0x25d   :  { %8780 = vst [vmem:[#allocation73_spill] sm:$0xff] %v5791_v41  ;;  %8781 = vst [vmem:[#allocation72_spill] sm:$0xff] %v5795_v11  ;;  %v788_v0 = vsel %vm82_vm0, %v8789_v23, %v8788_v20  ;;  %2475 = vrot.lane.b32.xlu0 %v8790_v18, %s3720_s8  ;;  %v5817_v40 = vadd.f32 %v695_v51, %v5618_v62  ;;  %v5820_v55 = vsel %vm547_vm11, %v728_v31, %v733_v8  ;;  %v8797_v60 = vld [vmem:[#allocation88_spill] sm:$0xff]  ;;  %v8798_v62 = vld [vmem:[#allocation89_spill] sm:$0xff] }
 0x25e   :  { %8784 = vst [vmem:[#allocation74_spill] sm:$0xff] %v5801_v29  ;;  %8791 = vst [vmem:[#allocation69_spill] sm:$0xff] %v5820_v55  ;;  %v799_v34 = vadd.f32 %v786_v53, %v8792_v49  ;;  %v802_v45 = vadd.f32 %v8786_v57, %v750_v25  ;;  %v5824_v54 = vpop.permute.xlu1 %2167  ;;  %v5826_v21 = vadd.f32 %v729_v46, %v719_v52  ;;  %v5835_v31 = vpop.permute.xlu0 %2165  ;;  %v5841_v46 = vmul.f32 0.09264482, %v5429_v48  ;;  %v8801_v52 = vld [vmem:[#allocation90_spill] sm:$0xff]  ;;  %v8802_v13 = vld [vmem:[#allocation91_spill] sm:$0xff] }
 0x25f   :  { %8793 = vst [vmem:[#allocation70_spill] sm:$0xff] %v5824_v54  ;;  %v804_v35 = vadd.f32 %v8788_v20, %v752_v6  ;;  %v837_v43 = vsel %vm135_vm1, %v8796_v1, %v8795_v44  ;;  %v838_v51 = vsel %vm135_vm1, %v8798_v62, %v8797_v60  ;;  %8799 = vst [vmem:[#allocation76_spill] sm:$0xff] %v5835_v31  ;;  %v8803_v57 = vld [vmem:[#allocation92_spill] sm:$0xff]  ;;  %v8808_v18 = vld [vmem:[#allocation94_spill] sm:$0xff] }
 0x260   :  { %8794 = vst [vmem:[#allocation75_spill] sm:$0xff] %v5826_v21  ;;  %v801_v8 = vadd.f32 %v787_v58, %v749_v47  ;;  %v803_v53 = vadd.f32 %v788_v0, %v751_v42  ;;  %v850_v25 = vadd.f32 %v8795_v44, %v798_v9  ;;  %2911 = vrot.lane.b32.xlu1 %v5801_v29, %s3714_s29  ;;  %8800 = vst [vmem:[#allocation77_spill] sm:$0xff] %v5841_v46  ;;  %v8805_v47 = vld [vmem:[#allocation231_spill] sm:$0xff]  ;;  %v8810_v1 = vld [vmem:[#allocation96_spill] sm:$0xff] }
 0x261   :  { %v852_v6 = vadd.f32 %v8797_v60, %v800_v2  ;;  %v839_v22 = vsel %vm135_vm1, %v8802_v13, %v8801_v52  ;;  %v840_v20 = vsel %vm135_vm1, %v8804_v37, %v8803_v57  ;;  %2479 = vrot.lane.b32.xlu0 %v8805_v47, %s3720_s8  ;;  %v5853_v42 = vmul.f32 0.08990675, %v5654_v7  ;;  %v8809_v49 = vld [vmem:[#allocation95_spill] sm:$0xff]  ;;  %v8811_v62 = vld [vmem:[#allocation97_spill] sm:$0xff]  ;;  %v8812_v37 = vld [vmem:[#allocation100_spill] sm:$0xff] }
 0x262   :  { %v849_v9 = vadd.f32 %v837_v43, %v797_v33  ;;  %v851_v58 = vadd.f32 %v838_v51, %v799_v34  ;;  %v854_v23 = vadd.f32 %v8801_v52, %v802_v45  ;;  %v856_v2 = vadd.f32 %v8803_v57, %v804_v35  ;;  %v5857_v0 = vpop.permute.xlu1 %2171  ;;  %v8813_v47 = vld [vmem:[#allocation101_spill] sm:$0xff]  ;;  %v5869_v34 = vpop.permute.xlu0 %2169  ;;  %v8826_v11 = vld [vmem:[#allocation120_spill] sm:$0xff]  ;;  %v8859_v54 = vld [vmem:[#allocation111_spill] sm:$0xff] }
 0x263   :  { %8806 = vst [vmem:[#allocation78_spill] sm:$0xff] %v5853_v42  ;;  %8807 = vst [vmem:[#allocation79_spill] sm:$0xff] %v5857_v0  ;;  %v889_v44 = vsel %vm188_vm2, %v8809_v49, %v8808_v18  ;;  %v904_v60 = vadd.f32 %v8810_v1, %v852_v6  ;;  %v890_v13 = vsel %vm188_vm2, %v8811_v62, %v8810_v1  ;;  %v5875_v51 = vmul.f32 0.09264482, %v5471_v50  ;;  %v8816_v6 = vld [vmem:[#allocation104_spill] sm:$0xff]  ;;  %v8817_v52 = vld [vmem:[#allocation105_spill] sm:$0xff] }
 0x264   :  { %v891_v33 = vsel %vm188_vm2, %v8813_v47, %v8812_v37  ;;  %8814 = vst [vmem:[#allocation16_spill] sm:$0xff] %v5869_v34  ;;  %v853_v45 = vadd.f32 %v839_v22, %v801_v8  ;;  %v855_v35 = vadd.f32 %v840_v20, %v803_v53  ;;  %v902_v43 = vadd.f32 %v8808_v18, %v850_v25  ;;  %v8818_v49 = vld [vmem:[#allocation108_spill] sm:$0xff]  ;;  %v8819_v1 = vld [vmem:[#allocation109_spill] sm:$0xff] }
 0x265   :  { %2955 = vrot.lane.b32.xlu1 %v5841_v46, %s3715_s30  ;;  %8815 = vst [vmem:[#allocation80_spill] sm:$0xff] %v5875_v51  ;;  %v892_v57 = vsel %vm188_vm2, %v8817_v52, %v8816_v6  ;;  %v941_v62 = vsel %vm241_vm3, %v8819_v1, %v8818_v49  ;;  %v8820_v47 = vld [vmem:[#allocation112_spill] sm:$0xff]  ;;  %2913 = vrot.lane.b32.xlu0 %v5853_v42, %s3714_s29  ;;  %v5887_v8 = vmul.f32 0.09264482, %v5480_v24  ;;  %v8823_v55 = vld [vmem:[#allocation113_spill] sm:$0xff]  ;;  %v8905_v42 = vld [vmem:[#allocation163_spill] sm:$0xff] }
 0x266   :  { %v956_v41 = vadd.f32 %v8820_v47, %v904_v60  ;;  %v901_v53 = vadd.f32 %v889_v44, %v849_v9  ;;  %v903_v25 = vadd.f32 %v890_v13, %v851_v58  ;;  %v906_v22 = vadd.f32 %v8812_v37, %v854_v23  ;;  %v5890_v18 = vpop.permute.xlu1 %2211  ;;  %v8824_v60 = vld [vmem:[#allocation114_spill] sm:$0xff]  ;;  %v5900_v63 = vpop.permute.xlu0 %2209  ;;  %v8828_v44 = vld [vmem:[#allocation116_spill] sm:$0xff]  ;;  %v8829_v13 = vld [vmem:[#allocation117_spill] sm:$0xff] }
 0x267   :  { %8821 = vst [vmem:[#allocation81_spill] sm:$0xff] %v5887_v8  ;;  %v905_v20 = vadd.f32 %v891_v33, %v853_v45  ;;  %8822 = vst [vmem:[#allocation17_spill] sm:$0xff] %v5890_v18  ;;  %v954_v52 = vadd.f32 %v8818_v49, %v902_v43  ;;  %v942_v1 = vsel %vm241_vm3, %v8823_v55, %v8820_v47  ;;  %v8830_v55 = vld [vmem:[#allocation118_spill] sm:$0xff]  ;;  %v8831_v45 = vld [vmem:[#allocation119_spill] sm:$0xff] }
 0x268   :  { %v943_v21 = vsel %vm241_vm3, %v8825_v39, %v8824_v60  ;;  %v1008_v30 = vadd.f32 %v8826_v11, %v956_v41  ;;  %8827 = vst [vmem:[#allocation232_spill] sm:$0xff] %v5900_v63  ;;  %v908_v9 = vadd.f32 %v8816_v6, %v856_v2  ;;  %v907_v58 = vadd.f32 %v892_v57, %v855_v35  ;;  %v8832_v41 = vld [vmem:[#allocation128_spill] sm:$0xff]  ;;  %v8835_v47 = vld [vmem:[#allocation121_spill] sm:$0xff]  ;;  %v8854_v63 = vld [vmem:[#allocation142_spill] sm:$0xff] }
 0x269   :  { %v953_v23 = vadd.f32 %v941_v62, %v901_v53  ;;  %v944_v37 = vsel %vm241_vm3, %v8829_v13, %v8828_v44  ;;  %2959 = vrot.lane.b32.xlu1 %v5875_v51, %s3715_s30  ;;  %v1006_v33 = vadd.f32 %v8830_v55, %v954_v52  ;;  %v993_v39 = vsel %vm8286_vm4, %v8831_v45, %v8830_v55  ;;  %v8836_v52 = vld [vmem:[#allocation126_spill] sm:$0xff]  ;;  %v8837_v13 = vld [vmem:[#allocation136_spill] sm:$0xff]  ;;  %v8860_v27 = vld [vmem:[#allocation213_spill] sm:$0xff] }
 0x26a   :  { %v1044_v43 = vadd.f32 %v8832_v41, %v1008_v30  ;;  %2957 = vrot.lane.b32.xlu0 %v5887_v8, %s3715_s30  ;;  %v5916_v2 = vmul.f32 0.09264482, %v5516_v61  ;;  %v955_v35 = vadd.f32 %v942_v1, %v903_v25  ;;  %v958_v6 = vadd.f32 %v8824_v60, %v906_v22  ;;  %v5920_v62 = vpop.permute.xlu1 %2215  ;;  %v8838_v45 = vld [vmem:[#allocation98_spill] sm:$0xff]  ;;  %v5930_v0 = vpop.permute.xlu0 %2213 }
 0x26b   :  { %v957_v57 = vadd.f32 %v943_v21, %v905_v20  ;;  %v960_v49 = vadd.f32 %v8828_v44, %v908_v9  ;;  %8834 = vst [vmem:[#allocation82_spill] sm:$0xff] %v5920_v62  ;;  %v994_v53 = vsel %vm8286_vm4, %v8835_v47, %v8826_v11  ;;  %v1042_v30 = vadd.f32 %v8836_v52, %v1006_v33  ;;  %v8840_v21 = vld [vmem:[#allocation99_spill] sm:$0xff]  ;;  %v8841_v1 = vld [vmem:[#allocation102_spill] sm:$0xff]  ;;  %v8842_v9 = vld [vmem:[#allocation236_spill] sm:$0xff] }
 0x26c   :  { %8833 = vst [vmem:[#allocation18_spill] sm:$0xff] %v5916_v2  ;;  %v1080_v55 = vadd.f32 %v8837_v13, %v1044_v43  ;;  %v5928_v34 = vmul.f32 0.08216859, %v8838_v45  ;;  %8839 = vst [vmem:[#allocation83_spill] sm:$0xff] %v5930_v0  ;;  %v959_v25 = vadd.f32 %v944_v37, %v907_v58  ;;  %v1005_v22 = vadd.f32 %v993_v39, %v953_v23  ;;  %v8843_v11 = vld [vmem:[#allocation122_spill] sm:$0xff]  ;;  %v8844_v44 = vld [vmem:[#allocation123_spill] sm:$0xff] }
 0x26d   :  { %v5933_v20 = vmul.f32 0.08216859, %v8840_v21  ;;  %v5936_v60 = vmul.f32 0.08216859, %v8841_v1  ;;  %2481 = vrot.lane.b32.xlu1 %v8842_v9, %s3720_s8  ;;  %v995_v33 = vsel %vm8286_vm4, %v8844_v44, %v8843_v11  ;;  %v8845_v43 = vld [vmem:[#allocation134_spill] sm:$0xff]  ;;  %v8846_v45 = vld [vmem:[#allocation144_spill] sm:$0xff]  ;;  %v1007_v23 = vadd.f32 %v994_v53, %v955_v35 }
 0x26e   :  { %v1078_v47 = vadd.f32 %v8845_v43, %v1042_v30  ;;  %v1116_v16 = vadd.f32 %v8846_v45, %v1080_v55  ;;  %v5946_v58 = vmul.f32 0.08216859, %v8847_v10  ;;  %2961 = vrot.lane.b32.xlu0 %v5916_v2, %s3715_s30  ;;  %v1010_v37 = vadd.f32 %v8843_v11, %v958_v6  ;;  %v8848_v39 = vld [vmem:[#allocation106_spill] sm:$0xff]  ;;  %v8849_v1 = vld [vmem:[#allocation107_spill] sm:$0xff]  ;;  %v5957_v44 = vpop.permute.xlu1 %2219  ;;  %v8851_v30 = vld [vmem:[#allocation124_spill] sm:$0xff]  ;;  %v5967_v11 = vpop.permute.xlu0 %2217 }
 0x26f   :  { %v5952_v21 = vmul.f32 0.08216859, %v8848_v39  ;;  %v5955_v9 = vmul.f32 0.08216859, %v8849_v1  ;;  %8850 = vst [vmem:[#allocation84_spill] sm:$0xff] %v5957_v44  ;;  %v8852_v0 = vld [vmem:[#allocation125_spill] sm:$0xff]  ;;  %v1009_v39 = vadd.f32 %v995_v33, %v957_v57 }
 0x270   :  { %v996_v55 = vsel %vm8286_vm4, %v8852_v0, %v8851_v30  ;;  %v8853_v10 = vld [vmem:[#allocation127_spill] sm:$0xff]  ;;  %v1114_v35 = vadd.f32 %v8854_v63, %v1078_v47  ;;  %v8855_v53 = vld [vmem:[#allocation152_spill] sm:$0xff]  ;;  %8856 = vst [vmem:[#allocation85_spill] sm:$0xff] %v5967_v11  ;;  %v8857_v1 = vld [vmem:[#allocation129_spill] sm:$0xff]  ;;  %v5976_v0 = vmul.f32 0.08216859, %v8859_v54 }
 0x271   :  { %v1029_v62 = vsel %vm8285_vm5, %v8853_v10, %v8836_v52  ;;  %v1152_v6 = vadd.f32 %v8855_v53, %v1116_v16  ;;  %v1030_v18 = vsel %vm8285_vm5, %v8857_v1, %v8832_v41  ;;  %v8858_v44 = vld [vmem:[#allocation110_spill] sm:$0xff]  ;;  %2509 = vrot.lane.b32.xlu1 %v8860_v27, %s3721_s9  ;;  %v1012_v52 = vadd.f32 %v8851_v30, %v960_v49  ;;  %v8862_v16 = vld [vmem:[#allocation131_spill] sm:$0xff]  ;;  %v8864_v11 = vld [vmem:[#allocation160_spill] sm:$0xff] }
 0x272   :  { %v5973_v31 = vmul.f32 0.08216859, %v8858_v44  ;;  %v8861_v47 = vld [vmem:[#allocation130_spill] sm:$0xff]  ;;  %v8865_v41 = vld [vmem:[#allocation235_spill] sm:$0xff]  ;;  %v1011_v44 = vadd.f32 %v996_v55, %v959_v25  ;;  %v1041_v54 = vadd.f32 %v1029_v62, %v1005_v22  ;;  %v8867_v49 = vld [vmem:[#allocation137_spill] sm:$0xff]  ;;  %v5996_v38 = vpop.permute.xlu1 %2223  ;;  %v6003_v62 = vpop.permute.xlu0 %2221 }
 0x273   :  { %v1031_v10 = vsel %vm8285_vm5, %v8862_v16, %v8861_v47  ;;  %v8863_v57 = vld [vmem:[#allocation150_spill] sm:$0xff]  ;;  %v5986_v14 = vadd.f32 %v8864_v11, %v1152_v6  ;;  %2483 = vrot.lane.b32.xlu0 %v8865_v41, %s3720_s8  ;;  %v8866_v1 = vld [vmem:[#allocation135_spill] sm:$0xff]  ;;  %v1066_v30 = vsel %vm368_vm6, %v8867_v49, %v8837_v13  ;;  %8868 = vst [vmem:[#allocation228_spill] sm:$0xff] %v5996_v38  ;;  %v8869_v6 = vld [vmem:[#allocation132_spill] sm:$0xff] }
 0x274   :  { %v1150_v33 = vadd.f32 %v8863_v57, %v1114_v35  ;;  %v1065_v27 = vsel %vm368_vm6, %v8866_v1, %v8845_v43  ;;  %v1043_v16 = vadd.f32 %v1030_v18, %v1007_v23  ;;  %v1046_v35 = vadd.f32 %v8861_v47, %v1010_v37  ;;  %v8871_v41 = vld [vmem:[#allocation158_spill] sm:$0xff]  ;;  %8872 = vst [vmem:[#allocation28_spill] sm:$0xff] %v6003_v62  ;;  %v8873_v43 = vld [vmem:[#allocation143_spill] sm:$0xff]  ;;  %v8874_v13 = vld [vmem:[#allocation145_spill] sm:$0xff] }
 0x275   :  { %v1032_v29 = vsel %vm8285_vm5, %v8870_v15, %v8869_v6  ;;  %v1045_v22 = vadd.f32 %v1031_v10, %v1009_v39  ;;  %v1101_v55 = vsel %vm405_vm7, %v8873_v43, %v8854_v63  ;;  %v1102_v1 = vsel %vm405_vm7, %v8874_v13, %v8846_v45  ;;  %v8875_v18 = vld [vmem:[#allocation217_spill] sm:$0xff]  ;;  %v8877_v10 = vld [vmem:[#allocation212_spill] sm:$0xff]  ;;  %v8879_v45 = vld [vmem:[#allocation139_spill] sm:$0xff] }
 0x276   :  { %v1186_v25 = vadd.f32 %v8871_v41, %v1150_v33  ;;  %2513 = vrot.lane.b32.xlu1 %v8875_v18, %s3721_s9  ;;  %v6014_v23 = vmul.f32 0.09264482, %v5608_v4  ;;  %v1048_v15 = vadd.f32 %v8869_v6, %v1012_v52  ;;  %v1077_v37 = vadd.f32 %v1065_v27, %v1041_v54  ;;  %v8878_v33 = vld [vmem:[#allocation138_spill] sm:$0xff]  ;;  %v8880_v13 = vld [vmem:[#allocation153_spill] sm:$0xff]  ;;  %v6029_v52 = vpop.permute.xlu1 %2263  ;;  %v8883_v54 = vld [vmem:[#allocation140_spill] sm:$0xff] }
 0x277   :  { %v1079_v47 = vadd.f32 %v1066_v30, %v1043_v16  ;;  %v6018_v39 = vmul.f32 0.08638146, %v5986_v14  ;;  %2511 = vrot.lane.b32.xlu0 %v8877_v10, %s3721_s9  ;;  %v1047_v63 = vadd.f32 %v1032_v29, %v1011_v44  ;;  %v1082_v49 = vadd.f32 %v8878_v33, %v1046_v35  ;;  %8882 = vst [vmem:[#allocation87_spill] sm:$0xff] %v6029_v52  ;;  %v8884_v27 = vld [vmem:[#allocation141_spill] sm:$0xff]  ;;  %v6034_v29 = vpop.permute.xlu0 %2261  ;;  %v8886_v44 = vld [vmem:[#allocation146_spill] sm:$0xff]  ;;  %v8887_v62 = vld [vmem:[#allocation151_spill] sm:$0xff] }
 0x278   :  { %8876 = vst [vmem:[#allocation86_spill] sm:$0xff] %v6014_v23  ;;  %v1067_v43 = vsel %vm368_vm6, %v8879_v45, %v8878_v33  ;;  %vm8881_vm5 = vcmask 973824   ;;  %v1068_v30 = vsel %vm368_vm6, %v8884_v27, %v8883_v54  ;;  %v1113_v16 = vadd.f32 %v1101_v55, %v1077_v37  ;;  %8885 = vst [vmem:[#allocation88_spill] sm:$0xff] %v6034_v29  ;;  %v8889_v45 = vld [vmem:[#allocation161_spill] sm:$0xff]  ;;  %v8890_v55 = vld [vmem:[#allocation147_spill] sm:$0xff] }
 0x279   :  { %v1138_v18 = vsel %vm8881_vm5, %v8880_v13, %v8855_v53  ;;  %v1115_v6 = vadd.f32 %v1102_v1, %v1079_v47  ;;  %v1198_v10 = vmul.f32 0.08638146, %v1186_v25  ;;  %v1118_v35 = vadd.f32 %v8886_v44, %v1082_v49  ;;  %vm8888_vm4 = vmmov %vm8881_vm5  ;;  %v8891_v49 = vld [vmem:[#allocation216_spill] sm:$0xff]  ;;  %v8893_v27 = vld [vmem:[#allocation154_spill] sm:$0xff] }
 0x27a   :  { %v1137_v33 = vsel %vm8888_vm4, %v8887_v62, %v8863_v57  ;;  %v1174_v53 = vsel %vm479_vm9, %v8889_v45, %v8864_v11  ;;  %2963 = vrot.lane.b32.xlu1 %v6014_v23, %s3715_s30  ;;  %v6046_v13 = vmul.f32 0.094516374, %v5429_v48  ;;  %v1103_v1 = vsel %vm405_vm7, %v8890_v55, %v8886_v44  ;;  %v8894_v38 = vld [vmem:[#allocation159_spill] sm:$0xff]  ;;  %v6062_v52 = vpop.permute.xlu1 %2267  ;;  %vm8940_vm5 = vmmov %vm8888_vm4 }
 0x27b   :  { %v1151_v37 = vadd.f32 %v1138_v18, %v1115_v6  ;;  %v8289_v47 = vrot.slane %v6018_v39, 1  ;;  %2515 = vrot.lane.b32.xlu0 %v8891_v49, %s3721_s9  ;;  %v6055_v57 = vmul.f32 0.09264482, %v5654_v7  ;;  %v1081_v11 = vadd.f32 %v1067_v43, %v1045_v22  ;;  %8895 = vst [vmem:[#allocation90_spill] sm:$0xff] %v6062_v52  ;;  %v6069_v49 = vpop.permute.xlu0 %2265 }
 0x27c   :  { %v1084_v62 = vadd.f32 %v8883_v54, %v1048_v15  ;;  %v1154_v45 = vadd.f32 %v8893_v27, %v1118_v35  ;;  %v1173_v29 = vsel %vm479_vm9, %v8894_v38, %v8871_v41  ;;  %v1149_v18 = vadd.f32 %v1137_v33, %v1113_v16  ;;  %8896 = vst [vmem:[#allocation91_spill] sm:$0xff] %v6069_v49  ;;  %v8897_v15 = vld [vmem:[#allocation162_spill] sm:$0xff]  ;;  %v8899_v33 = vld [vmem:[#allocation149_spill] sm:$0xff] }
 0x27d   :  { %8892 = vst [vmem:[#allocation89_spill] sm:$0xff] %v6055_v57  ;;  %v1212_v6 = vrot.slane %v1198_v10, 1  ;;  %v6065_v44 = vmul.f32 0.08990675, %v5986_v14  ;;  %v6067_v55 = vadd.f32 %v1174_v53, %v1151_v37  ;;  %v1083_v22 = vadd.f32 %v1068_v30, %v1047_v63  ;;  %v8898_v30 = vld [vmem:[#allocation148_spill] sm:$0xff] }
 0x27e   :  { %v1117_v43 = vadd.f32 %v1103_v1, %v1081_v11  ;;  %v6072_v54 = vadd.f32 %v8897_v15, %v1154_v45  ;;  %3007 = vrot.lane.b32.xlu1 %v6046_v13, %s3716_s4  ;;  %v6077_v38 = vmul.f32 0.094516374, %v5471_v50  ;;  %v1228_v41 = vmul.f32 0.08990675, %v1186_v25  ;;  %v8901_v11 = vld [vmem:[#allocation155_spill] sm:$0xff] }
 0x27f   :  { %v6079_v16 = vadd.f32 %v1173_v29, %v1149_v18  ;;  %v1214_v10 = vsel %vm516_vm10, %v1212_v6, %v8289_v47  ;;  %2965 = vrot.lane.b32.xlu0 %v6055_v57, %s3715_s30  ;;  %v6087_v63 = vmul.f32 0.094516374, %v5480_v24  ;;  %v1120_v35 = vadd.f32 %v8898_v30, %v1084_v62  ;;  %v6093_v29 = vpop.permute.xlu1 %2271  ;;  %v6105_v62 = vpop.permute.xlu0 %2269 }
 0x280   :  { %v1104_v53 = vsel %vm405_vm7, %v8899_v33, %v8898_v30  ;;  %v1194_v1 = vmul.f32 0.08216859, %v1186_v25  ;;  %v1258_v37 = vmul.f32 0.09264482, %v1186_v25  ;;  %8900 = vst [vmem:[#allocation92_spill] sm:$0xff] %v6093_v29  ;;  %v1139_v45 = vsel %vm8888_vm4, %v8901_v11, %v8893_v27  ;;  %8902 = vst [vmem:[#allocation93_spill] sm:$0xff] %v6105_v62 }
 0x281   :  { %v6100_v6 = vmul.f32 0.09264482, %v5986_v14  ;;  %v6103_v47 = vmul.f32 0.08638146, %v6067_v55  ;;  %v6107_v49 = vmul.f32 0.094516374, %v1186_v25  ;;  %v6118_v27 = vadd.f32 %v5804_v19, %v5817_v40 }
 0x282   :  { %v6109_v30 = vmul.f32 0.09546628, %v1186_v25  ;;  %v1224_v33 = vadd.f32 %v1214_v10, %v1194_v1  ;;  %v6112_v29 = vmul.f32 0.08638146, %v6072_v54  ;;  %3011 = vrot.lane.b32.xlu1 %v6077_v38, %s3716_s4  ;;  %v1242_v11 = vrot.slane %v1228_v41, 2  ;;  %v8904_v62 = vld [vmem:[#allocation156_spill] sm:$0xff] }
 0x283   :  { %8903 = vst [vmem:[#allocation231_spill] sm:$0xff] %v6118_v27  ;;  %v1197_v18 = vmul.f32 0.08638146, %v6079_v16  ;;  %3009 = vrot.lane.b32.xlu0 %v6087_v63, %s3716_s4  ;;  %v6124_v25 = vmul.f32 0.094516374, %v5516_v61  ;;  %v6126_v10 = vadd.f32 %v1104_v53, %v1083_v22  ;;  %v1153_v1 = vadd.f32 %v1139_v45, %v1117_v43  ;;  %v6134_v40 = vpop.permute.xlu1 %2275  ;;  %v6144_v43 = vpop.permute.xlu0 %2273 }
 0x284   :  { %v6129_v52 = vadd.f32 %v8904_v62, %v1120_v35  ;;  %v1175_v19 = vsel %vm479_vm9, %v8905_v42, %v8897_v15  ;;  %8906 = vst [vmem:[#allocation94_spill] sm:$0xff] %v6134_v40  ;;  %v8907_v41 = vrot.slane %v6065_v44, 2  ;;  %v6141_v36 = vmul.f32 0.094516374, %v5986_v14  ;;  %8908 = vst [vmem:[#allocation95_spill] sm:$0xff] %v6144_v43  ;;  %v8909_v15 = vld [vmem:[#allocation221_spill] sm:$0xff] }
 0x285   :  { %v1272_v35 = vrot.slane %v1258_v37, 3  ;;  %v1193_v53 = vmul.f32 0.08216859, %v6079_v16  ;;  %v1217_v42 = vrot.slane %v6112_v29, 1  ;;  %v1209_v12 = vrot.slane %v1197_v18, 1 }
 0x286   :  { %v1244_v27 = vsel %vm547_vm11, %v1242_v11, %v8907_v41  ;;  %2517 = vrot.lane.b32.xlu1 %v8909_v15, %s3721_s9  ;;  %v1302_v11 = vrot.slane %v6107_v49, 4  ;;  %v1332_v41 = vrot.slane %v6109_v30, 5  ;;  %v6153_v40 = vmul.f32 0.08990675, %v6067_v55 }
 0x287   :  { %v1254_v45 = vadd.f32 %v1244_v27, %v1224_v33  ;;  %3013 = vrot.lane.b32.xlu0 %v6124_v25, %s3716_s4  ;;  %v1227_v33 = vmul.f32 0.08990675, %v6079_v16  ;;  %v6160_v27 = vmul.f32 0.08990675, %v6072_v54  ;;  %v6162_v22 = vadd.f32 %v1175_v19, %v1153_v1  ;;  %v6164_v15 = vpop.permute.xlu1 %2315  ;;  %v6176_v17 = vpop.permute.xlu0 %2313 }
 0x288   :  { %8910 = vst [vmem:[#allocation96_spill] sm:$0xff] %v6164_v15  ;;  %v8911_v43 = vrot.slane %v6100_v6, 3  ;;  %v6171_v32 = vmul.f32 0.09546628, %v5986_v14  ;;  %v8912_v37 = vrot.slane %v6103_v47, 1  ;;  %8913 = vst [vmem:[#allocation97_spill] sm:$0xff] %v6176_v17 }
 0x289   :  { %v1257_v1 = vmul.f32 0.09264482, %v6079_v16  ;;  %v6180_v19 = vmul.f32 0.094516374, %v6079_v16  ;;  %v8914_v23 = vrot.slane %v6018_v39, 1  ;;  %v8916_v17 = vld [vmem:[#allocation220_spill] sm:$0xff] }
 0x28a   :  { %v1274_v18 = vsel %vm578_vm12, %v1272_v35, %v8911_v43  ;;  %v1211_v5 = vsel %vm516_vm10, %v1209_v12, %v8912_v37  ;;  %v8915_v35 = vld [vmem:[#allocation192_spill] sm:$0xff]  ;;  %v1196_v57 = vmul.f32 0.08216859, %v5986_v14  ;;  %v6191_v37 = vmul.f32 0.09264482, %v6067_v55 }
 0x28b   :  { %v1284_v15 = vadd.f32 %v1274_v18, %v1254_v45  ;;  %v1218_v43 = vsel %vm516_vm10, %v8914_v23, %v1217_v42  ;;  %2545 = vrot.lane.b32.xlu1 %v8915_v35, %s3722_s10  ;;  %2519 = vrot.lane.b32.xlu0 %v8916_v17, %s3721_s9  ;;  %v1223_v45 = vadd.f32 %v1211_v5, %v1193_v53  ;;  %v1247_v18 = vrot.slane %v6160_v27, 2  ;;  %v6202_v35 = vpop.permute.xlu1 %2319  ;;  %v6208_v17 = vpop.permute.xlu0 %2317 }
 0x28c   :  { %v6197_v23 = vmul.f32 0.08638146, %v6162_v22  ;;  %v6200_v42 = vmul.f32 0.09264482, %v6072_v54  ;;  %8918 = vst [vmem:[#allocation101_spill] sm:$0xff] %v6202_v35  ;;  %v1239_v14 = vrot.slane %v1227_v33, 2  ;;  %v1226_v2 = vadd.f32 %v1218_v43, %v1196_v57 }
 0x28d   :  { %v8919_v3 = vrot.slane %v6141_v36, 4  ;;  %v8307_v51 = vrot.slane %v6171_v32, 5  ;;  %8920 = vst [vmem:[#allocation104_spill] sm:$0xff] %v6208_v17  ;;  %v1269_v5 = vrot.slane %v1257_v1, 3  ;;  %v6211_v53 = vmul.f32 0.09546628, %v6079_v16 }
 0x28e   :  { %8917 = vst [vmem:[#allocation100_spill] sm:$0xff] %v6197_v23  ;;  %v6216_v35 = vmul.f32 0.094516374, %v5608_v4  ;;  %v8923_v33 = vrot.slane %v6153_v40, 2  ;;  %v6223_v57 = vmul.f32 0.094516374, %v6067_v55 }
 0x28f   :  { %v1304_v12 = vsel %vm609_vm13, %v1302_v11, %v8919_v3  ;;  %2549 = vrot.lane.b32.xlu1 %v8921_v28, %s3722_s10  ;;  %v6226_v1 = vmul.f32 0.094516374, %v6072_v54  ;;  %v8924_v16 = vld [vmem:[#allocation190_spill] sm:$0xff]  ;;  %v8925_v28 = vrot.slane %v6065_v44, 2  ;;  %v1299_v11 = vrot.slane %v6180_v19, 4 }
 0x290   :  { %v1314_v26 = vadd.f32 %v1304_v12, %v1284_v15  ;;  %8922 = vst [vmem:[#allocation105_spill] sm:$0xff] %v6216_v35  ;;  %v1241_v3 = vsel %vm547_vm11, %v1239_v14, %v8923_v33  ;;  %2547 = vrot.lane.b32.xlu0 %v8924_v16, %s3722_s10  ;;  %v1215_v12 = vrot.slane %v6197_v23, 1  ;;  %v1277_v14 = vrot.slane %v6200_v42, 3  ;;  %v6235_v33 = vpop.permute.xlu1 %2323  ;;  %v8930_v16 = vld [vmem:[#allocation196_spill] sm:$0xff] }
 0x291   :  { %v1253_v15 = vadd.f32 %v1241_v3, %v1223_v45  ;;  %v1248_v43 = vsel %vm547_vm11, %v8925_v28, %v1247_v18  ;;  %8926 = vst [vmem:[#allocation108_spill] sm:$0xff] %v6235_v33  ;;  %v1334_v17 = vsel %vm640_vm14, %v1332_v41, %v8307_v51  ;;  %v6242_v45 = vpop.permute.xlu0 %2321  ;;  %v6245_v3 = vmul.f32 0.09546628, %v6067_v55 }
 0x292   :  { %v1256_v56 = vadd.f32 %v1248_v43, %v1226_v2  ;;  %8927 = vst [vmem:[#allocation109_spill] sm:$0xff] %v6242_v45  ;;  %v6248_v18 = vmul.f32 0.08990675, %v6162_v22  ;;  %v1344_v28 = vadd.f32 %v1334_v17, %v1314_v26  ;;  %v6253_v33 = vmul.f32 0.09546628, %v5429_v48 }
 0x293   :  { %3015 = vrot.lane.b32.xlu1 %v6216_v35, %s3716_s4  ;;  %v8929_v41 = vrot.slane %v6191_v37, 3  ;;  %v1307_v51 = vrot.slane %v6226_v1, 4  ;;  %v6263_v45 = vmul.f32 0.094516374, %v5654_v7  ;;  %v1322_v17 = vmul.f32 0.09546628, %v6072_v54 }
 0x294   :  { %8928 = vst [vmem:[#allocation112_spill] sm:$0xff] %v6248_v18  ;;  %2551 = vrot.lane.b32.xlu0 %v8930_v16, %s3722_s10  ;;  %v8931_v59 = vrot.slane %v6103_v47, 1  ;;  %v8932_v46 = vrot.slane %v6100_v6, 3  ;;  %v1195_v43 = vmul.f32 0.08216859, %v6067_v55  ;;  %v8934_v16 = vrot.slane %v6171_v32, 6 }
 0x295   :  { %v1271_v2 = vsel %vm578_vm12, %v1269_v5, %v8929_v41  ;;  %v6272_v41 = vpop.permute.xlu1 %2365  ;;  %v8935_v35 = vrot.slane %v6109_v30, 6  ;;  %v8938_v55 = vrot.slane %v6223_v57, 4  ;;  %v1337_v54 = vrot.slane %v1322_v17, 5 }
 0x296   :  { %v1283_v26 = vadd.f32 %v1271_v2, %v1253_v15  ;;  %v1216_v48 = vsel %vm516_vm10, %v8931_v59, %v1215_v12  ;;  %v1278_v5 = vsel %vm578_vm12, %v8932_v46, %v1277_v14  ;;  %8933 = vst [vmem:[#allocation113_spill] sm:$0xff] %v6272_v41  ;;  %v6281_v2 = vpop.permute.xlu0 %2325  ;;  %v1245_v59 = vrot.slane %v6248_v18, 2 }
 0x297   :  { %v1286_v8 = vadd.f32 %v1278_v5, %v1256_v56  ;;  %v1352_v15 = vsel %vm659_vm15, %v8935_v35, %v8934_v16  ;;  %8936 = vst [vmem:[#allocation114_spill] sm:$0xff] %v6281_v2  ;;  %v6285_v46 = vmul.f32 0.09264482, %v6162_v22  ;;  %3059 = vrot.lane.b32.xlu1 %v6253_v33, %s3717_s5  ;;  %v6290_v56 = vmul.f32 0.09546628, %v5471_v50  ;;  %v8939_v5 = vld [vmem:[#allocation157_spill] sm:$0xff] }
 0x298   :  { %v1362_v12 = vadd.f32 %v1352_v15, %v1344_v28  ;;  %v1301_v30 = vsel %vm609_vm13, %v1299_v11, %v8938_v55  ;;  %v1225_v14 = vadd.f32 %v1216_v48, %v1195_v43  ;;  %3017 = vrot.lane.b32.xlu0 %v6263_v45, %s3716_s4  ;;  %v6299_v28 = vmul.f32 0.09546628, %v5480_v24 }
 0x299   :  { %8937 = vst [vmem:[#allocation115_spill] sm:$0xff] %v6285_v46  ;;  %v6304_v16 = vsel %vm8940_vm5, %v8939_v5, %v8904_v62  ;;  %v1313_v15 = vadd.f32 %v1301_v30, %v1283_v26  ;;  %v8941_v2 = vrot.slane %v6141_v36, 4  ;;  %v6309_v55 = vpop.permute.xlu1 %2369  ;;  %v1329_v48 = vrot.slane %v6211_v53, 5 }
 0x29a   :  { %8942 = vst [vmem:[#allocation120_spill] sm:$0xff] %v6309_v55  ;;  %v1347_v43 = vrot.slane %v6211_v53, 6  ;;  %v8943_v41 = vrot.slane %v6141_v36, 7  ;;  %v8944_v50 = vrot.slane %v6107_v49, 7  ;;  %v6318_v5 = vpop.permute.xlu0 %2367  ;;  %v8946_v26 = vrot.slane %v6153_v40, 2 }
 0x29b   :  { %v1308_v11 = vsel %vm609_vm13, %v8941_v2, %v1307_v51  ;;  %8945 = vst [vmem:[#allocation116_spill] sm:$0xff] %v6318_v5  ;;  %v6324_v51 = vmul.f32 0.094516374, %v6162_v22  ;;  %v1275_v55 = vrot.slane %v6285_v46, 3  ;;  %3063 = vrot.lane.b32.xlu1 %v6290_v56, %s3717_s5  ;;  %v1348_v53 = vrot.slane %v6245_v3, 6 }
 0x29c   :  { %v1316_v35 = vadd.f32 %v1308_v11, %v1286_v8  ;;  %v1370_v62 = vsel %vm8319_vm8, %v8944_v50, %v8943_v41  ;;  %v1246_v30 = vsel %vm547_vm11, %v8946_v26, %v1245_v59  ;;  %v8947_v8 = vrot.slane %v6245_v3, 5  ;;  %3061 = vrot.lane.b32.xlu0 %v6299_v28, %s3717_s5 }
 0x29d   :  { %v1380_v2 = vadd.f32 %v1370_v62, %v1362_v12  ;;  %v1255_v50 = vadd.f32 %v1246_v30, %v1225_v14  ;;  %v6336_v41 = vmul.f32 0.09546628, %v5516_v61  ;;  %v1355_v59 = vrot.slane %v1322_v17, 6  ;;  %v8949_v62 = vld [vmem:[#allocation164_spill] sm:$0xff]  ;;  %v6343_v5 = vpop.permute.xlu1 %2373 }
 0x29e   :  { %v1331_v49 = vsel %vm640_vm14, %v1329_v48, %v8947_v8  ;;  %v8948_v12 = vrot.slane %v6171_v32, 5  ;;  %v1192_v26 = vadd.f32 %v8949_v62, %v6129_v52  ;;  %8950 = vst [vmem:[#allocation117_spill] sm:$0xff] %v6343_v5  ;;  %v1394_v14 = vrot.slane %v6065_v44, 1  ;;  %v6348_v61 = vpop.permute.xlu0 %2371 }
 0x29f   :  { %v1343_v46 = vadd.f32 %v1331_v49, %v1313_v15  ;;  %v1321_v48 = vmul.f32 0.09546628, %v6162_v22  ;;  %v1395_v8 = vrot.slane %v6160_v27, 1  ;;  %8951 = vst [vmem:[#allocation118_spill] sm:$0xff] %v6348_v61  ;;  %v1305_v17 = vrot.slane %v6324_v51, 4  ;;  %v8953_v15 = vld [vmem:[#allocation204_spill] sm:$0xff] }
 0x2a0   :  { %v1338_v11 = vsel %vm640_vm14, %v8948_v12, %v1337_v54  ;;  %v1384_v24 = vadd.f32 %v1380_v2, %v6100_v6  ;;  %v8952_v54 = vrot.slane %v6191_v37, 3  ;;  %2553 = vrot.lane.b32.xlu1 %v8953_v15, %s3722_s10  ;;  %v6358_v44 = vmul.f32 0.09546628, %v5608_v4  ;;  %3065 = vrot.lane.b32.xlu0 %v6336_v41, %s3717_s5 }
 0x2a1   :  { %v1346_v30 = vadd.f32 %v1338_v11, %v1316_v35  ;;  %v1373_v22 = vrot.slane %v6226_v1, 7  ;;  %v1349_v27 = vsel %vm659_vm15, %v1347_v43, %v1348_v53  ;;  %v1366_v49 = vrot.slane %v6223_v57, 7 }
 0x2a2   :  { %v1276_v52 = vsel %vm578_vm12, %v8952_v54, %v1275_v55  ;;  %v8954_v6 = vrot.slane %v6171_v32, 6  ;;  %v1388_v2 = vmul.f32 0.08990675, %v1192_v26  ;;  %v1410_v12 = vmul.f32 0.08638146, %v1192_v26  ;;  %v6368_v54 = vpop.permute.xlu1 %2401 }
 0x2a3   :  { %v1285_v35 = vadd.f32 %v1276_v52, %v1255_v50  ;;  %v1361_v11 = vadd.f32 %v1349_v27, %v1343_v46  ;;  %8955 = vst [vmem:[#allocation119_spill] sm:$0xff] %v6368_v54  ;;  %v1365_v15 = vrot.slane %v6180_v19, 7  ;;  %v1396_v50 = vsel %vm516_vm10, %v1394_v14, %v1395_v8  ;;  %v6373_v52 = vpop.permute.xlu0 %2375  ;;  %v8957_v14 = vld [vmem:[#allocation202_spill] sm:$0xff] }
 0x2a4   :  { %v1356_v55 = vsel %vm659_vm15, %v8954_v6, %v1355_v59  ;;  %v1417_v43 = vrot.slane %v6112_v29, 2  ;;  %v1416_v61 = vrot.slane %v6018_v39, 2  ;;  %v1335_v5 = vrot.slane %v1321_v48, 5  ;;  %3067 = vrot.lane.b32.xlu1 %v6358_v44, %s3717_s5  ;;  %2555 = vrot.lane.b32.xlu0 %v8957_v14, %s3722_s10 }
 0x2a5   :  { %v1364_v1 = vadd.f32 %v1356_v55, %v1346_v30  ;;  %v1406_v32 = vadd.f32 %v1396_v50, %v1384_v24  ;;  %v8956_v59 = vrot.slane %v6223_v57, 4  ;;  %v1353_v46 = vrot.slane %v1321_v48, 6 }
 0x2a6   :  { %v1367_v30 = vsel %vm8319_vm8, %v1365_v15, %v1366_v49  ;;  %v6385_v29 = vmul.f32 0.09546628, %v5654_v7  ;;  %v8958_v39 = vrot.slane %v6141_v36, 7  ;;  %v1399_v57 = vrot.slane %v1388_v2, 1  ;;  %v6390_v6 = vpop.permute.xlu1 %2405 }
 0x2a7   :  { %v1306_v26 = vsel %vm609_vm13, %v8956_v59, %v1305_v17  ;;  %v1421_v27 = vrot.slane %v1410_v12, 2  ;;  %v1379_v17 = vadd.f32 %v1367_v30, %v1361_v11  ;;  %8959 = vst [vmem:[#allocation128_spill] sm:$0xff] %v6390_v6  ;;  %v1155_v48 = vadd.f32 %v6304_v16, %v6126_v10  ;;  %v6396_v50 = vpop.permute.xlu0 %2403  ;;  %v8974_v30 = vld [vmem:[#allocation170_spill] sm:$0xff] }
 0x2a8   :  { %v1315_v19 = vadd.f32 %v1306_v26, %v1285_v35  ;;  %v1374_v24 = vsel %vm8319_vm8, %v8958_v39, %v1373_v22  ;;  %v1371_v35 = vrot.slane %v6324_v51, 7  ;;  %v1418_v15 = vsel %vm547_vm11, %v1416_v61, %v1417_v43  ;;  %8960 = vst [vmem:[#allocation121_spill] sm:$0xff] %v6396_v50  ;;  %3095 = vrot.lane.b32.xlu1 %v6253_v33, %s3718_s6  ;;  %v8965_v33 = vld [vmem:[#allocation165_spill] sm:$0xff] }
 0x2a9   :  { %v1382_v55 = vadd.f32 %v1374_v24, %v1364_v1  ;;  %v1391_v59 = vrot.slane %v6153_v40, 1  ;;  %v6399_v36 = vadd.f32 %v1418_v15, %v1406_v32  ;;  %v8962_v22 = vrot.slane %v6245_v3, 5  ;;  %3069 = vrot.lane.b32.xlu0 %v6385_v29, %s3717_s5 }
 0x2aa   :  { %v8321_v12 = vrot.slane %v6248_v18, 1  ;;  %v1413_v10 = vrot.slane %v6103_v47, 2  ;;  %v1354_v61 = vsel %vm659_vm15, %v1348_v53, %v1353_v46  ;;  %v8320_v51 = vrot.slane %v6197_v23, 2  ;;  %v6422_v11 = vpop.permute.xlu1 %2851  ;;  %v8972_v46 = vld [vmem:[#allocation168_spill] sm:$0xff] }
 0x2ab   :  { %8961 = vst [vmem:[#allocation126_spill] sm:$0xff] %v6399_v36  ;;  %v1336_v2 = vsel %vm640_vm14, %v8962_v22, %v1335_v5  ;;  %v6413_v40 = vsel %vm516_vm10, %v1395_v8, %v1399_v57  ;;  %v6416_v3 = vsel %vm547_vm11, %v1417_v43, %v1421_v27  ;;  %v1383_v5 = vadd.f32 %v1379_v17, %v6191_v37  ;;  %v8968_v8 = vld [vmem:[#allocation166_spill] sm:$0xff]  ;;  %v8969_v43 = vld [vmem:[#allocation167_spill] sm:$0xff]  ;;  %v6435_v37 = vpop.permute.xlu0 %2407  ;;  %v8979_v27 = vld [vmem:[#allocation172_spill] sm:$0xff] }
 0x2ac   :  { %v1345_v16 = vadd.f32 %v1336_v2, %v1315_v19  ;;  %8963 = vst [vmem:[#allocation136_spill] sm:$0xff] %v6413_v40  ;;  %8964 = vst [vmem:[#allocation98_spill] sm:$0xff] %v6416_v3  ;;  %v1176_v47 = vsel %vm479_vm9, %v8965_v33, %v8949_v62  ;;  %v6425_v53 = vadd.f32 %v1382_v55, %v6200_v42  ;;  %3099 = vrot.lane.b32.xlu1 %v6290_v56, %s3718_s6  ;;  %v8980_v17 = vld [vmem:[#allocation173_spill] sm:$0xff]  ;;  %v8983_v22 = vld [vmem:[#allocation175_spill] sm:$0xff]  ;;  %vm9011_vm4 = vcmask 1006592  }
 0x2ad   :  { %v6428_v1 = vsel %vm8319_vm8, %v1366_v49, %v1371_v35  ;;  %v1492_v32 = vadd.f32 %v8968_v8, %v5928_v34  ;;  %v1479_v26 = vsel %vm82_vm0, %v8969_v43, %v8968_v8  ;;  %8970 = vst [vmem:[#allocation236_spill] sm:$0xff] %v6435_v37  ;;  %v6439_v62 = vmul.f32 %v6399_v36, %v6399_v36  ;;  %v8973_v49 = vld [vmem:[#allocation169_spill] sm:$0xff]  ;;  %v8975_v34 = vld [vmem:[#allocation171_spill] sm:$0xff]  ;;  %v8986_v43 = vld [vmem:[#allocation178_spill] sm:$0xff] }
 0x2ae   :  { %8966 = vst [vmem:[#allocation99_spill] sm:$0xff] %v6425_v53  ;;  %8967 = vst [vmem:[#allocation102_spill] sm:$0xff] %v6428_v1  ;;  %v1393_v42 = vsel %vm516_vm10, %v1391_v59, %v8321_v12  ;;  %v1480_v19 = vsel %vm82_vm0, %v8973_v49, %v8972_v46  ;;  %v1481_v14 = vsel %vm82_vm0, %v8975_v34, %v8974_v30  ;;  %3097 = vrot.lane.b32.xlu0 %v6299_v28, %s3718_s6  ;;  %v8982_v59 = vld [vmem:[#allocation174_spill] sm:$0xff]  ;;  %v8989_v49 = vld [vmem:[#allocation181_spill] sm:$0xff]  ;;  %vm9029_vm8 = vcmask 998400  }
 0x2af   :  { %8971 = vst [vmem:[#allocation122_spill] sm:$0xff] %v6439_v62  ;;  %v6452_v39 = vadd.f32 %v1354_v61, %v1345_v16  ;;  %v6457_v24 = vsel %vm547_vm11, %v1413_v10, %v8320_v51  ;;  %v6459_v57 = vadd.f32 %v1176_v47, %v1155_v48  ;;  %v1482_v35 = vsel %vm82_vm0, %v8980_v17, %v8979_v27  ;;  %v6474_v48 = vpop.permute.xlu1 %2855  ;;  %v8984_v61 = vld [vmem:[#allocation176_spill] sm:$0xff]  ;;  %v6483_v33 = vpop.permute.xlu0 %2853  ;;  %vm9015_vm5 = vmmov %vm9011_vm4  ;;  %v9038_v51 = vld [vmem:[#allocation10_spill] sm:$0xff] }
 0x2b0   :  { %8977 = vst [vmem:[#allocation134_spill] sm:$0xff] %v6457_v24  ;;  %v6466_v55 = vadd.f32 %v1393_v42, %v1383_v5  ;;  %v1491_v56 = vadd.f32 %v1479_v26, %v5933_v20  ;;  %v1494_v15 = vadd.f32 %v8972_v46, %v5936_v60  ;;  %v1531_v2 = vsel %vm135_vm1, %v8983_v22, %v8982_v59  ;;  %v8985_v5 = vld [vmem:[#allocation177_spill] sm:$0xff]  ;;  %v8988_v46 = vld [vmem:[#allocation180_spill] sm:$0xff]  ;;  %v8997_v22 = vld [vmem:[#allocation194_spill] sm:$0xff] }
 0x2b1   :  { %8976 = vst [vmem:[#allocation123_spill] sm:$0xff] %v6452_v39  ;;  %8978 = vst [vmem:[#allocation144_spill] sm:$0xff] %v6459_v57  ;;  %v1493_v10 = vadd.f32 %v1480_v19, %v5946_v58  ;;  %v1496_v16 = vadd.f32 %v8974_v30, %v5952_v21  ;;  %v1495_v28 = vadd.f32 %v1481_v14, %v5955_v9  ;;  %v8987_v58 = vld [vmem:[#allocation179_spill] sm:$0xff]  ;;  %3103 = vrot.lane.b32.xlu1 %v6358_v44, %s3718_s6  ;;  %v8990_v19 = vld [vmem:[#allocation182_spill] sm:$0xff] }
 0x2b2   :  { %8981 = vst [vmem:[#allocation103_spill] sm:$0xff] %v6466_v55  ;;  %v1532_v20 = vsel %vm135_vm1, %v8985_v5, %v8984_v61  ;;  %v1498_v60 = vadd.f32 %v8979_v27, %v5973_v31  ;;  %v1497_v47 = vadd.f32 %v1482_v35, %v5976_v0  ;;  %v1544_v8 = vadd.f32 %v8982_v59, %v1492_v32  ;;  %v8991_v30 = vld [vmem:[#allocation183_spill] sm:$0xff]  ;;  %v8992_v44 = vld [vmem:[#allocation184_spill] sm:$0xff]  ;;  %v8993_v14 = vld [vmem:[#allocation185_spill] sm:$0xff] }
 0x2b3   :  { %v1533_v26 = vsel %vm135_vm1, %v8987_v58, %v8986_v43  ;;  %v1543_v21 = vadd.f32 %v1531_v2, %v1491_v56  ;;  %v1546_v9 = vadd.f32 %v8984_v61, %v1494_v15  ;;  %v1548_v42 = vadd.f32 %v8986_v43, %v1496_v16  ;;  %3101 = vrot.lane.b32.xlu0 %v6336_v41, %s3718_s6  ;;  %v6508_v17 = vpop.permute.xlu1 %2409  ;;  %v8995_v15 = vld [vmem:[#allocation188_spill] sm:$0xff]  ;;  %v8996_v59 = vld [vmem:[#allocation189_spill] sm:$0xff]  ;;  %v8998_v2 = vld [vmem:[#allocation195_spill] sm:$0xff]  ;;  %v6517_v16 = vpop.permute.xlu0 %2857 }
 0x2b4   :  { %v1534_v31 = vsel %vm135_vm1, %v8989_v49, %v8988_v46  ;;  %v1545_v0 = vadd.f32 %v1532_v20, %v1493_v10  ;;  %v1550_v32 = vadd.f32 %v8988_v46, %v1498_v60  ;;  %v1583_v34 = vsel %vm188_vm2, %v8991_v30, %v8990_v19  ;;  %8994 = vst [vmem:[#allocation106_spill] sm:$0xff] %v6508_v17  ;;  %v8999_v20 = vld [vmem:[#allocation200_spill] sm:$0xff]  ;;  %v9000_v60 = vld [vmem:[#allocation201_spill] sm:$0xff]  ;;  %v9002_v58 = vld [vmem:[#allocation207_spill] sm:$0xff] }
 0x2b5   :  { %v1584_v27 = vsel %vm188_vm2, %v8993_v14, %v8992_v44  ;;  %v1547_v35 = vadd.f32 %v1533_v26, %v1495_v28  ;;  %v1596_v56 = vadd.f32 %v8990_v19, %v1544_v8  ;;  %v1585_v41 = vsel %vm188_vm2, %v8996_v59, %v8995_v15  ;;  %v9001_v28 = vld [vmem:[#allocation206_spill] sm:$0xff]  ;;  %3131 = vrot.lane.b32.xlu1 %v6046_v13, %s3719_s7  ;;  %v9004_v30 = vld [vmem:[#allocation211_spill] sm:$0xff]  ;;  %v9041_v18 = vld [vmem:[#allocation12_spill] sm:$0xff] }
 0x2b6   :  { %v1586_v10 = vsel %vm188_vm2, %v8998_v2, %v8997_v22  ;;  %v1549_v61 = vadd.f32 %v1534_v31, %v1497_v47  ;;  %v1598_v5 = vadd.f32 %v8992_v44, %v1546_v9  ;;  %v1635_v43 = vsel %vm241_vm3, %v9000_v60, %v8999_v20  ;;  %v9003_v19 = vld [vmem:[#allocation210_spill] sm:$0xff]  ;;  %v9039_v12 = vld [vmem:[#allocation11_spill] sm:$0xff]  ;;  %v9042_v3 = vld [vmem:[#allocation13_spill] sm:$0xff] }
 0x2b7   :  { %v1636_v8 = vsel %vm241_vm3, %v9002_v58, %v9001_v28  ;;  %v1595_v26 = vadd.f32 %v1583_v34, %v1543_v21  ;;  %v1597_v46 = vadd.f32 %v1584_v27, %v1545_v0  ;;  %v1600_v49 = vadd.f32 %v8995_v15, %v1548_v42  ;;  %3105 = vrot.lane.b32.xlu0 %v6385_v29, %s3718_s6  ;;  %v6536_v59 = vpop.permute.xlu1 %2437  ;;  %v9006_v42 = vld [vmem:[#allocation214_spill] sm:$0xff]  ;;  %v9007_v34 = vld [vmem:[#allocation215_spill] sm:$0xff]  ;;  %v6542_v15 = vpop.permute.xlu0 %2411  ;;  %v9063_v53 = vld [vmem:[#allocation77_spill] sm:$0xff] }
 0x2b8   :  { %v1637_v47 = vsel %vm241_vm3, %v9004_v30, %v9003_v19  ;;  %v1599_v9 = vadd.f32 %v1585_v41, %v1547_v35  ;;  %v1602_v31 = vadd.f32 %v8997_v22, %v1550_v32  ;;  %v1601_v44 = vadd.f32 %v1586_v10, %v1549_v61  ;;  %9005 = vst [vmem:[#allocation107_spill] sm:$0xff] %v6536_v59  ;;  %v9009_v41 = vld [vmem:[#allocation218_spill] sm:$0xff]  ;;  %v9010_v32 = vld [vmem:[#allocation219_spill] sm:$0xff]  ;;  %v9084_v1 = vld [vmem:[#allocation41_spill] sm:$0xff] }
 0x2b9   :  { %v1648_v14 = vadd.f32 %v8999_v20, %v1596_v56  ;;  %v1647_v13 = vadd.f32 %v1635_v43, %v1595_v26  ;;  %v1650_v21 = vadd.f32 %v9001_v28, %v1598_v5  ;;  %v1649_v0 = vadd.f32 %v1636_v8, %v1597_v46  ;;  %9008 = vst [vmem:[#allocation124_spill] sm:$0xff] %v6542_v15  ;;  %v9012_v56 = vld [vmem:[#allocation203_spill] sm:$0xff]  ;;  %v9013_v61 = vld [vmem:[#allocation222_spill] sm:$0xff] }
 0x2ba   :  { %v1638_v27 = vsel %vm241_vm3, %v9007_v34, %v9006_v42  ;;  %v1652_v29 = vadd.f32 %v9003_v19, %v1600_v49  ;;  %v1651_v35 = vadd.f32 %v1637_v47, %v1599_v9  ;;  %v1687_v22 = vsel %vm9011_vm4, %v9010_v32, %v9009_v41  ;;  %3135 = vrot.lane.b32.xlu1 %v6077_v38, %s3719_s7  ;;  %v9014_v5 = vld [vmem:[#allocation223_spill] sm:$0xff]  ;;  %v9016_v60 = vld [vmem:[#allocation186_spill] sm:$0xff]  ;;  %v9019_v49 = vld [vmem:[#allocation193_spill] sm:$0xff] }
 0x2bb   :  { %v6551_v2 = vmul.f32 0.094516374, %v9012_v56  ;;  %v1654_v10 = vadd.f32 %v9006_v42, %v1602_v31  ;;  %v1688_v20 = vsel %vm9015_vm5, %v9014_v5, %v9013_v61  ;;  %v6558_v43 = vmul.f32 0.08216859, %v9016_v60  ;;  %v9017_v28 = vld [vmem:[#allocation187_spill] sm:$0xff]  ;;  %3133 = vrot.lane.b32.xlu0 %v6087_v63, %s3719_s7  ;;  %v6572_v30 = vpop.permute.xlu1 %2441  ;;  %v9021_v31 = vld [vmem:[#allocation226_spill] sm:$0xff]  ;;  %vm9025_vm5 = vmmov %vm9011_vm4 }
 0x2bc   :  { %v6561_v58 = vmul.f32 0.08216859, %v9017_v28  ;;  %v1653_v8 = vadd.f32 %v1638_v27, %v1601_v44  ;;  %v1700_v38 = vadd.f32 %v9009_v41, %v1648_v14  ;;  %v9018_v26 = vld [vmem:[#allocation191_spill] sm:$0xff]  ;;  %v6570_v19 = vmul.f32 0.08216859, %v9019_v49  ;;  %9020 = vst [vmem:[#allocation125_spill] sm:$0xff] %v6572_v30  ;;  %v6581_v14 = vpop.permute.xlu0 %2439 }
 0x2bd   :  { %v6567_v46 = vmul.f32 0.08216859, %v9018_v26  ;;  %v1699_v47 = vadd.f32 %v1687_v22, %v1647_v13  ;;  %v1702_v9 = vadd.f32 %v9013_v61, %v1650_v21  ;;  %v9022_v42 = vld [vmem:[#allocation227_spill] sm:$0xff]  ;;  %v9023_v32 = vld [vmem:[#allocation229_spill] sm:$0xff]  ;;  %v9024_v63 = vld [vmem:[#allocation230_spill] sm:$0xff]  ;;  %9026 = vst [vmem:[#allocation127_spill] sm:$0xff] %v6581_v14  ;;  %v1701_v27 = vadd.f32 %v1688_v20, %v1649_v0 }
 0x2be   :  { %v1689_v34 = vsel %vm9011_vm4, %v9022_v42, %v9021_v31  ;;  %v1690_v44 = vsel %vm9025_vm5, %v9024_v63, %v9023_v32  ;;  %v9027_v41 = vld [vmem:[#allocation233_spill] sm:$0xff]  ;;  %v9028_v5 = vld [vmem:[#allocation234_spill] sm:$0xff]  ;;  %v9031_v13 = vld [vmem:[#allocation199_spill] sm:$0xff]  ;;  %2327 = vrot.lane.b32.xlu1 %v6551_v2, %s3716_s4  ;;  %v1704_v22 = vadd.f32 %v9021_v31, %v1652_v29  ;;  %v6599_v0 = vmul.f32 0.08216859, %v9012_v56 }
 0x2bf   :  { %v1723_v60 = vsel %vm9029_vm8, %v9028_v5, %v9027_v41  ;;  %v9030_v28 = vld [vmem:[#allocation197_spill] sm:$0xff]  ;;  %v6590_v21 = vmul.f32 0.08216859, %v9031_v13  ;;  %v9032_v61 = vld [vmem:[#allocation7_spill] sm:$0xff]  ;;  %v9033_v49 = vld [vmem:[#allocation6_spill] sm:$0xff]  ;;  %3137 = vrot.lane.b32.xlu0 %v6124_v25, %s3719_s7  ;;  %v1703_v5 = vadd.f32 %v1689_v34, %v1651_v35  ;;  %v1705_v13 = vadd.f32 %v1690_v44, %v1653_v8  ;;  %v6610_v31 = vpop.permute.xlu1 %2859 }
 0x2c0   :  { %v6587_v26 = vmul.f32 0.08216859, %v9030_v28  ;;  %vm9034_vm4 = vmmov %vm9029_vm8  ;;  %9035 = vst [vmem:[#allocation142_spill] sm:$0xff] %v6599_v0  ;;  %v9036_v20 = vld [vmem:[#allocation205_spill] sm:$0xff]  ;;  %v1706_v28 = vadd.f32 %v9023_v32, %v1654_v10  ;;  %v1735_v23 = vadd.f32 %v1723_v60, %v1699_v47  ;;  %v1738_v36 = vadd.f32 %v9032_v61, %v1702_v9  ;;  %v6617_v25 = vpop.permute.xlu0 %2443  ;;  %v9045_v8 = vld [vmem:[#allocation14_spill] sm:$0xff] }
 0x2c1   :  { %v1724_v42 = vsel %vm9034_vm4, %v9033_v49, %v9032_v61  ;;  %v6602_v63 = vmul.f32 0.08216859, %v9036_v20  ;;  %vm9040_vm8 = vmmov %vm9034_vm4  ;;  %v1736_v49 = vadd.f32 %v9027_v41, %v1700_v38  ;;  %9044 = vst [vmem:[#allocation129_spill] sm:$0xff] %v6617_v25  ;;  %v1740_v10 = vadd.f32 %v9038_v51, %v1704_v22  ;;  %v9046_v34 = vld [vmem:[#allocation15_spill] sm:$0xff]  ;;  %v9048_v44 = vld [vmem:[#allocation20_spill] sm:$0xff] }
 0x2c2   :  { %v1725_v29 = vsel %vm9040_vm8, %v9039_v12, %v9038_v51  ;;  %vm9043_vm5 = vmmov %vm9034_vm4  ;;  %v1737_v35 = vadd.f32 %v1724_v42, %v1701_v27  ;;  %v1759_v12 = vsel %vm368_vm6, %v9046_v34, %v9045_v8  ;;  %v9047_v32 = vld [vmem:[#allocation19_spill] sm:$0xff]  ;;  %3141 = vrot.lane.b32.xlu1 %v6263_v45, %s3719_s7  ;;  %v1742_v9 = vadd.f32 %v9041_v18, %v1706_v28  ;;  %v9049_v41 = vld [vmem:[#allocation22_spill] sm:$0xff] }
 0x2c3   :  { %9037 = vst [vmem:[#allocation152_spill] sm:$0xff] %v6602_v63  ;;  %v1726_v62 = vsel %vm9043_vm5, %v9042_v3, %v9041_v18  ;;  %v1760_v38 = vsel %vm368_vm6, %v9048_v44, %v9047_v32  ;;  %v1739_v47 = vadd.f32 %v1725_v29, %v1703_v5  ;;  %v1772_v3 = vadd.f32 %v9045_v8, %v1736_v49  ;;  %v9050_v27 = vld [vmem:[#allocation23_spill] sm:$0xff]  ;;  %v9051_v60 = vld [vmem:[#allocation105_spill] sm:$0xff]  ;;  %v9052_v42 = vld [vmem:[#allocation24_spill] sm:$0xff]  ;;  %v6642_v28 = vpop.permute.xlu1 %2903 }
 0x2c4   :  { %v1761_v51 = vsel %vm368_vm6, %v9050_v27, %v9049_v41  ;;  %3139 = vrot.lane.b32.xlu0 %v9051_v60, %s3719_s7  ;;  %v1741_v22 = vadd.f32 %v1726_v62, %v1705_v13  ;;  %v1774_v61 = vadd.f32 %v9047_v32, %v1738_v36  ;;  %v9053_v34 = vld [vmem:[#allocation25_spill] sm:$0xff]  ;;  %v9054_v45 = vld [vmem:[#allocation26_spill] sm:$0xff]  ;;  %v9055_v5 = vld [vmem:[#allocation27_spill] sm:$0xff]  ;;  %v1771_v29 = vadd.f32 %v1759_v12, %v1735_v23  ;;  %v6648_v13 = vpop.permute.xlu0 %2861 }
 0x2c5   :  { %v1762_v44 = vsel %vm368_vm6, %v9053_v34, %v9052_v42  ;;  %v1795_v18 = vsel %vm405_vm7, %v9055_v5, %v9054_v45  ;;  %v1773_v49 = vadd.f32 %v1760_v38, %v1737_v35  ;;  %v1808_v8 = vadd.f32 %v9054_v45, %v1772_v3  ;;  %v9056_v27 = vld [vmem:[#allocation29_spill] sm:$0xff]  ;;  %v9057_v40 = vld [vmem:[#allocation30_spill] sm:$0xff]  ;;  %v9078_v55 = vld [vmem:[#allocation35_spill] sm:$0xff] }
 0x2c6   :  { %v1796_v62 = vsel %vm405_vm7, %v9057_v40, %v9056_v27  ;;  %v1776_v36 = vadd.f32 %v9049_v41, %v1740_v10  ;;  %v1775_v32 = vadd.f32 %v1761_v51, %v1739_v47  ;;  %v1778_v60 = vadd.f32 %v9052_v42, %v1742_v9  ;;  %v9058_v5 = vld [vmem:[#allocation81_spill] sm:$0xff]  ;;  %v9059_v12 = vld [vmem:[#allocation42_spill] sm:$0xff]  ;;  %v9064_v47 = vld [vmem:[#allocation43_spill] sm:$0xff] }
 0x2c7   :  { %v1810_v34 = vadd.f32 %v9056_v27, %v1774_v61  ;;  %3169 = vrot.lane.b32.xlu1 %v9058_v5, %s3720_s8  ;;  %v1777_v23 = vadd.f32 %v1762_v44, %v1741_v22  ;;  %v1807_v35 = vadd.f32 %v1795_v18, %v1771_v29  ;;  %v1844_v38 = vadd.f32 %v9059_v12, %v1808_v8  ;;  %v9060_v3 = vld [vmem:[#allocation45_spill] sm:$0xff]  ;;  %v9061_v45 = vld [vmem:[#allocation46_spill] sm:$0xff]  ;;  %v9066_v51 = vld [vmem:[#allocation31_spill] sm:$0xff]  ;;  %v6668_v22 = vpop.permute.xlu1 %2907 }
 0x2c8   :  { %vm9062_vm4 = vcmask 973824   ;;  %3167 = vrot.lane.b32.xlu0 %v9063_v53, %s3720_s8  ;;  %v1809_v10 = vadd.f32 %v1796_v62, %v1773_v49  ;;  %v6666_v61 = vmul.f32 0.08216859, %v9066_v51  ;;  %9067 = vst [vmem:[#allocation110_spill] sm:$0xff] %v6668_v22  ;;  %v9068_v42 = vld [vmem:[#allocation32_spill] sm:$0xff]  ;;  %v9069_v44 = vld [vmem:[#allocation33_spill] sm:$0xff] }
 0x2c9   :  { %v1832_v40 = vsel %vm9062_vm4, %v9061_v45, %v9060_v3  ;;  %vm9065_vm8 = vmmov %vm9062_vm4  ;;  %v1846_v41 = vadd.f32 %v9060_v3, %v1810_v34  ;;  %v1797_v18 = vsel %vm405_vm7, %v9069_v44, %v9068_v42  ;;  %v9070_v29 = vld [vmem:[#allocation52_spill] sm:$0xff]  ;;  %v9072_v53 = vld [vmem:[#allocation57_spill] sm:$0xff] }
 0x2ca   :  { %v1831_v9 = vsel %vm9065_vm8, %v9064_v47, %v9059_v12  ;;  %v1880_v8 = vadd.f32 %v9070_v29, %v1844_v38  ;;  %v9071_v27 = vld [vmem:[#allocation56_spill] sm:$0xff]  ;;  %v6680_v12 = vpop.permute.xlu0 %2905  ;;  %v1845_v34 = vadd.f32 %v1832_v40, %v1809_v10  ;;  %v9074_v3 = vld [vmem:[#allocation53_spill] sm:$0xff]  ;;  %v9075_v51 = vld [vmem:[#allocation18_spill] sm:$0xff]  ;;  %v6691_v38 = vmul.f32 0.09546628, %v9012_v56 }
 0x2cb   :  { %v1868_v49 = vsel %vm479_vm9, %v9072_v53, %v9071_v27  ;;  %v9073_v62 = vld [vmem:[#allocation36_spill] sm:$0xff]  ;;  %v1867_v45 = vsel %vm479_vm9, %v9074_v3, %v9070_v29  ;;  %v6686_v47 = vadd.f32 %v9071_v27, %v1846_v41  ;;  %3173 = vrot.lane.b32.xlu1 %v9075_v51, %s3720_s8  ;;  %v9076_v44 = vld [vmem:[#allocation37_spill] sm:$0xff]  ;;  %v9077_v53 = vld [vmem:[#allocation38_spill] sm:$0xff]  ;;  %v1843_v24 = vadd.f32 %v1831_v9, %v1807_v35  ;;  %v6713_v35 = vpop.permute.xlu1 %2445 }
 0x2cc   :  { %v6678_v5 = vmul.f32 0.08216859, %v9073_v62  ;;  %v1798_v62 = vsel %vm405_vm7, %v9077_v53, %v9076_v44  ;;  %v6697_v40 = vmul.f32 0.08216859, %v9078_v55  ;;  %v9080_v10 = vld [vmem:[#allocation80_spill] sm:$0xff]  ;;  %v1812_v29 = vadd.f32 %v9068_v42, %v1776_v36  ;;  %v9081_v27 = vld [vmem:[#allocation47_spill] sm:$0xff]  ;;  %vm9083_vm5 = vmmov %vm9062_vm4 }
 0x2cd   :  { %3171 = vrot.lane.b32.xlu0 %v9080_v10, %s3720_s8  ;;  %v6702_v41 = vmul.f32 0.09546628, %v9036_v20  ;;  %v9082_v3 = vld [vmem:[#allocation48_spill] sm:$0xff]  ;;  %v6708_v51 = vadd.f32 %v1868_v49, %v1845_v34  ;;  %v6711_v53 = vmul.f32 0.08216859, %v9084_v1  ;;  %9086 = vst [vmem:[#allocation130_spill] sm:$0xff] %v6713_v35  ;;  %v1811_v55 = vadd.f32 %v1797_v18, %v1775_v32  ;;  %vm9166_vm8 = vmmov %vm9062_vm4 }
 0x2ce   :  { %9079 = vst [vmem:[#allocation111_spill] sm:$0xff] %v6697_v40  ;;  %v1833_v56 = vsel %vm9083_vm5, %v9082_v3, %v9081_v27  ;;  %v1814_v9 = vadd.f32 %v9076_v44, %v1778_v60  ;;  %v1892_v10 = vmul.f32 0.08638146, %v1880_v8  ;;  %v1879_v39 = vadd.f32 %v1867_v45, %v1843_v24  ;;  %v6716_v20 = vpop.permute.xlu0 %2909  ;;  %v9090_v18 = vld [vmem:[#allocation50_spill] sm:$0xff]  ;;  %v9096_v30 = vld [vmem:[#allocation89_spill] sm:$0xff]  ;;  %v9108_v14 = vld [vmem:[#allocation63_spill] sm:$0xff] }
 0x2cf   :  { %9085 = vst [vmem:[#allocation213_spill] sm:$0xff] %v6711_v53  ;;  %9087 = vst [vmem:[#allocation131_spill] sm:$0xff] %v6716_v20  ;;  %v1813_v57 = vadd.f32 %v1798_v62, %v1777_v23  ;;  %v6718_v36 = vmul.f32 0.08990675, %v1880_v8  ;;  %v6721_v42 = vmul.f32 0.08638146, %v6686_v47  ;;  %2379 = vrot.lane.b32.xlu1 %v6691_v38, %s3717_s5  ;;  %v1848_v1 = vadd.f32 %v9081_v27, %v1812_v29  ;;  %v6744_v62 = vpop.permute.xlu1 %2473 }
 0x2d0   :  { %v6724_v49 = vmul.f32 0.08216859, %v5608_v4  ;;  %v1847_v32 = vadd.f32 %v1833_v56, %v1811_v55  ;;  %v1888_v60 = vmul.f32 0.08216859, %v1880_v8  ;;  %v6730_v24 = vmul.f32 0.08216859, %v5654_v7  ;;  %vm9175_vm5 = vmmov %vm9062_vm4 }
 0x2d1   :  { %9088 = vst [vmem:[#allocation150_spill] sm:$0xff] %v6721_v42  ;;  %2377 = vrot.lane.b32.xlu0 %v6702_v41, %s3717_s5  ;;  %v9089_v23 = vld [vmem:[#allocation49_spill] sm:$0xff]  ;;  %v6737_v45 = vmul.f32 0.09264482, %v1880_v8  ;;  %v6739_v4 = vmul.f32 0.094516374, %v1880_v8 }
 0x2d2   :  { %v1834_v34 = vsel %vm9062_vm4, %v9090_v18, %v9089_v23  ;;  %v6742_v44 = vmul.f32 0.08638146, %v6708_v51  ;;  %9093 = vst [vmem:[#allocation135_spill] sm:$0xff] %v6744_v62  ;;  %v6747_v29 = vadd.f32 %v9089_v23, %v1814_v9  ;;  %v1906_v7 = vrot.slane %v1892_v10, 1  ;;  %v6751_v56 = vpop.permute.xlu0 %2447  ;;  %v9100_v10 = vld [vmem:[#allocation86_spill] sm:$0xff] }
 0x2d3   :  { %9091 = vst [vmem:[#allocation160_spill] sm:$0xff] %v6739_v4  ;;  %v6749_v27 = vmul.f32 0.09546628, %v1880_v8  ;;  %v1887_v3 = vmul.f32 0.08216859, %v1879_v39  ;;  %9095 = vst [vmem:[#allocation132_spill] sm:$0xff] %v6751_v56  ;;  %3177 = vrot.lane.b32.xlu1 %v9096_v30, %s3720_s8  ;;  %v6757_v25 = vadd.f32 %v1834_v34, %v1813_v57  ;;  %v6775_v57 = vpop.permute.xlu1 %2477 }
 0x2d4   :  { %9092 = vst [vmem:[#allocation235_spill] sm:$0xff] %v6742_v44  ;;  %9094 = vst [vmem:[#allocation137_spill] sm:$0xff] %v6747_v29  ;;  %v1936_v55 = vrot.slane %v6718_v36, 2  ;;  %v1891_v18 = vmul.f32 0.08638146, %v1879_v39  ;;  %v9102_v29 = vld [vmem:[#allocation61_spill] sm:$0xff] }
 0x2d5   :  { %v1921_v63 = vmul.f32 0.08990675, %v1879_v39  ;;  %9097 = vst [vmem:[#allocation133_spill] sm:$0xff] %v6757_v25  ;;  %v6759_v6 = vmul.f32 0.09264482, %v1879_v39  ;;  %3175 = vrot.lane.b32.xlu0 %v9100_v10, %s3720_s8  ;;  %v6773_v30 = vadd.f32 %v9102_v29, %v1848_v1  ;;  %9103 = vst [vmem:[#allocation217_spill] sm:$0xff] %v6775_v57 }
 0x2d6   :  { %v6761_v9 = vmul.f32 0.094516374, %v1879_v39  ;;  %v6763_v8 = vmul.f32 0.09546628, %v1879_v39  ;;  %v6769_v23 = vmul.f32 0.08990675, %v6686_v47  ;;  %v6783_v36 = vpop.permute.xlu0 %2475 }
 0x2d7   :  { %v6781_v10 = vmul.f32 0.08990675, %v6708_v51  ;;  %9105 = vst [vmem:[#allocation138_spill] sm:$0xff] %v6783_v36  ;;  %v1903_v62 = vrot.slane %v1891_v18, 1  ;;  %v1933_v0 = vrot.slane %v1921_v63, 2  ;;  %v9106_v1 = vrot.slane %v6721_v42, 1  ;;  %v2912_v37 = vpop.permute.xlu1 %2911 }
 0x2d8   :  { %9098 = vst [vmem:[#allocation158_spill] sm:$0xff] %v6761_v9  ;;  %9099 = vst [vmem:[#allocation143_spill] sm:$0xff] %v6763_v8  ;;  %v9107_v57 = vld [vmem:[#allocation60_spill] sm:$0xff]  ;;  %v1963_v39 = vrot.slane %v6759_v6, 3  ;;  %v1869_v36 = vsel %vm479_vm9, %v9108_v14, %v9102_v29  ;;  %v9109_v18 = vld [vmem:[#allocation54_spill] sm:$0xff]  ;;  %vm9180_vm4 = vcmask 1006592  }
 0x2d9   :  { %9101 = vst [vmem:[#allocation145_spill] sm:$0xff] %v6769_v23  ;;  %9104 = vst [vmem:[#allocation212_spill] sm:$0xff] %v6781_v10  ;;  %v1908_v59 = vsel %vm516_vm10, %v1906_v7, %v9106_v1  ;;  %3205 = vrot.lane.b32.xlu1 %v9107_v57, %s3721_s9  ;;  %3203 = vrot.lane.b32.xlu0 %v9109_v18, %s3721_s9  ;;  %v6801_v7 = vmul.f32 0.09264482, %v6686_v47  ;;  %v9111_v57 = vrot.slane %v6742_v44, 1  ;;  %v9122_v50 = vrot.slane %v6781_v10, 2 }
 0x2da   :  { %v6807_v1 = vmul.f32 0.08638146, %v6773_v30  ;;  %v1918_v25 = vadd.f32 %v1908_v59, %v1888_v60  ;;  %v6812_v29 = vmul.f32 0.09264482, %v6708_v51  ;;  %v6814_v18 = vpop.permute.xlu0 %2479  ;;  %v1890_v35 = vmul.f32 0.08216859, %v6686_v47 }
 0x2db   :  { %9110 = vst [vmem:[#allocation139_spill] sm:$0xff] %v6801_v7  ;;  %v1905_v6 = vsel %vm516_vm10, %v1903_v62, %v9111_v57  ;;  %9114 = vst [vmem:[#allocation141_spill] sm:$0xff] %v6814_v18  ;;  %v6818_v56 = vadd.f32 %v1869_v36, %v1847_v32  ;;  %v9115_v62 = vld [vmem:[#allocation64_spill] sm:$0xff]  ;;  %v6831_v34 = vmul.f32 0.094516374, %v6686_v47  ;;  %v9119_v36 = vld [vmem:[#allocation62_spill] sm:$0xff]  ;;  %v1935_v17 = vsel %vm547_vm11, %v1933_v0, %v9122_v50 }
 0x2dc   :  { %9112 = vst [vmem:[#allocation153_spill] sm:$0xff] %v6807_v1  ;;  %9113 = vst [vmem:[#allocation140_spill] sm:$0xff] %v6812_v29  ;;  %v3685_v59 = vld [vmem:[%s8109_s1 + $0x38] sm:$0x3]  ;;  %v6834_v63 = vmul.f32 0.09546628, %v6686_v47  ;;  %v1917_v32 = vadd.f32 %v1905_v6, %v1887_v3 }
 0x2dd   :  { %3209 = vrot.lane.b32.xlu1 %v9115_v62, %s3721_s9  ;;  %v3686_v60 = vld [vmem:[%s8110_s2 + $0x38] sm:$0x3]  ;;  %9117 = vst [vmem:[#allocation151_spill] sm:$0xff] %v6831_v34  ;;  %3207 = vrot.lane.b32.xlu0 %v9119_v36, %s3721_s9  ;;  %v3687_v62 = vld [vmem:[%s8109_s1 + $0x30] sm:$0x3]  ;;  %v8340_v47 = vrot.slane %v6801_v7, 3  ;;  %v2956_v36 = vpop.permute.xlu1 %2955 }
 0x2de   :  { %v6828_v57 = vmul.f32 %v3686_v60, %v3685_v59  ;;  %9118 = vst [vmem:[#allocation161_spill] sm:$0xff] %v6834_v63  ;;  %v3688_v14 = vld [vmem:[%s8110_s2 + $0x30] sm:$0x3]  ;;  %v9121_v60 = vrot.slane %v6769_v23, 2  ;;  %v1911_v6 = vrot.slane %v6807_v1, 1  ;;  %v1997_v0 = vrot.slane %v6831_v34, 4 }
 0x2df   :  { %v6844_v59 = vmul.f32 %v3688_v14, %v3687_v62  ;;  %v6857_v14 = vmul.f32 0.094516374, %v6708_v51  ;;  %v6859_v62 = vpop.permute.xlu0 %2913  ;;  %v6878_v3 = vmul.f32 0.09546628, %v6708_v51  ;;  %v9129_v1 = vrot.slane %v6721_v42, 1 }
 0x2e0   :  { %9116 = vst [vmem:[#allocation146_spill] sm:$0xff] %v6828_v57  ;;  %v1938_v18 = vsel %vm547_vm11, %v1936_v55, %v9121_v60  ;;  %v6862_v55 = vmul.f32 0.08990675, %v6773_v30  ;;  %v6865_v60 = vmul.f32 0.08638146, %v6818_v56 }
 0x2e1   :  { %9120 = vst [vmem:[#allocation147_spill] sm:$0xff] %v6844_v59  ;;  %v1948_v54 = vadd.f32 %v1938_v18, %v1918_v25  ;;  %9123 = vst [vmem:[#allocation216_spill] sm:$0xff] %v6857_v14  ;;  %v6869_v25 = vsel %vm135_vm1, %v2912_v37, %v6859_v62  ;;  %2415 = vrot.lane.b32.xlu1 %v6691_v38, %s3718_s6  ;;  %v6874_v50 = vmul.f32 0.08638146, %v6828_v57  ;;  %2413 = vrot.lane.b32.xlu0 %v6702_v41, %s3718_s6  ;;  %v2960_v41 = vpop.permute.xlu1 %2959 }
 0x2e2   :  { %9124 = vst [vmem:[#allocation154_spill] sm:$0xff] %v6862_v55  ;;  %9125 = vst [vmem:[#allocation159_spill] sm:$0xff] %v6865_v60  ;;  %v1947_v18 = vadd.f32 %v1935_v17, %v1917_v32  ;;  %v6883_v15 = vmul.f32 0.08638146, %v6844_v59  ;;  %v9128_v37 = vrot.slane %v6737_v45, 3  ;;  %v1912_v40 = vsel %vm516_vm10, %v9129_v1, %v1911_v6 }
 0x2e3   :  { %9126 = vst [vmem:[#allocation162_spill] sm:$0xff] %v6874_v50  ;;  %v6894_v17 = vmul.f32 0.094516374, %v6773_v30  ;;  %v6897_v32 = vmul.f32 0.08990675, %v6818_v56  ;;  %v6902_v53 = vpop.permute.xlu0 %2957  ;;  %v1941_v6 = vrot.slane %v6862_v55, 2 }
 0x2e4   :  { %9127 = vst [vmem:[#allocation148_spill] sm:$0xff] %v6883_v15  ;;  %v1968_v38 = vsel %vm578_vm12, %v9128_v37, %v8340_v47  ;;  %v1889_v7 = vmul.f32 0.08216859, %v6708_v51  ;;  %v9132_v37 = vrot.slane %v6812_v29, 3  ;;  %v1909_v47 = vrot.slane %v6865_v60, 1 }
 0x2e5   :  { %9130 = vst [vmem:[#allocation149_spill] sm:$0xff] %v6894_v17  ;;  %9131 = vst [vmem:[#allocation155_spill] sm:$0xff] %v6897_v32  ;;  %v1978_v22 = vadd.f32 %v1968_v38, %v1948_v54  ;;  %v6911_v42 = vsel %vm188_vm2, %v2956_v36, %v6902_v53  ;;  %2865 = vrot.lane.b32.xlu1 %v6874_v50, %s3713_s20  ;;  %v1920_v38 = vadd.f32 %v1912_v40, %v1890_v35 }
 0x2e6   :  { %v1965_v1 = vsel %vm578_vm12, %v1963_v39, %v9132_v37  ;;  %v6917_v45 = vmul.f32 0.09546628, %v6773_v30  ;;  %2863 = vrot.lane.b32.xlu0 %v6883_v15, %s3713_s20  ;;  %v9134_v39 = vrot.slane %v6739_v4, 4  ;;  %v2001_v36 = vrot.slane %v6894_v17, 4 }
 0x2e7   :  { %v1977_v54 = vadd.f32 %v1965_v1, %v1947_v18  ;;  %v1939_v20 = vrot.slane %v6897_v32, 2  ;;  %v6927_v60 = vmul.f32 0.094516374, %v6818_v56  ;;  %v2482_v18 = vpop.permute.xlu1 %2481  ;;  %v9136_v40 = vrot.slane %v6834_v63, 5  ;;  %v6945_v29 = vpop.permute.xlu0 %2961 }
 0x2e8   :  { %9133 = vst [vmem:[#allocation156_spill] sm:$0xff] %v6917_v45  ;;  %v1998_v37 = vsel %vm609_vm13, %v9134_v39, %v1997_v0  ;;  %v9137_v35 = vrot.slane %v6749_v27, 5  ;;  %v9138_v51 = vrot.slane %v6857_v14, 4  ;;  %v9139_v55 = vrot.slane %v6761_v9, 4  ;;  %v9161_v45 = vld [vmem:[#allocation83_spill] sm:$0xff] }
 0x2e9   :  { %9135 = vst [vmem:[#allocation163_spill] sm:$0xff] %v6927_v60  ;;  %v6940_v17 = vmul.f32 0.09546628, %v6818_v56  ;;  %v6943_v32 = vmul.f32 0.09264482, %v6773_v30  ;;  %v2008_v15 = vadd.f32 %v1998_v37, %v1978_v22  ;;  %v9142_v50 = vrot.slane %v6769_v23, 2 }
 0x2ea   :  { %v2028_v1 = vsel %vm640_vm14, %v9137_v35, %v9136_v40  ;;  %v1995_v39 = vsel %vm609_vm13, %v9139_v55, %v9138_v51  ;;  %v9143_v40 = vrot.slane %v6742_v44, 1  ;;  %v6955_v55 = vsel %vm188_vm2, %v2960_v41, %v6945_v29  ;;  %v9144_v51 = vld [vmem:[#allocation78_spill] sm:$0xff]  ;;  %v9151_v44 = vld [vmem:[#allocation71_spill] sm:$0xff]  ;;  %v9153_v23 = vld [vmem:[#allocation68_spill] sm:$0xff] }
 0x2eb   :  { %9140 = vst [vmem:[#allocation221_spill] sm:$0xff] %v6940_v17  ;;  %9141 = vst [vmem:[#allocation192_spill] sm:$0xff] %v6943_v32  ;;  %v1942_v4 = vsel %vm547_vm11, %v9142_v50, %v1941_v6  ;;  %3213 = vrot.lane.b32.xlu1 %v9144_v51, %s3721_s9  ;;  %v6959_v30 = vadd.f32 %v1995_v39, %v1977_v54  ;;  %v9145_v9 = vrot.slane %v6878_v3, 5  ;;  %v9146_v22 = vrot.slane %v6763_v8, 5  ;;  %v9147_v6 = vld [vmem:[#allocation74_spill] sm:$0xff]  ;;  %v9150_v51 = vld [vmem:[#allocation65_spill] sm:$0xff] }
 0x2ec   :  { %v1910_v35 = vsel %vm516_vm10, %v9143_v40, %v1909_v47  ;;  %v6968_v50 = vadd.f32 %v1942_v4, %v1920_v38  ;;  %3211 = vrot.lane.b32.xlu0 %v9147_v6, %s3721_s9  ;;  %v9148_v41 = vrot.slane %v6781_v10, 2  ;;  %v6978_v39 = vsel %vm609_vm13, %v1997_v0, %v2001_v36  ;;  %v2510_v4 = vpop.permute.xlu1 %2509  ;;  %v9152_v6 = vld [vmem:[#allocation67_spill] sm:$0xff]  ;;  %v9154_v36 = vld [vmem:[#allocation70_spill] sm:$0xff]  ;;  %v9155_v54 = vld [vmem:[#allocation76_spill] sm:$0xff] }
 0x2ed   :  { %v6966_v37 = vsel %vm640_vm14, %v9146_v22, %v9145_v9  ;;  %9149 = vst [vmem:[#allocation220_spill] sm:$0xff] %v6978_v39  ;;  %v2173_v9 = vsel %vm82_vm0, %v9151_v44, %v9150_v51  ;;  %v1919_v38 = vadd.f32 %v1910_v35, %v1889_v7  ;;  %v2174_v10 = vsel %vm82_vm0, %v9153_v23, %v9152_v6  ;;  %v9156_v35 = vld [vmem:[#allocation40_spill] sm:$0xff]  ;;  %v9164_v14 = vld [vmem:[#allocation87_spill] sm:$0xff] }
 0x2ee   :  { %v1940_v40 = vsel %vm547_vm11, %v9148_v41, %v1939_v20  ;;  %v6988_v20 = vpop.permute.xlu0 %2483  ;;  %v6990_v41 = vadd.f32 %v2028_v1, %v2008_v15  ;;  %v2175_v44 = vsel %vm82_vm0, %v9155_v54, %v9154_v36  ;;  %v2186_v23 = vadd.f32 %v9150_v51, %v6558_v43  ;;  %v9157_v1 = vld [vmem:[#allocation17_spill] sm:$0xff]  ;;  %v9158_v0 = vld [vmem:[#allocation232_spill] sm:$0xff]  ;;  %v9159_v54 = vld [vmem:[#allocation34_spill] sm:$0xff] }
 0x2ef   :  { %v6998_v7 = vsel %vm405_vm7, %v2482_v18, %v6988_v20  ;;  %3241 = vrot.lane.b32.xlu1 %v9156_v35, %s3722_s10  ;;  %v2185_v15 = vadd.f32 %v2173_v9, %v6561_v58  ;;  %v2225_v47 = vsel %vm135_vm1, %v9158_v0, %v9157_v1  ;;  %v2188_v18 = vadd.f32 %v9152_v6, %v6567_v46  ;;  %v9160_v35 = vld [vmem:[#allocation82_spill] sm:$0xff]  ;;  %v9162_v60 = vld [vmem:[#allocation84_spill] sm:$0xff]  ;;  %v9163_v43 = vld [vmem:[#allocation85_spill] sm:$0xff] }
 0x2f0   :  { %3239 = vrot.lane.b32.xlu0 %v9159_v54, %s3722_s10  ;;  %v2187_v17 = vadd.f32 %v2174_v10, %v6570_v19  ;;  %v2226_v22 = vsel %vm135_vm1, %v9161_v45, %v9160_v35  ;;  %v2227_v58 = vsel %vm135_vm1, %v9163_v43, %v9162_v60  ;;  %v2514_v51 = vpop.permute.xlu1 %2513  ;;  %v2190_v9 = vadd.f32 %v9154_v36, %v6587_v26  ;;  %v9165_v46 = vld [vmem:[#allocation88_spill] sm:$0xff] }
 0x2f1   :  { %v2189_v0 = vadd.f32 %v2175_v44, %v6590_v21  ;;  %v2238_v54 = vadd.f32 %v9157_v1, %v2186_v23  ;;  %v2277_v19 = vsel %vm188_vm2, %v9165_v46, %v9164_v14  ;;  %v7029_v6 = vadd.f32 %v1940_v40, %v1919_v38  ;;  %v9167_v26 = vld [vmem:[#allocation44_spill] sm:$0xff]  ;;  %v9168_v40 = vld [vmem:[#allocation39_spill] sm:$0xff]  ;;  %v9169_v38 = vld [vmem:[#allocation90_spill] sm:$0xff] }
 0x2f2   :  { %v7027_v10 = vpop.permute.xlu0 %2511  ;;  %v2237_v45 = vadd.f32 %v2225_v47, %v2185_v15  ;;  %v2240_v8 = vadd.f32 %v9160_v35, %v2188_v18  ;;  %v7038_v21 = vadd.f32 %v2226_v22, %v2187_v17  ;;  %v2242_v36 = vadd.f32 %v9162_v60, %v2190_v9  ;;  %v9170_v1 = vld [vmem:[#allocation92_spill] sm:$0xff]  ;;  %v9172_v60 = vld [vmem:[#allocation91_spill] sm:$0xff] }
 0x2f3   :  { %v7034_v43 = vsel %vm9166_vm8, %v2510_v4, %v7027_v10  ;;  %3245 = vrot.lane.b32.xlu1 %v9167_v26, %s3722_s10  ;;  %v2241_v44 = vadd.f32 %v2227_v58, %v2189_v0  ;;  %v2290_v23 = vadd.f32 %v9164_v14, %v2238_v54  ;;  %v9171_v4 = vld [vmem:[#allocation93_spill] sm:$0xff]  ;;  %v2869_v17 = vsel %vm82_vm0, %v6610_v31, %v6648_v13  ;;  %v9173_v0 = vld [vmem:[#allocation96_spill] sm:$0xff]  ;;  %vm9186_vm8 = vmmov %vm9180_vm4 }
 0x2f4   :  { %3243 = vrot.lane.b32.xlu0 %v9168_v40, %s3722_s10  ;;  %v2289_v47 = vadd.f32 %v2277_v19, %v2237_v45  ;;  %v7045_v15 = vadd.f32 %v9169_v38, %v2240_v8  ;;  %v2279_v18 = vsel %vm188_vm2, %v9171_v4, %v9170_v1  ;;  %v2964_v22 = vpop.permute.xlu1 %2963  ;;  %v7056_v14 = vsel %vm188_vm2, %v9172_v60, %v9169_v38  ;;  %v9174_v54 = vld [vmem:[#allocation97_spill] sm:$0xff] }
 0x2f5   :  { %v2294_v35 = vadd.f32 %v9170_v1, %v2242_v36  ;;  %v7062_v8 = vmul.f32 0.08990675, %v6828_v57  ;;  %v7065_v9 = vmul.f32 0.09264482, %v6828_v57  ;;  %v2329_v31 = vsel %vm241_vm3, %v9174_v54, %v9173_v0  ;;  %v9176_v40 = vld [vmem:[#allocation21_spill] sm:$0xff] }
 0x2f6   :  { %v7059_v58 = vpop.permute.xlu0 %2515  ;;  %v2867_v46 = vsel %vm82_vm0, %v6422_v11, %v6483_v33  ;;  %v2884_v19 = vadd.f32 %v6648_v13, %v6730_v24  ;;  %v2293_v26 = vadd.f32 %v2279_v18, %v2241_v44  ;;  %v2883_v36 = vadd.f32 %v2869_v17, %v6724_v49  ;;  %v9177_v13 = vld [vmem:[#allocation108_spill] sm:$0xff]  ;;  %v9178_v24 = vld [vmem:[#allocation109_spill] sm:$0xff] }
 0x2f7   :  { %v7077_v45 = vsel %vm9175_vm5, %v2514_v51, %v7059_v58  ;;  %2451 = vrot.lane.b32.xlu1 %v6551_v2, %s3719_s7  ;;  %v7085_v38 = vmul.f32 0.08990675, %v6844_v59  ;;  %v7088_v11 = vmul.f32 0.09264482, %v6844_v59  ;;  %v2331_v51 = vsel %vm241_vm3, %v9178_v24, %v9177_v13 }
 0x2f8   :  { %2449 = vrot.lane.b32.xlu0 %v9176_v40, %s3719_s7  ;;  %v2880_v1 = vadd.f32 %v6483_v33, %v6678_v5  ;;  %v2919_v2 = vsel %vm135_vm1, %v6642_v28, %v6680_v12  ;;  %v2936_v49 = vadd.f32 %v6859_v62, %v2884_v19  ;;  %v3008_v44 = vpop.permute.xlu1 %3007  ;;  %v2342_v4 = vadd.f32 %v9173_v0, %v2290_v23  ;;  %v9182_v0 = vld [vmem:[#allocation131_spill] sm:$0xff] }
 0x2f9   :  { %v2341_v18 = vadd.f32 %v2329_v31, %v2289_v47  ;;  %v2879_v17 = vadd.f32 %v2867_v46, %v6666_v61  ;;  %v2935_v60 = vadd.f32 %v6869_v25, %v2883_v36  ;;  %v2868_v40 = vsel %vm82_vm0, %v6474_v48, %v6517_v16  ;;  %v9179_v48 = vld [vmem:[#allocation117_spill] sm:$0xff]  ;;  %v9183_v31 = vld [vmem:[#allocation110_spill] sm:$0xff] }
 0x2fa   :  { %v2966_v54 = vpop.permute.xlu0 %2965  ;;  %v2932_v33 = vadd.f32 %v6680_v12, %v2880_v1  ;;  %v2346_v62 = vadd.f32 %v9177_v13, %v2294_v35  ;;  %v2345_v23 = vadd.f32 %v2331_v51, %v2293_v26  ;;  %v2383_v12 = vsel %vm9180_vm4, %v9179_v48, %v6373_v52  ;;  %v9181_v25 = vld [vmem:[#allocation213_spill] sm:$0xff]  ;;  %v9184_v26 = vld [vmem:[#allocation116_spill] sm:$0xff]  ;;  %v9187_v51 = vld [vmem:[#allocation111_spill] sm:$0xff] }
 0x2fb   :  { %v2973_v5 = vsel %vm188_vm2, %v2964_v22, %v2966_v54  ;;  %v7107_v28 = vadd.f32 %v2966_v54, %v2936_v49  ;;  %2917 = vrot.lane.b32.xlu1 %v7062_v8, %s3714_s29  ;;  %v2931_v61 = vadd.f32 %v2919_v2, %v2879_v17  ;;  %v2882_v22 = vadd.f32 %v6517_v16, %v9181_v25  ;;  %v9185_v36 = vld [vmem:[#allocation113_spill] sm:$0xff]  ;;  %v9188_v17 = vld [vmem:[#allocation124_spill] sm:$0xff]  ;;  %v9189_v16 = vld [vmem:[#allocation106_spill] sm:$0xff] }
 0x2fc   :  { %v7112_v47 = vadd.f32 %v2973_v5, %v2935_v60  ;;  %2915 = vrot.lane.b32.xlu0 %v7085_v38, %s3714_s29  ;;  %v2920_v46 = vsel %vm135_vm1, %v9183_v31, %v9182_v0  ;;  %v2984_v35 = vadd.f32 %v6902_v53, %v2932_v33  ;;  %v3012_v19 = vpop.permute.xlu1 %3011  ;;  %v2381_v13 = vsel %vm9186_vm8, %v9185_v36, %v9184_v26  ;;  %v9191_v5 = vld [vmem:[#allocation55_spill] sm:$0xff]  ;;  %v9197_v31 = vld [vmem:[#allocation130_spill] sm:$0xff] }
 0x2fd   :  { %v2398_v24 = vadd.f32 %v6373_v52, %v2346_v62  ;;  %v2881_v1 = vadd.f32 %v2868_v40, %v9187_v51  ;;  %v2983_v2 = vadd.f32 %v6911_v42, %v2931_v61  ;;  %vm9190_vm5 = vcmask 998400   ;;  %v9192_v42 = vld [vmem:[#allocation51_spill] sm:$0xff]  ;;  %v9193_v61 = vld [vmem:[#allocation121_spill] sm:$0xff] }
 0x2fe   :  { %v3010_v49 = vpop.permute.xlu0 %3009  ;;  %v2419_v60 = vsel %vm9190_vm5, %v9189_v16, %v9188_v17  ;;  %v2934_v54 = vadd.f32 %v9182_v0, %v2882_v22  ;;  %v2394_v52 = vadd.f32 %v9184_v26, %v2342_v4  ;;  %v2397_v62 = vadd.f32 %v2383_v12, %v2345_v23  ;;  %v9194_v25 = vld [vmem:[#allocation119_spill] sm:$0xff]  ;;  %vm9195_vm4 = vmmov %vm9190_vm5  ;;  %v9196_v0 = vld [vmem:[#allocation132_spill] sm:$0xff] }
 0x2ff   :  { %v3023_v53 = vsel %vm241_vm3, %v3008_v44, %v3010_v49  ;;  %v7136_v33 = vadd.f32 %v3010_v49, %v2984_v35  ;;  %3249 = vrot.lane.b32.xlu1 %v9191_v5, %s3722_s10  ;;  %v2933_v40 = vadd.f32 %v2920_v46, %v2881_v1  ;;  %v2417_v22 = vsel %vm9195_vm4, %v9194_v25, %v9193_v61  ;;  %v9198_v1 = vld [vmem:[#allocation127_spill] sm:$0xff]  ;;  %v9203_v5 = vld [vmem:[#allocation9_spill] sm:$0xff] }
 0x300   :  { %v7141_v48 = vadd.f32 %v3023_v53, %v2983_v2  ;;  %3247 = vrot.lane.b32.xlu0 %v9192_v42, %s3722_s10  ;;  %v2434_v44 = vadd.f32 %v9188_v17, %v2398_v24  ;;  %v2455_v35 = vsel %vm368_vm6, %v9197_v31, %v9196_v0  ;;  %v2986_v36 = vadd.f32 %v6945_v29, %v2934_v54  ;;  %v2518_v4 = vpop.permute.xlu1 %2517  ;;  %v9199_v2 = vld [vmem:[#allocation107_spill] sm:$0xff]  ;;  %v9200_v29 = vld [vmem:[#allocation8_spill] sm:$0xff] }
 0x301   :  { %v2393_v23 = vadd.f32 %v2381_v13, %v2341_v18  ;;  %v2430_v12 = vadd.f32 %v9193_v61, %v2394_v52  ;;  %v2433_v46 = vadd.f32 %v2419_v60, %v2397_v62  ;;  %v2985_v26 = vadd.f32 %v6955_v55, %v2933_v40  ;;  %v9201_v18 = vld [vmem:[#allocation101_spill] sm:$0xff]  ;;  %v9202_v13 = vld [vmem:[#allocation104_spill] sm:$0xff]  ;;  %v9204_v62 = vld [vmem:[#allocation138_spill] sm:$0xff] }
 0x302   :  { %v3014_v51 = vpop.permute.xlu0 %3013  ;;  %v2453_v49 = vsel %vm368_vm6, %v9199_v2, %v9198_v1  ;;  %v2470_v24 = vadd.f32 %v9196_v0, %v2434_v44  ;;  %v2330_v60 = vsel %vm241_vm3, %v9202_v13, %v9201_v18  ;;  %v2291_v52 = vadd.f32 %v7056_v14, %v7038_v21  ;;  %v9205_v40 = vld [vmem:[#allocation135_spill] sm:$0xff]  ;;  %v9206_v44 = vld [vmem:[#allocation118_spill] sm:$0xff]  ;;  %v9207_v0 = vld [vmem:[#allocation120_spill] sm:$0xff] }
 0x303   :  { %v3024_v17 = vsel %vm241_vm3, %v3012_v19, %v3014_v51  ;;  %v7160_v16 = vadd.f32 %v3014_v51, %v2986_v36  ;;  %2487 = vrot.lane.b32.xlu1 %v9200_v29, %s3720_s8  ;;  %v2429_v54 = vadd.f32 %v2417_v22, %v2393_v23  ;;  %v2469_v55 = vadd.f32 %v2455_v35, %v2433_v46 }
 0x304   :  { %v7167_v53 = vadd.f32 %v3024_v17, %v2985_v26  ;;  %2485 = vrot.lane.b32.xlu0 %v9203_v5, %s3720_s8  ;;  %v2466_v19 = vadd.f32 %v9198_v1, %v2430_v12  ;;  %v2489_v42 = vsel %vm405_vm7, %v9205_v40, %v9204_v62  ;;  %v2506_v61 = vadd.f32 %v6988_v20, %v2470_v24  ;;  %v2546_v25 = vpop.permute.xlu1 %2545  ;;  %v9210_v26 = vld [vmem:[#allocation128_spill] sm:$0xff] }
 0x305   :  { %v2344_v22 = vadd.f32 %v9201_v18, %v7045_v15  ;;  %v2382_v31 = vsel %vm9186_vm8, %v9207_v0, %v9206_v44  ;;  %v2465_v35 = vadd.f32 %v2453_v49, %v2429_v54  ;;  %v2505_v36 = vadd.f32 %v6998_v7, %v2469_v55  ;;  %v9209_v15 = vld [vmem:[#allocation236_spill] sm:$0xff]  ;;  %v9219_v0 = vld [vmem:[#allocation141_spill] sm:$0xff] }
 0x306   :  { %v2520_v21 = vpop.permute.xlu0 %2519  ;;  %v2343_v14 = vadd.f32 %v2330_v60, %v2291_v52  ;;  %v2502_v23 = vadd.f32 %v9204_v62, %v2466_v19  ;;  %vm9208_vm5 = vcmask 973824   ;;  %v2418_v51 = vsel %vm9195_vm4, %v9210_v26, %v9209_v15  ;;  %v9216_v52 = vld [vmem:[#allocation129_spill] sm:$0xff] }
 0x307   :  { %v2527_v12 = vsel %vm9208_vm5, %v2518_v4, %v2520_v21  ;;  %v7186_v46 = vadd.f32 %v2520_v21, %v2506_v61  ;;  %2969 = vrot.lane.b32.xlu1 %v7065_v9, %s3715_s30  ;;  %v2396_v20 = vadd.f32 %v9206_v44, %v2344_v22  ;;  %v2501_v1 = vadd.f32 %v2489_v42, %v2465_v35  ;;  %v9212_v4 = vld [vmem:[#allocation139_spill] sm:$0xff]  ;;  %v9217_v19 = vld [vmem:[#allocation125_spill] sm:$0xff]  ;;  %v9218_v44 = vld [vmem:[#allocation224_spill] sm:$0xff] }
 0x308   :  { %v7194_v2 = vadd.f32 %v2527_v12, %v2505_v36  ;;  %2967 = vrot.lane.b32.xlu0 %v7088_v11, %s3715_s30  ;;  %v9211_v7 = vrot.slane %v6943_v32, 3  ;;  %v9213_v49 = vrot.slane %v9212_v4, 3  ;;  %v9214_v17 = vrot.slane %v6834_v63, 6  ;;  %v2550_v54 = vpop.permute.xlu1 %2549  ;;  %v9225_v12 = vld [vmem:[#allocation160_spill] sm:$0xff] }
 0x309   :  { %v9215_v29 = vrot.slane %v6749_v27, 6  ;;  %v2395_v13 = vadd.f32 %v2382_v31, %v2343_v14  ;;  %v2538_v60 = vadd.f32 %v7027_v10, %v2502_v23  ;;  %v7210_v55 = vmul.f32 0.09264482, %v6818_v56  ;;  %v9220_v31 = vld [vmem:[#allocation217_spill] sm:$0xff] }
 0x30a   :  { %v1972_v24 = vsel %vm578_vm12, %v9213_v49, %v9211_v7  ;;  %v2432_v5 = vadd.f32 %v9209_v15, %v2396_v20  ;;  %v2454_v62 = vsel %vm368_vm6, %v9217_v19, %v9216_v52  ;;  %v2537_v40 = vadd.f32 %v7034_v43, %v2501_v1  ;;  %v2548_v42 = vpop.permute.xlu0 %2547  ;;  %v9221_v43 = vld [vmem:[#allocation225_spill] sm:$0xff] }
 0x30b   :  { %v2046_v18 = vsel %vm659_vm15, %v9215_v29, %v9214_v17  ;;  %v2431_v61 = vadd.f32 %v2418_v51, %v2395_v13  ;;  %v2561_v27 = vsel %vm479_vm9, %v2546_v25, %v2548_v42  ;;  %v2574_v22 = vadd.f32 %v2548_v42, %v2538_v60  ;;  %2523 = vrot.lane.b32.xlu1 %v9218_v44, %s3721_s9 }
 0x30c   :  { %v7221_v10 = vmul.f32 0.094516374, %v6828_v57  ;;  %v2468_v56 = vadd.f32 %v9216_v52, %v2432_v5  ;;  %v2490_v35 = vsel %vm405_vm7, %v9220_v31, %v9219_v0  ;;  %v2573_v36 = vadd.f32 %v2561_v27, %v2537_v40  ;;  %2521 = vrot.lane.b32.xlu0 %v9221_v43, %s3721_s9  ;;  %v3016_v51 = vpop.permute.xlu1 %3015 }
 0x30d   :  { %v7230_v21 = vmul.f32 0.094516374, %v6844_v59  ;;  %v7233_v25 = vadd.f32 %v1972_v24, %v6968_v50  ;;  %v7236_v14 = vadd.f32 %v2046_v18, %v6990_v41  ;;  %v9224_v23 = vrot.slane %v6831_v34, 7 }
 0x30e   :  { %v9226_v20 = vrot.slane %v9225_v12, 7  ;;  %vm9227_vm8 = vcmask 1040384   ;;  %v2467_v26 = vadd.f32 %v2454_v62, %v2431_v61  ;;  %v2504_v1 = vadd.f32 %v9219_v0, %v2468_v56  ;;  %v2552_v50 = vpop.permute.xlu0 %2551 }
 0x30f   :  { %9222 = vst [vmem:[#allocation198_spill] sm:$0xff] %v7233_v25  ;;  %9223 = vst [vmem:[#allocation190_spill] sm:$0xff] %v7236_v14  ;;  %v7246_v7 = vmul.f32 0.08638146, %v2573_v36  ;;  %v2586_v49 = vmul.f32 0.08638146, %v2574_v22  ;;  %3021 = vrot.lane.b32.xlu1 %v7221_v10, %s3716_s4  ;;  %v2562_v12 = vsel %vm479_vm9, %v2550_v54, %v2552_v50 }
 0x310   :  { %v7243_v15 = vsel %vm9227_vm8, %v9226_v20, %v9224_v23  ;;  %v2616_v17 = vmul.f32 0.08990675, %v2574_v22  ;;  %v2503_v24 = vadd.f32 %v2490_v35, %v2467_v26  ;;  %v7248_v29 = vmul.f32 0.08990675, %v2573_v36  ;;  %3019 = vrot.lane.b32.xlu0 %v7230_v21, %s3716_s4  ;;  %v3060_v61 = vpop.permute.xlu1 %3059 }
 0x311   :  { %9228 = vst [vmem:[#allocation196_spill] sm:$0xff] %v7243_v15  ;;  %v7250_v41 = vmul.f32 0.09264482, %v2573_v36  ;;  %v7252_v18 = vmul.f32 0.09264482, %v2574_v22  ;;  %v2540_v60 = vadd.f32 %v7059_v58, %v2504_v1  ;;  %v2597_v27 = vrot.slane %v7246_v7, 1 }
 0x312   :  { %v3050_v5 = vmul.f32 0.09546628, %v6828_v57  ;;  %v3049_v52 = vmul.f32 0.09546628, %v6844_v59  ;;  %v2539_v19 = vadd.f32 %v7077_v45, %v2503_v24  ;;  %v2581_v62 = vmul.f32 0.08216859, %v2573_v36  ;;  %v3018_v58 = vpop.permute.xlu0 %3017 }
 0x313   :  { %v2582_v40 = vmul.f32 0.08216859, %v2574_v22  ;;  %v7263_v42 = vmul.f32 0.094516374, %v2573_v36  ;;  %v2600_v44 = vrot.slane %v2586_v49, 1  ;;  %v2630_v56 = vrot.slane %v2616_v17, 2 }
 0x314   :  { %v7266_v0 = vmul.f32 0.094516374, %v2574_v22  ;;  %v2627_v31 = vrot.slane %v7248_v29, 2  ;;  %v2657_v35 = vrot.slane %v7250_v41, 3  ;;  %v2660_v43 = vrot.slane %v7252_v18, 3  ;;  %v9229_v45 = vld [vmem:[#allocation208_spill] sm:$0xff]  ;;  %v3064_v29 = vpop.permute.xlu1 %3063 }
 0x315   :  { %v7271_v23 = vmul.f32 0.09546628, %v2573_v36  ;;  %2559 = vrot.lane.b32.xlu1 %v9229_v45, %s3722_s10  ;;  %v2576_v20 = vadd.f32 %v2552_v50, %v2540_v60  ;;  %v3025_v26 = vsel %vm241_vm3, %v3016_v51, %v3018_v58  ;;  %v7278_v1 = vadd.f32 %v3018_v58, %v7107_v28  ;;  %v9230_v7 = vld [vmem:[#allocation209_spill] sm:$0xff] }
 0x316   :  { %2557 = vrot.lane.b32.xlu0 %v9230_v7, %s3722_s10  ;;  %v2687_v49 = vrot.slane %v7263_v42, 4  ;;  %v7283_v17 = vmul.f32 0.09546628, %v2574_v22  ;;  %v2575_v36 = vadd.f32 %v2562_v12, %v2539_v19  ;;  %v7286_v24 = vadd.f32 %v3025_v26, %v7112_v47  ;;  %v3062_v41 = vpop.permute.xlu0 %3061 }
 0x317   :  { %v2690_v54 = vrot.slane %v7266_v0, 4  ;;  %v7290_v51 = vmul.f32 0.08638146, %v2576_v20  ;;  %v7292_v28 = vmul.f32 0.08990675, %v2576_v20  ;;  %v2717_v18 = vrot.slane %v7271_v23, 5 }
 0x318   :  { %v7295_v60 = vmul.f32 0.08638146, %v2575_v36  ;;  %v7297_v22 = vmul.f32 0.08990675, %v2575_v36  ;;  %vm9231_vm5 = vcmask 1006592  }
 0x319   :  { %v3075_v19 = vsel %vm9231_vm5, %v3060_v61, %v3062_v41  ;;  %3073 = vrot.lane.b32.xlu1 %v3050_v5, %s3717_s5  ;;  %v8371_v47 = vrot.slane %v7290_v51, 1  ;;  %v8372_v58 = vrot.slane %v7292_v28, 2  ;;  %v7303_v45 = vmul.f32 0.09264482, %v2575_v36  ;;  %v2554_v61 = vpop.permute.xlu1 %2553  ;;  %vm9234_vm4 = vmmov %vm9231_vm5 }
 0x31a   :  { %v7305_v12 = vmul.f32 0.09264482, %v2576_v20  ;;  %3071 = vrot.lane.b32.xlu0 %v3049_v52, %s3717_s5  ;;  %v7310_v13 = vmul.f32 0.094516374, %v2575_v36  ;;  %v7312_v50 = vmul.f32 0.094516374, %v2576_v20  ;;  %v3066_v26 = vpop.permute.xlu0 %3065  ;;  %vm9235_vm8 = vmmov %vm9234_vm4 }
 0x31b   :  { %v2602_v59 = vsel %vm516_vm10, %v2600_v44, %v8371_v47  ;;  %v2632_v57 = vsel %vm547_vm11, %v2630_v56, %v8372_v58  ;;  %v8373_v32 = vrot.slane %v7303_v45, 3  ;;  %v9232_v7 = vrot.slane %v7295_v60, 1 }
 0x31c   :  { %v8375_v34 = vrot.slane %v7305_v12, 3  ;;  %v2612_v63 = vadd.f32 %v2602_v59, %v2582_v40  ;;  %v9233_v15 = vrot.slane %v7297_v22, 2  ;;  %v8374_v44 = vrot.slane %v7310_v13, 4 }
 0x31d   :  { %v2599_v4 = vsel %vm516_vm10, %v2597_v27, %v9232_v7  ;;  %3109 = vrot.lane.b32.xlu1 %v3050_v5, %s3718_s6  ;;  %v2659_v56 = vsel %vm578_vm12, %v2657_v35, %v8373_v32  ;;  %v8378_v27 = vrot.slane %v7312_v50, 4  ;;  %v7341_v40 = vmul.f32 0.09546628, %v2575_v36  ;;  %v3068_v5 = vpop.permute.xlu1 %3067 }
 0x31e   :  { %v2629_v14 = vsel %vm547_vm11, %v2627_v31, %v9233_v15  ;;  %v2611_v47 = vadd.f32 %v2599_v4, %v2581_v62  ;;  %v2662_v58 = vsel %vm578_vm12, %v2660_v43, %v8375_v34  ;;  %3107 = vrot.lane.b32.xlu0 %v3049_v52, %s3718_s6  ;;  %v2642_v59 = vadd.f32 %v2632_v57, %v2612_v63  ;;  %v2556_v52 = vpop.permute.xlu0 %2555 }
 0x31f   :  { %v2689_v15 = vsel %vm609_vm13, %v2687_v49, %v8374_v44  ;;  %v7343_v4 = vmul.f32 0.09546628, %v2576_v20  ;;  %v2720_v62 = vrot.slane %v7283_v17, 5  ;;  %v2738_v31 = vrot.slane %v7283_v17, 6 }
 0x320   :  { %v2641_v35 = vadd.f32 %v2629_v14, %v2611_v47  ;;  %v2692_v43 = vsel %vm609_vm13, %v2690_v54, %v8378_v27  ;;  %v2584_v63 = vmul.f32 0.08216859, %v2576_v20  ;;  %v2672_v57 = vadd.f32 %v2662_v58, %v2642_v59 }
 0x321   :  { %v8376_v7 = vrot.slane %v7341_v40, 5  ;;  %v8377_v49 = vrot.slane %v7343_v4, 5  ;;  %3145 = vrot.lane.b32.xlu1 %v7221_v10, %s3719_s7  ;;  %v2583_v32 = vmul.f32 0.08216859, %v2575_v36  ;;  %v7355_v34 = vadd.f32 %v3075_v19, %v7141_v48  ;;  %v3096_v36 = vpop.permute.xlu1 %3095 }
 0x322   :  { %v2671_v44 = vadd.f32 %v2659_v56, %v2641_v35  ;;  %v3088_v14 = vadd.f32 %v3062_v41, %v7136_v33  ;;  %3143 = vrot.lane.b32.xlu0 %v7230_v21, %s3719_s7  ;;  %v2702_v17 = vadd.f32 %v2692_v43, %v2672_v57  ;;  %v3076_v10 = vsel %vm9234_vm4, %v3064_v29, %v3066_v26  ;;  %v3070_v21 = vpop.permute.xlu0 %3069 }
 0x323   :  { %v2719_v20 = vsel %vm640_vm14, %v2717_v18, %v8376_v7  ;;  %v2722_v54 = vsel %vm640_vm14, %v2720_v62, %v8377_v49  ;;  %v3089_v48 = vadd.f32 %v3076_v10, %v7167_v53  ;;  %v3090_v33 = vadd.f32 %v3066_v26, %v7160_v16 }
 0x324   :  { %v2701_v47 = vadd.f32 %v2689_v15, %v2671_v44  ;;  %v2563_v41 = vsel %vm479_vm9, %v2554_v61, %v2556_v52  ;;  %v2578_v18 = vadd.f32 %v2556_v52, %v7186_v46  ;;  %v3077_v58 = vsel %vm9235_vm8, %v3068_v5, %v3070_v21 }
 0x325   :  { %v7371_v19 = vadd.f32 %v2563_v41, %v7194_v2  ;;  %v3092_v56 = vadd.f32 %v3070_v21, %v7278_v1  ;;  %3181 = vrot.lane.b32.xlu1 %v7065_v9, %s3720_s8  ;;  %v3091_v53 = vadd.f32 %v3077_v58, %v7286_v24  ;;  %v2732_v16 = vadd.f32 %v2722_v54, %v2702_v17  ;;  %v3100_v61 = vpop.permute.xlu1 %3099 }
 0x326   :  { %3179 = vrot.lane.b32.xlu0 %v7088_v11, %s3720_s8  ;;  %v2739_v2 = vrot.slane %v7343_v4, 6  ;;  %v7386_v46 = vmul.f32 0.08638146, %v2578_v18  ;;  %v7391_v9 = vadd.f32 %v2719_v20, %v2701_v47  ;;  %v7393_v44 = vmul.f32 0.08990675, %v2578_v18  ;;  %v3098_v59 = vpop.permute.xlu0 %3097  ;;  %s3724_s8 = smov [#allocation3]  }
 0x327   :  { %v7384_v26 = vmul.f32 0.08638146, %v7371_v19  ;;  %v7389_v1 = vmul.f32 0.08990675, %v7371_v19  ;;  %v7396_v24 = vmul.f32 0.094516374, %v7371_v19 }
 0x328   :  { %v2680_v11 = vmul.f32 0.094516374, %v2578_v18  ;;  %v2740_v15 = vsel %vm659_vm15, %v2738_v31, %v2739_v2  ;;  %v2605_v62 = vrot.slane %v7386_v46, 1  ;;  %v7403_v43 = vmul.f32 0.09546628, %v7371_v19 }
 0x329   :  { %v2603_v5 = vrot.slane %v7384_v26, 1  ;;  %v2633_v35 = vrot.slane %v7389_v1, 2  ;;  %3217 = vrot.lane.b32.xlu1 %v7062_v8, %s3721_s9  ;;  %v2804_v52 = vrot.slane %v7290_v51, 2  ;;  %v2635_v57 = vrot.slane %v7393_v44, 2  ;;  %v3104_v58 = vpop.permute.xlu1 %3103 }
 0x32a   :  { %v2710_v17 = vmul.f32 0.09546628, %v2578_v18  ;;  %3215 = vrot.lane.b32.xlu0 %v7085_v38, %s3721_s9  ;;  %v2757_v31 = vrot.slane %v7312_v50, 7  ;;  %v9236_v20 = vrot.slane %v7295_v60, 1  ;;  %v9237_v10 = vrot.slane %v7290_v51, 1  ;;  %v3102_v39 = vpop.permute.xlu0 %3101  ;;  %s3639_s9 = sshll.u32 %s3724_s8, 4  ;;  %s3640_s9 = int_to_ptr.vmem [resolvable:$true] %s3639_s9 }
 0x32b   :  { %v9238_v8 = vrot.slane %v7297_v22, 2  ;;  %v2695_v21 = vrot.slane %v2680_v11, 4  ;;  %v9239_v38 = vrot.slane %v7292_v28, 2  ;;  %v2723_v51 = vrot.slane %v7403_v43, 5  ;;  %s3693_s16 = scalar_lea.vmem %s3640_s9, 32  ;;  %p3694_p1 = scmp.lt.s32.totalorder %s3640_s9, %s3640_s9 }
 0x32c   :  { %v2604_v54 = vsel %vm516_vm10, %v9236_v20, %v2603_v5  ;;  %v2606_v47 = vsel %vm516_vm10, %v9237_v10, %v2605_v62  ;;  %v2725_v27 = vrot.slane %v2710_v17, 5  ;;  %v2693_v5 = vrot.slane %v7396_v24, 4  ;;  %v9240_v10 = vld [vmem:[#allocation162_spill] sm:$0xff] }
 0x32d   :  { %v2634_v41 = vsel %vm547_vm11, %v9238_v8, %v2633_v35  ;;  %v2613_v7 = vadd.f32 %v2604_v54, %v2583_v32  ;;  %v2614_v29 = vadd.f32 %v2606_v47, %v2584_v63  ;;  %v2636_v49 = vsel %vm547_vm11, %v9239_v38, %v2635_v57  ;;  %3253 = vrot.lane.b32.xlu1 %v9240_v10, %s3722_s10  ;;  %v9242_v54 = vld [vmem:[#allocation148_spill] sm:$0xff] }
 0x32e   :  { %v2743_v20 = vrot.slane %v2710_v17, 6  ;;  %v2761_v62 = vrot.slane %v2680_v11, 7  ;;  %vm9241_vm5 = vcmask 998400   ;;  %v7429_v63 = vadd.f32 %v3098_v59, %v3088_v14  ;;  %3251 = vrot.lane.b32.xlu0 %v9242_v54, %s3722_s10  ;;  %v3132_v17 = vpop.permute.xlu1 %3131  ;;  %v3106_v10 = vpop.permute.xlu0 %3105  ;;  %s3689_s10 = scalar_lea.vmem %s3640_s9, 16 }
 0x32f   :  { %v2643_v35 = vadd.f32 %v2634_v41, %v2613_v7  ;;  %v2644_v8 = vadd.f32 %v2636_v49, %v2614_v29  ;;  %v3111_v32 = vsel %vm9241_vm5, %v3096_v36, %v3098_v59  ;;  %vm9243_vm4 = vmmov %vm9241_vm5  ;;  %v7435_v38 = vadd.f32 %v3102_v39, %v3090_v33  ;;  %p3690_p0 = scmp.ne.s32.totalorder %s3640_s9, %s3689_s10  ;;  %p3695_p2 = scmp.lt.s32.totalorder %s3693_s16, %s3689_s10 }
 0x330   :  { %v3123_v57 = vadd.f32 %v3111_v32, %v7355_v34  ;;  %v3112_v47 = vsel %vm9243_vm4, %v3100_v61, %v3102_v39  ;;  %v7437_v11 = vmul.f32 0.09264482, %v2578_v18  ;;  %v9244_v7 = vrot.slane %v7312_v50, 4  ;;  %vm9246_vm8 = vmmov %vm9243_vm4 }
 0x331   :  { %v3125_v25 = vadd.f32 %v3112_v47, %v3089_v48  ;;  %v9245_v14 = vrot.slane %v7343_v4, 5  ;;  %v2744_v29 = vsel %vm659_vm15, %v2739_v2, %v2743_v20  ;;  %v3113_v34 = vsel %vm9246_vm8, %v3104_v58, %v3106_v10  ;;  %p3696_p3 = por %p3695_p2, %p3694_p1 }
 0x332   :  { %v2696_v49 = vsel %vm609_vm13, %v9244_v7, %v2695_v21  ;;  %v3128_v61 = vadd.f32 %v3106_v10, %v3092_v56  ;;  %v2665_v39 = vrot.slane %v7437_v11, 3  ;;  %v2750_v33 = vadd.f32 %v2740_v15, %v2732_v16  ;;  %v3136_v4 = vpop.permute.xlu1 %3135 }
 0x333   :  { %v2726_v36 = vsel %vm640_vm14, %v9245_v14, %v2725_v27  ;;  %v3127_v18 = vadd.f32 %v3113_v34, %v3091_v53  ;;  %v9247_v48 = vrot.slane %v7266_v0, 7  ;;  %vm9248_vm5 = vcmask 1040384   ;;  %v7460_v53 = vpop.permute.xlu0 %3133  ;;  %p3697_p4 = pnand %p3696_p3, %p3690_p0 }
 0x334   :  { %vm9249_vm4 = vmmov %vm9248_vm5  ;;  %v8383_v41 = vrot.slane %v7393_v44, 1  ;;  %v9250_v27 = vrot.slane %v7305_v12, 3  ;;  %v8382_v56 = vrot.slane %v7386_v46, 2  ;;  %v7458_v58 = vmul.f32 0.09264482, %v7371_v19 }
 0x335   :  { %v2758_v59 = vsel %vm9248_vm5, %v9247_v48, %v2757_v31  ;;  %v2762_v50 = vsel %vm9249_vm4, %v2757_v31, %v2761_v62  ;;  %v9251_v16 = vrot.slane %v7292_v28, 1  ;;  %v9252_v31 = vrot.slane %v7310_v13, 4  ;;  %vm9255_vm8 = vmmov %vm9249_vm4 }
 0x336   :  { %v2666_v2 = vsel %vm578_vm12, %v9250_v27, %v2665_v39  ;;  %v2768_v21 = vadd.f32 %v2758_v59, %v2750_v33  ;;  %v9253_v62 = vrot.slane %v7341_v40, 5  ;;  %v2753_v19 = vrot.slane %v7263_v42, 7  ;;  %v7484_v42 = vpop.permute.xlu1 %2327  ;;  %vm9256_vm5 = vmmov %vm9249_vm4 }
 0x337   :  { %v2674_v0 = vadd.f32 %v2666_v2, %v2644_v8  ;;  %v2784_v15 = vsel %vm516_vm10, %v9251_v16, %v8383_v41  ;;  %v2694_v20 = vsel %vm609_vm13, %v9252_v31, %v2693_v5  ;;  %v3147_v54 = vsel %vm368_vm6, %v3132_v17, %v7460_v53 }
 0x338   :  { %v2724_v32 = vsel %vm640_vm14, %v9253_v62, %v2723_v51  ;;  %v2772_v8 = vadd.f32 %v2768_v21, %v7305_v12  ;;  %v2806_v28 = vsel %vm547_vm11, %v2804_v52, %v8382_v56  ;;  %v3159_v47 = vadd.f32 %v3147_v54, %v3123_v57  ;;  %v7489_v52 = vpop.permute.xlu0 %3137  ;;  %v9322_v56 = vld [vmem:[#allocation98_spill] sm:$0xff] }
 0x339   :  { %v2704_v10 = vadd.f32 %v2696_v49, %v2674_v0  ;;  %v2663_v7 = vrot.slane %v7458_v58, 3  ;;  %v2736_v5 = vrot.slane %v7341_v40, 6  ;;  %v2735_v14 = vrot.slane %v7271_v23, 6 }
 0x33a   :  { %v2741_v51 = vrot.slane %v7403_v43, 6  ;;  %v2794_v34 = vadd.f32 %v2784_v15, %v2772_v8  ;;  %v2754_v17 = vrot.slane %v7310_v13, 7  ;;  %v2779_v12 = vrot.slane %v7297_v22, 1  ;;  %v3142_v27 = vpop.permute.xlu1 %3141 }
 0x33b   :  { %v2759_v39 = vrot.slane %v7396_v24, 7  ;;  %v2734_v57 = vadd.f32 %v2726_v36, %v2704_v10  ;;  %v9254_v49 = vrot.slane %v7303_v45, 3  ;;  %v3148_v23 = vsel %vm368_vm6, %v3136_v4, %v7489_v52 }
 0x33c   :  { %v7496_v43 = vadd.f32 %v2806_v28, %v2794_v34  ;;  %v8381_v33 = vrot.slane %v7389_v1, 1  ;;  %v8380_v13 = vrot.slane %v7384_v26, 2  ;;  %v7500_v48 = vadd.f32 %v3148_v23, %v3125_v25  ;;  %v3140_v16 = vpop.permute.xlu0 %3139 }
 0x33d   :  { %v2664_v40 = vsel %vm578_vm12, %v9254_v49, %v2663_v7  ;;  %v2752_v22 = vadd.f32 %v2744_v29, %v2734_v57  ;;  %v2737_v59 = vsel %vm659_vm15, %v2735_v14, %v2736_v5  ;;  %v2801_v36 = vrot.slane %v7295_v60, 2  ;;  %v9260_v7 = vld [vmem:[#allocation140_spill] sm:$0xff]  ;;  %v9262_v14 = vld [vmem:[#allocation142_spill] sm:$0xff] }
 0x33e   :  { %v2673_v24 = vadd.f32 %v2664_v40, %v2643_v35  ;;  %v2742_v2 = vsel %vm659_vm15, %v2736_v5, %v2741_v51  ;;  %v2749_v21 = vadd.f32 %v2737_v59, %v7391_v9  ;;  %v2755_v4 = vsel %vm9255_vm8, %v2753_v19, %v2754_v17  ;;  %v9258_v19 = vld [vmem:[#allocation16_spill] sm:$0xff]  ;;  %v7526_v28 = vpop.permute.xlu1 %3169  ;;  %vm9288_vm8 = vmmov %vm9256_vm5 }
 0x33f   :  { %v7507_v0 = vadd.f32 %v3142_v27, %v3128_v61  ;;  %v2770_v15 = vadd.f32 %v2762_v50, %v2752_v22  ;;  %v2760_v25 = vsel %vm9256_vm5, %v2754_v17, %v2759_v39  ;;  %v2042_v35 = vrot.slane %v6878_v3, 6  ;;  %v9263_v39 = vld [vmem:[#allocation228_spill] sm:$0xff] }
 0x340   :  { %v2703_v31 = vadd.f32 %v2694_v20, %v2673_v24  ;;  %v3149_v29 = vsel %vm368_vm6, %v3140_v16, %v3142_v27  ;;  %v2767_v62 = vadd.f32 %v2755_v4, %v2749_v21  ;;  %v2781_v60 = vsel %vm516_vm10, %v2779_v12, %v8381_v33  ;;  %v9257_v20 = vld [vmem:[#allocation79_spill] sm:$0xff]  ;;  %v3168_v34 = vpop.permute.xlu0 %3167  ;;  %v9264_v57 = vld [vmem:[#allocation28_spill] sm:$0xff]  ;;  %v9270_v16 = vld [vmem:[#allocation94_spill] sm:$0xff] }
 0x341   :  { %v7515_v54 = vadd.f32 %v3149_v29, %v3127_v18  ;;  %v7518_v9 = vadd.f32 %v2770_v15, %v7437_v11  ;;  %v2803_v50 = vsel %vm547_vm11, %v2801_v36, %v8380_v13  ;;  %v2176_v8 = vsel %vm82_vm0, %v9258_v19, %v9257_v20  ;;  %v9265_v40 = vld [vmem:[#allocation152_spill] sm:$0xff]  ;;  %v9266_v36 = vld [vmem:[#allocation198_spill] sm:$0xff]  ;;  %v9271_v15 = vld [vmem:[#allocation95_spill] sm:$0xff] }
 0x342   :  { %v2733_v61 = vadd.f32 %v2724_v32, %v2703_v31  ;;  %v2771_v10 = vadd.f32 %v2767_v62, %v7303_v45  ;;  %vm8384_vm4 = vcmask 572416   ;;  %v9259_v18 = vrot.slane %v7210_v55, 3  ;;  %v9267_v27 = vld [vmem:[#allocation220_spill] sm:$0xff]  ;;  %v7562_v29 = vpop.permute.xlu1 %3173 }
 0x343   :  { %v9261_v5 = vrot.slane %v9260_v7, 3  ;;  %v2037_v32 = vadd.f32 %v6966_v37, %v6959_v30  ;;  %v2192_v51 = vadd.f32 %v9257_v20, %v9262_v14  ;;  %v8379_v12 = vmov 0.0  }
 0x344   :  { %v2751_v17 = vadd.f32 %v2742_v2, %v2733_v61  ;;  %21 = vst.msk [vmem:[#allocation2 + $0x8] sm:$0xff] %vm8384_vm4, %v8379_v12  ;;  %23 = vst.msk [vmem:[#allocation2 + $0x18] sm:$0xff] %vm8384_vm4, %v8379_v12  ;;  %v2228_v49 = vsel %vm135_vm1, %v9264_v57, %v9263_v39  ;;  %v3183_v30 = vsel %vm405_vm7, %v3168_v34, %v7526_v28  ;;  %v7568_v20 = vpop.permute.xlu0 %3171  ;;  %v9278_v34 = vld [vmem:[#allocation114_spill] sm:$0xff]  ;;  %vm9292_vm5 = vcmask 1006592  }
 0x345   :  { %v1970_v11 = vsel %vm578_vm12, %v9261_v5, %v9259_v18  ;;  %v2793_v37 = vadd.f32 %v2781_v60, %v2771_v10  ;;  %v2191_v23 = vadd.f32 %v2176_v8, %v9265_v40  ;;  %v2244_v22 = vadd.f32 %v9263_v39, %v2192_v51  ;;  %v9273_v8 = vld [vmem:[#allocation190_spill] sm:$0xff]  ;;  %v9274_v10 = vld [vmem:[#allocation196_spill] sm:$0xff]  ;;  %v9275_v5 = vld [vmem:[#allocation163_spill] sm:$0xff] }
 0x346   :  { %v1979_v45 = vadd.f32 %v1970_v11, %v7029_v6  ;;  %v7550_v24 = vadd.f32 %v3183_v30, %v3159_v47  ;;  %v2769_v59 = vadd.f32 %v2760_v25, %v2751_v17  ;;  %v2010_v2 = vadd.f32 %v9267_v27, %v9266_v36  ;;  %v9268_v6 = vld [vmem:[#allocation143_spill] sm:$0xff]  ;;  %v9272_v47 = vld [vmem:[#allocation216_spill] sm:$0xff]  ;;  %v9279_v39 = vld [vmem:[#allocation150_spill] sm:$0xff] }
 0x347   :  { %v9269_v21 = vrot.slane %v9268_v6, 6  ;;  %v2280_v31 = vsel %vm188_vm2, %v9271_v15, %v9270_v16  ;;  %v7564_v62 = vadd.f32 %v2803_v50, %v2793_v37  ;;  %v2060_v60 = vrot.slane %v9272_v47, 7  ;;  %v9280_v37 = vld [vmem:[#allocation156_spill] sm:$0xff]  ;;  %v9283_v36 = vld [vmem:[#allocation161_spill] sm:$0xff]  ;;  %v9285_v6 = vld [vmem:[#allocation154_spill] sm:$0xff] }
 0x348   :  { %v2243_v25 = vadd.f32 %v2228_v49, %v2191_v23  ;;  %v2296_v61 = vadd.f32 %v9270_v16, %v2244_v22  ;;  %v7571_v19 = vadd.f32 %v2769_v59, %v7458_v58  ;;  %v2074_v18 = vadd.f32 %v9274_v10, %v9273_v8  ;;  %v9281_v23 = vld [vmem:[#allocation221_spill] sm:$0xff]  ;;  %v9286_v15 = vld [vmem:[#allocation158_spill] sm:$0xff] }
 0x349   :  { %v2043_v4 = vsel %vm659_vm15, %v9269_v21, %v2042_v35  ;;  %v9276_v11 = vrot.slane %v9275_v5, 4  ;;  %v9277_v14 = vrot.slane %v9272_v47, 4  ;;  %v2332_v17 = vsel %vm241_vm3, %v9278_v34, %v7484_v42 }
 0x34a   :  { %v2055_v51 = vadd.f32 %v2043_v4, %v2037_v32  ;;  %v2110_v57 = vrot.slane %v9279_v39, 2  ;;  %v2295_v30 = vadd.f32 %v2280_v31, %v2243_v25  ;;  %v2348_v58 = vadd.f32 %v7484_v42, %v2296_v61  ;;  %v2380_v4 = vpop.permute.xlu1 %2379  ;;  %v2378_v25 = vpop.permute.xlu0 %2377  ;;  %v9289_v61 = vld [vmem:[#allocation139_spill] sm:$0xff] }
 0x34b   :  { %v2000_v50 = vsel %vm609_vm13, %v9277_v14, %v9276_v11  ;;  %v2049_v40 = vrot.slane %v9280_v37, 6  ;;  %v2047_v22 = vrot.slane %v9281_v23, 6  ;;  %v9282_v59 = vrot.slane %v9280_v37, 5 }
 0x34c   :  { %v2009_v49 = vadd.f32 %v2000_v50, %v1979_v45  ;;  %v9284_v27 = vrot.slane %v9283_v36, 5  ;;  %v2089_v21 = vrot.slane %v9285_v6, 1  ;;  %v9287_v47 = vrot.slane %v9286_v15, 7  ;;  %v9299_v15 = vld [vmem:[#allocation153_spill] sm:$0xff]  ;;  %v9331_v6 = vld [vmem:[#allocation100_spill] sm:$0xff] }
 0x34d   :  { %v2347_v31 = vadd.f32 %v2332_v17, %v2295_v30  ;;  %v7596_v42 = vadd.f32 %v2380_v4, %v2348_v58  ;;  %v2078_v8 = vadd.f32 %v2074_v18, %v9289_v61  ;;  %v9290_v10 = vrot.slane %v9281_v23, 5 }
 0x34e   :  { %v2032_v32 = vsel %vm640_vm14, %v9284_v27, %v9282_v59  ;;  %v2061_v45 = vsel %vm9288_vm8, %v9287_v47, %v2060_v60  ;;  %v9291_v11 = vrot.slane %v6878_v3, 5  ;;  %v2384_v34 = vsel %vm9292_vm5, %v2378_v25, %v2380_v4  ;;  %v9294_v59 = vld [vmem:[#allocation58_spill] sm:$0xff]  ;;  %v9295_v27 = vld [vmem:[#allocation59_spill] sm:$0xff]  ;;  %v7621_v47 = vpop.permute.xlu1 %3177  ;;  %v9300_v25 = vld [vmem:[#allocation137_spill] sm:$0xff]  ;;  %v3176_v61 = vpop.permute.xlu0 %3175 }
 0x34f   :  { %v2040_v16 = vadd.f32 %v2032_v32, %v2010_v2  ;;  %v2073_v50 = vadd.f32 %v2061_v45, %v2055_v51  ;;  %v9293_v2 = vld [vmem:[#allocation149_spill] sm:$0xff]  ;;  %v1870_v17 = vsel %vm479_vm9, %v9295_v27, %v9294_v59  ;;  %v7609_v30 = vadd.f32 %v2384_v34, %v2347_v31  ;;  %v9303_v27 = vld [vmem:[#allocation144_spill] sm:$0xff]  ;;  %vm9313_vm5 = vmmov %vm9288_vm8 }
 0x350   :  { %v2030_v14 = vsel %vm640_vm14, %v9291_v11, %v9290_v10  ;;  %v2067_v39 = vrot.slane %v9293_v2, 7  ;;  %v2065_v18 = vrot.slane %v9275_v5, 7  ;;  %v9296_v58 = vrot.slane %v9283_v36, 6  ;;  %v9297_v51 = vld [vmem:[#allocation145_spill] sm:$0xff]  ;;  %v9301_v36 = vld [vmem:[#allocation155_spill] sm:$0xff] }
 0x351   :  { %v2039_v37 = vadd.f32 %v2030_v14, %v2009_v49  ;;  %v9298_v32 = vrot.slane %v9297_v51, 1  ;;  %v2111_v49 = vrot.slane %v9299_v15, 2  ;;  %v1886_v31 = vadd.f32 %v9294_v59, %v9300_v25  ;;  %v9302_v14 = vld [vmem:[#allocation133_spill] sm:$0xff] }
 0x352   :  { %v2050_v23 = vsel %vm659_vm15, %v9296_v58, %v2049_v40  ;;  %v2048_v5 = vsel %vm659_vm15, %v2042_v35, %v2047_v22  ;;  %v2086_v40 = vrot.slane %v9301_v36, 1  ;;  %v2077_v11 = vadd.f32 %v2073_v50, %v9260_v7  ;;  %v9304_v58 = vld [vmem:[#allocation212_spill] sm:$0xff]  ;;  %v9305_v35 = vld [vmem:[#allocation123_spill] sm:$0xff]  ;;  %v9306_v22 = vld [vmem:[#allocation102_spill] sm:$0xff]  ;;  %v7650_v36 = vpop.permute.xlu1 %3205 }
 0x353   :  { %v2090_v4 = vsel %vm516_vm10, %v9298_v32, %v2089_v21  ;;  %v2058_v45 = vadd.f32 %v2050_v23, %v2040_v16  ;;  %v1885_v34 = vadd.f32 %v1870_v17, %v9302_v14  ;;  %v3185_v2 = vsel %vm405_vm7, %v3176_v61, %v7621_v47  ;;  %v9307_v32 = vld [vmem:[#allocation103_spill] sm:$0xff] }
 0x354   :  { %v2100_v10 = vadd.f32 %v2090_v4, %v2078_v8  ;;  %v1387_v16 = vmul.f32 0.08990675, %v9303_v27  ;;  %v2085_v23 = vrot.slane %v9304_v58, 1  ;;  %v2057_v59 = vadd.f32 %v2048_v5, %v2039_v37  ;;  %v9308_v8 = vld [vmem:[#allocation134_spill] sm:$0xff]  ;;  %v9310_v7 = vld [vmem:[#allocation151_spill] sm:$0xff] }
 0x355   :  { %v7636_v3 = vadd.f32 %v3185_v2, %v7515_v54  ;;  %v1381_v51 = vadd.f32 %v9306_v22, %v9305_v35  ;;  %v7642_v4 = vadd.f32 %v9308_v8, %v9307_v32  ;;  %v9311_v50 = vrot.slane %v9310_v7, 7  ;;  %v9312_v61 = vld [vmem:[#allocation159_spill] sm:$0xff]  ;;  %v7654_v2 = vpop.permute.xlu0 %3203  ;;  %v9315_v8 = vld [vmem:[#allocation136_spill] sm:$0xff] }
 0x356   :  { %v2112_v25 = vsel %vm547_vm11, %v2110_v57, %v2111_v49  ;;  %v2082_v54 = vmul.f32 0.08990675, %v1886_v31  ;;  %v2087_v5 = vsel %vm516_vm10, %v2085_v23, %v2086_v40  ;;  %v2108_v14 = vrot.slane %v9312_v61, 2  ;;  %v7664_v33 = vpop.permute.xlu1 %3209 }
 0x357   :  { %9309 = vst [vmem:[#allocation157_spill] sm:$0xff] %v7642_v4  ;;  %v2068_v17 = vsel %vm9288_vm8, %v9311_v50, %v2067_v39  ;;  %v2122_v58 = vadd.f32 %v2112_v25, %v2100_v10  ;;  %v2066_v35 = vsel %vm9313_vm5, %v2060_v60, %v2065_v18  ;;  %v2099_v22 = vadd.f32 %v2087_v5, %v2077_v11  ;;  %v9314_v39 = vld [vmem:[#allocation99_spill] sm:$0xff]  ;;  %v9318_v10 = vld [vmem:[#allocation122_spill] sm:$0xff]  ;;  %v9319_v18 = vld [vmem:[#allocation192_spill] sm:$0xff] }
 0x358   :  { %v2076_v37 = vadd.f32 %v2068_v17, %v2058_v45  ;;  %v2081_v32 = vmul.f32 0.08990675, %v1885_v34  ;;  %v1408_v7 = vadd.f32 %v9315_v8, %v9314_v39  ;;  %v1409_v57 = vmul.f32 0.08638146, %v9303_v27  ;;  %v9316_v50 = vld [vmem:[#allocation235_spill] sm:$0xff] }
 0x359   :  { %v2107_v12 = vrot.slane %v9316_v50, 2  ;;  %v2075_v45 = vadd.f32 %v2066_v35, %v2057_v59  ;;  %v9317_v17 = vld [vmem:[#allocation115_spill] sm:$0xff]  ;;  %v3517_v23 = vmul.f32 %v7642_v4, %v7642_v4  ;;  %v1397_v61 = vrot.slane %v1387_v16, 1  ;;  %v7670_v39 = vpop.permute.xlu0 %3207  ;;  %v9320_v59 = vld [vmem:[#allocation72_spill] sm:$0xff] }
 0x35a   :  { %v1385_v13 = vadd.f32 %v1381_v51, %v9317_v17  ;;  %v3530_v60 = vsub.f32 %v7496_v43, %v9318_v10  ;;  %v2080_v11 = vadd.f32 %v2076_v37, %v9319_v18  ;;  %v2093_v25 = vrot.slane %v2082_v54, 1  ;;  %v9321_v17 = vld [vmem:[#allocation75_spill] sm:$0xff]  ;;  %v9324_v37 = vld [vmem:[#allocation112_spill] sm:$0xff] }
 0x35b   :  { %v2104_v5 = vmul.f32 0.08638146, %v1886_v31  ;;  %v2109_v27 = vsel %vm547_vm11, %v2107_v12, %v2108_v14  ;;  %v3526_v35 = vsub.f32 %v2122_v58, %v9320_v59  ;;  %v2091_v8 = vrot.slane %v2081_v32, 1  ;;  %v7684_v58 = vpop.permute.xlu1 %2415 }
 0x35c   :  { %v2121_v51 = vadd.f32 %v2109_v27, %v2099_v22  ;;  %v2103_v50 = vmul.f32 0.08638146, %v1885_v34  ;;  %v3513_v16 = vmul.f32 %v9321_v17, %v9321_v17  ;;  %v7676_v41 = vadd.f32 %v9322_v56, %v1408_v7 }
 0x35d   :  { %v3558_v43 = vadd.f32 %v9318_v10, %v9320_v59  ;;  %v2079_v31 = vadd.f32 %v2075_v45, %v7210_v55  ;;  %v9325_v12 = vrot.slane %v9324_v37, 1  ;;  %v1419_v18 = vrot.slane %v1409_v57, 2  ;;  %v2414_v27 = vpop.permute.xlu0 %2413  ;;  %v9326_v10 = vld [vmem:[#allocation66_spill] sm:$0xff] }
 0x35e   :  { %9323 = vst [vmem:[#allocation164_spill] sm:$0xff] %v7676_v41  ;;  %v3566_v22 = vadd.f32 %v3530_v60, %v3526_v35  ;;  %v3529_v34 = vsub.f32 %v7564_v62, %v3517_v23  ;;  %v2094_v56 = vsel %vm516_vm10, %v2089_v21, %v2093_v25  ;;  %v2115_v7 = vrot.slane %v2104_v5, 2  ;;  %v9327_v59 = vld [vmem:[#allocation126_spill] sm:$0xff]  ;;  %v9329_v60 = vld [vmem:[#allocation69_spill] sm:$0xff] }
 0x35f   :  { %v1398_v54 = vsel %vm516_vm10, %v9325_v12, %v1397_v61  ;;  %v7692_v55 = vmul.f32 %v9327_v59, %v9326_v10  ;;  %v2102_v45 = vadd.f32 %v2094_v56, %v2080_v11  ;;  %v2092_v61 = vsel %vm516_vm10, %v2086_v40, %v2091_v8  ;;  %v9328_v12 = vld [vmem:[#allocation231_spill] sm:$0xff]  ;;  %v2866_v5 = vpop.permute.xlu1 %2865  ;;  %v9333_v56 = vld [vmem:[#allocation73_spill] sm:$0xff] }
 0x360   :  { %v1407_v32 = vadd.f32 %v1398_v54, %v1385_v13  ;;  %v2113_v57 = vrot.slane %v2103_v50, 2  ;;  %v3525_v37 = vsub.f32 %v2121_v51, %v3513_v16  ;;  %v7697_v35 = vadd.f32 %v9329_v60, %v9328_v12 }
 0x361   :  { %v2101_v13 = vadd.f32 %v2092_v61, %v2079_v31  ;;  %v7701_v62 = vmul.f32 %v7676_v41, %v7676_v41  ;;  %v9332_v21 = vrot.slane %v9331_v6, 2  ;;  %v3570_v54 = vadd.f32 0.0009, %v3566_v22  ;;  %v2864_v31 = vpop.permute.xlu0 %2863  ;;  %v9340_v6 = vld [vmem:[#allocation147_spill] sm:$0xff] }
 0x362   :  { %9330 = vst [vmem:[#allocation204_spill] sm:$0xff] %v7697_v35  ;;  %v3565_v11 = vadd.f32 %v3529_v34, %v3525_v37  ;;  %v7708_v40 = vmul.f32 %v9333_v56, %v9333_v56  ;;  %v3557_v8 = vadd.f32 %v3517_v23, %v3513_v16  ;;  %v2116_v50 = vsel %vm547_vm11, %v2111_v49, %v2115_v7 }
 0x363   :  { %v1420_v25 = vsel %vm547_vm11, %v9332_v21, %v1419_v18  ;;  %v3562_v10 = vadd.f32 0.0001, %v3558_v43  ;;  %v7715_v59 = vadd.f32 %v2116_v50, %v2102_v45  ;;  %v2114_v18 = vsel %vm547_vm11, %v2108_v14, %v2113_v57  ;;  %v3214_v49 = vpop.permute.xlu1 %3213 }
 0x364   :  { %v7710_v51 = vadd.f32 %v1420_v25, %v1407_v32  ;;  %v3538_v22 = vmul.f32 2.0, %v7692_v55  ;;  %v7719_v34 = vadd.f32 %v2114_v18, %v2101_v13  ;;  %v3160_v61 = vadd.f32 %v7460_v53, %v7429_v63  ;;  %v9339_v13 = vld [vmem:[#allocation146_spill] sm:$0xff] }
 0x365   :  { %v7725_v23 = vmul.f32 %v7697_v35, %v7697_v35  ;;  %v7729_v15 = vadd.f32 %v7701_v62, %v7708_v40  ;;  %v3574_v16 = vmul.f32 %v3570_v54, %v3562_v10  ;;  %v3569_v43 = vadd.f32 0.0009, %v3565_v11  ;;  %v3212_v53 = vpop.permute.xlu0 %3211 }
 0x366   :  { %9334 = vst [vmem:[#allocation202_spill] sm:$0xff] %v7710_v51  ;;  %9335 = vst [vmem:[#allocation165_spill] sm:$0xff] %v7719_v34  ;;  %v7733_v14 = vmul.f32 %v7710_v51, %v7710_v51  ;;  %v3561_v32 = vadd.f32 0.0001, %v3557_v8  ;;  %v3196_v7 = vadd.f32 %v7526_v28, %v3160_v61  ;;  %v3184_v63 = vsel %vm405_vm7, %v7568_v20, %v7562_v29 }
 0x367   :  { %9336 = vst [vmem:[#allocation166_spill] sm:$0xff] %v7725_v23  ;;  %9337 = vst [vmem:[#allocation167_spill] sm:$0xff] %v7729_v15  ;;  %v3162_v57 = vadd.f32 %v7489_v52, %v7435_v38  ;;  %vm9338_vm8 = vcmask 973824   ;;  %v7746_v12 = vadd.f32 0.0001, %v3538_v22  ;;  %v3197_v54 = vadd.f32 %v3184_v63, %v7500_v48  ;;  %v3242_v38 = vpop.permute.xlu1 %3241 }
 0x368   :  { %v3219_v37 = vsel %vm9338_vm8, %v7654_v2, %v7650_v36  ;;  %v3232_v60 = vadd.f32 %v7650_v36, %v3196_v7  ;;  %v2834_v20 = vmul.f32 0.08216859, %v9339_v13  ;;  %v2833_v21 = vmul.f32 0.08216859, %v9340_v6  ;;  %vm9342_vm5 = vmmov %vm9338_vm8 }
 0x369   :  { %v3198_v25 = vadd.f32 %v7562_v29, %v3162_v57  ;;  %3661 = vrcp.f32 %v3574_v16  ;;  %v7755_v52 = vmul.f32 %v3569_v43, %v3561_v32  ;;  %v3231_v2 = vadd.f32 %v3219_v37, %v7550_v24  ;;  %v3240_v50 = vpop.permute.xlu0 %3239  ;;  %vm9344_vm4 = vmmov %vm9342_vm5 }
 0x36a   :  { %v3220_v11 = vsel %vm9342_vm5, %v7670_v39, %v7664_v33  ;;  %vm9343_vm8 = vcmask 998400   ;;  %v3268_v8 = vadd.f32 %v3242_v38, %v3232_v60  ;;  %v3200_v29 = vadd.f32 %v7621_v47, %v7507_v0 }
 0x36b   :  { %9341 = vst [vmem:[#allocation168_spill] sm:$0xff] %v7755_v52  ;;  %v2420_v36 = vsel %vm9343_vm8, %v2414_v27, %v7684_v58  ;;  %v3234_v48 = vadd.f32 %v7664_v33, %v3198_v25  ;;  %v2870_v10 = vsel %vm82_vm0, %v2864_v31, %v2866_v5  ;;  %v3255_v18 = vsel %vm479_vm9, %v3240_v50, %v3242_v38  ;;  %v3246_v0 = vpop.permute.xlu1 %3245  ;;  %vm9355_vm0 = vmmov %vm9344_vm4 }
 0x36c   :  { %v3221_v24 = vsel %vm9344_vm4, %v3212_v53, %v3214_v49  ;;  %v3280_v22 = vmul.f32 0.08638146, %v3268_v8  ;;  %v3310_v61 = vmul.f32 0.08990675, %v3268_v8  ;;  %v3267_v16 = vadd.f32 %v3255_v18, %v3231_v2 }
 0x36d   :  { %v3233_v39 = vadd.f32 %v3220_v11, %v3197_v54  ;;  %v2436_v27 = vadd.f32 %v7684_v58, %v7596_v42  ;;  %v7772_v43 = vadd.f32 %v2420_v36, %v7609_v30  ;;  %v3340_v32 = vmul.f32 0.09264482, %v3268_v8  ;;  %v3244_v63 = vpop.permute.xlu0 %3243 }
 0x36e   :  { %v7774_v47 = vadd.f32 %v2866_v5, %v2834_v20  ;;  %v7776_v33 = vadd.f32 %v2870_v10, %v2833_v21  ;;  %v7778_v31 = vmul.f32 0.094516374, %v3268_v8  ;;  %v7780_v7 = vmul.f32 0.09546628, %v3268_v8 }
 0x36f   :  { %v7782_v53 = vadd.f32 %v3214_v49, %v3200_v29  ;;  %v7785_v57 = vadd.f32 %v3221_v24, %v7636_v3  ;;  %v3276_v42 = vmul.f32 0.08216859, %v3268_v8  ;;  %v3279_v58 = vmul.f32 0.08638146, %v3267_v16  ;;  %v2452_v25 = vpop.permute.xlu1 %2451 }
 0x370   :  { %v3294_v30 = vrot.slane %v3280_v22, 1  ;;  %v3324_v37 = vrot.slane %v3310_v61, 2  ;;  %v3309_v60 = vmul.f32 0.08990675, %v3267_v16  ;;  %v3339_v13 = vmul.f32 0.09264482, %v3267_v16 }
 0x371   :  { %v3354_v5 = vrot.slane %v3340_v32, 3  ;;  %v3275_v20 = vmul.f32 0.08216859, %v3267_v16  ;;  %v7787_v6 = vadd.f32 %v3246_v0, %v3234_v48  ;;  %v3256_v21 = vsel %vm479_vm9, %v3244_v63, %v3246_v0  ;;  %v2450_v2 = vpop.permute.xlu0 %2449 }
 0x372   :  { %v3384_v54 = vrot.slane %v7778_v31, 4  ;;  %v3414_v49 = vrot.slane %v7780_v7, 5  ;;  %v7792_v38 = vmul.f32 0.094516374, %v3267_v16  ;;  %v7794_v3 = vadd.f32 %v3256_v21, %v3233_v39 }
 0x373   :  { %v7796_v11 = vpop.eup %3661  ;;  %v3291_v50 = vrot.slane %v3279_v58, 1  ;;  %v7800_v29 = vmul.f32 0.09546628, %v3267_v16  ;;  %v3321_v48 = vrot.slane %v3309_v60, 2  ;;  %v3351_v10 = vrot.slane %v3339_v13, 3  ;;  %v2918_v16 = vpop.permute.xlu1 %2917 }
 0x374   :  { %9345 = vst [vmem:[#allocation169_spill] sm:$0xff] %v7792_v38  ;;  %9346 = vst [vmem:[#allocation170_spill] sm:$0xff] %v7796_v11  ;;  %v7803_v18 = vmul.f32 0.08638146, %v7787_v6  ;;  %v7806_v24 = vmul.f32 0.08990675, %v7787_v6  ;;  %v7817_v32 = vadd.f32 %v2452_v25, %v2436_v27 }
 0x375   :  { %v7809_v22 = vmul.f32 0.09264482, %v7787_v6  ;;  %v7812_v61 = vmul.f32 0.094516374, %v7787_v6  ;;  %v7815_v39 = vmul.f32 0.09546628, %v7787_v6  ;;  %v2916_v13 = vpop.permute.xlu0 %2915 }
 0x376   :  { %v3381_v0 = vrot.slane %v7792_v38, 4  ;;  %v8388_v63 = vrot.slane %v7803_v18, 1  ;;  %v8389_v58 = vrot.slane %v7806_v24, 2  ;;  %v7823_v60 = vmul.f32 0.08638146, %v7794_v3 }
 0x377   :  { %v7829_v27 = vmul.f32 0.08990675, %v7794_v3  ;;  %v7839_v35 = vmul.f32 0.09264482, %v7794_v3  ;;  %v9348_v28 = vrot.slane %v7809_v22, 3  ;;  %v9349_v41 = vrot.slane %v7812_v61, 4 }
 0x378   :  { %v3296_v8 = vsel %vm516_vm10, %v3294_v30, %v8388_v63  ;;  %v3326_v36 = vsel %vm547_vm11, %v3324_v37, %v8389_v58  ;;  %v8390_v51 = vrot.slane %v7823_v60, 1  ;;  %v9350_v30 = vrot.slane %v7815_v39, 5  ;;  %v3250_v37 = vpop.permute.xlu1 %3249 }
 0x379   :  { %9347 = vst [vmem:[#allocation171_spill] sm:$0xff] %v7829_v27  ;;  %v3306_v21 = vadd.f32 %v3296_v8, %v3276_v42  ;;  %v3356_v45 = vsel %vm578_vm12, %v3354_v5, %v9348_v28  ;;  %v3386_v56 = vsel %vm609_vm13, %v3384_v54, %v9349_v41  ;;  %v3322_v42 = vrot.slane %v7829_v27, 2  ;;  %v3248_v5 = vpop.permute.xlu0 %3247 }
 0x37a   :  { %v7850_v63 = vsel %vm640_vm14, %v3414_v49, %v9350_v30  ;;  %v3293_v58 = vsel %vm516_vm10, %v3291_v50, %v8390_v51  ;;  %v8394_v8 = vrot.slane %v7839_v35, 3  ;;  %v7858_v28 = vmul.f32 0.094516374, %v7794_v3 }
 0x37b   :  { %v3411_v41 = vrot.slane %v7800_v29, 5  ;;  %v3336_v54 = vadd.f32 %v3326_v36, %v3306_v21  ;;  %v3305_v15 = vadd.f32 %v3293_v58, %v3275_v20  ;;  %v7862_v49 = vmul.f32 0.09546628, %v7794_v3 }
 0x37c   :  { %v3323_v52 = vsel %vm547_vm11, %v3321_v48, %v3322_v42  ;;  %v3353_v50 = vsel %vm578_vm12, %v3351_v10, %v8394_v8  ;;  %v8397_v51 = vrot.slane %v7858_v28, 4  ;;  %v2488_v20 = vpop.permute.xlu1 %2487  ;;  %v2456_v21 = vsel %vm368_vm6, %v2450_v2, %v2452_v25 }
 0x37d   :  { %v3366_v17 = vadd.f32 %v3356_v45, %v3336_v54  ;;  %v3335_v23 = vadd.f32 %v3323_v52, %v3305_v15  ;;  %v8396_v36 = vrot.slane %v7862_v49, 5  ;;  %v3272_v48 = vadd.f32 %v3250_v37, %v7782_v53  ;;  %v2486_v10 = vpop.permute.xlu0 %2485 }
 0x37e   :  { %v3383_v58 = vsel %vm609_vm13, %v3381_v0, %v8397_v51  ;;  %v3257_v30 = vsel %vm479_vm9, %v3248_v5, %v3250_v37  ;;  %v2922_v45 = vsel %vm135_vm1, %v2916_v13, %v2918_v16  ;;  %v3278_v52 = vmul.f32 0.08216859, %v7787_v6 }
 0x37f   :  { %v3396_v8 = vadd.f32 %v3386_v56, %v3366_v17  ;;  %v3365_v34 = vadd.f32 %v3353_v50, %v3335_v23  ;;  %v7881_v15 = vsel %vm640_vm14, %v3411_v41, %v8396_v36  ;;  %v7885_v54 = vmul.f32 0.094516374, %v3272_v48 }
 0x380   :  { %v3404_v0 = vmul.f32 0.09546628, %v3272_v48  ;;  %v7888_v25 = vadd.f32 %v3257_v30, %v7785_v57  ;;  %v3277_v53 = vmul.f32 0.08216859, %v7794_v3  ;;  %v2471_v17 = vadd.f32 %v2456_v21, %v7772_v43  ;;  %v2970_v56 = vpop.permute.xlu1 %2969 }
 0x381   :  { %v7891_v2 = vadd.f32 %v3383_v58, %v3365_v34  ;;  %v7894_v23 = vmul.f32 0.08638146, %v3272_v48  ;;  %v2938_v6 = vadd.f32 %v2918_v16, %v7774_v47  ;;  %v7900_v5 = vadd.f32 %v2922_v45, %v7776_v33  ;;  %v2968_v57 = vpop.permute.xlu0 %2967 }
 0x382   :  { %v7903_v41 = vmul.f32 0.08638146, %v7888_v25  ;;  %v7906_v34 = vmul.f32 0.08990675, %v7888_v25  ;;  %v2508_v43 = vadd.f32 %v2488_v20, %v7817_v32  ;;  %v2492_v3 = vsel %vm405_vm7, %v2486_v10, %v2488_v20 }
 0x383   :  { %v3389_v30 = vrot.slane %v7885_v54, 4  ;;  %v3419_v50 = vrot.slane %v3404_v0, 5  ;;  %v3299_v58 = vrot.slane %v7894_v23, 1  ;;  %v7912_v47 = vmul.f32 0.08990675, %v3272_v48 }
 0x384   :  { %9351 = vst [vmem:[#allocation172_spill] sm:$0xff] %v7903_v41  ;;  %9352 = vst [vmem:[#allocation173_spill] sm:$0xff] %v7906_v34  ;;  %v3437_v33 = vrot.slane %v3404_v0, 6  ;;  %v3455_v16 = vrot.slane %v7885_v54, 7  ;;  %v3297_v21 = vrot.slane %v7903_v41, 1  ;;  %v3327_v45 = vrot.slane %v7906_v34, 2  ;;  %v2524_v13 = vpop.permute.xlu1 %2523 }
 0x385   :  { %v7918_v37 = vmul.f32 0.094516374, %v7888_v25  ;;  %v7921_v32 = vmul.f32 0.09546628, %v7888_v25  ;;  %v2507_v20 = vadd.f32 %v2492_v3, %v2471_v17  ;;  %v7923_v10 = vadd.f32 %v2970_v56, %v2938_v6  ;;  %v2522_v4 = vpop.permute.xlu0 %2521 }
 0x386   :  { %v9353_v36 = vrot.slane %v7823_v60, 1  ;;  %v3328_v54 = vsel %vm547_vm11, %v3322_v42, %v3327_v45  ;;  %v2974_v51 = vsel %vm188_vm2, %v2968_v57, %v2970_v56  ;;  %v9354_v27 = vrot.slane %v7803_v18, 1 }
 0x387   :  { %v2528_v11 = vsel %vm9355_vm0, %v2522_v4, %v2524_v13  ;;  %v3329_v17 = vrot.slane %v7912_v47, 2  ;;  %v7937_v3 = vmul.f32 0.09264482, %v3272_v48  ;;  %v9357_v56 = vrot.slane %v7815_v39, 5 }
 0x388   :  { %v3298_v0 = vsel %vm516_vm10, %v9353_v36, %v3297_v21  ;;  %v3300_v41 = vsel %vm516_vm10, %v9354_v27, %v3299_v58  ;;  %v7935_v6 = vpop.permute.xlu1 %3021  ;;  %v9356_v36 = vrot.slane %v7812_v61, 4  ;;  %v3426_v27 = vadd.f32 %v7850_v63, %v3396_v8 }
 0x389   :  { %v3307_v34 = vadd.f32 %v3298_v0, %v3277_v53  ;;  %v3308_v38 = vadd.f32 %v3300_v41, %v3278_v52  ;;  %v3420_v57 = vsel %vm640_vm14, %v9357_v56, %v3419_v50  ;;  %v3387_v4 = vrot.slane %v7918_v37, 4  ;;  %v3020_v52 = vpop.permute.xlu0 %3019 }
 0x38a   :  { %v3390_v42 = vsel %vm609_vm13, %v9356_v36, %v3389_v30  ;;  %v9358_v41 = vrot.slane %v7806_v24, 2  ;;  %v3433_v58 = vrot.slane %v7815_v39, 6  ;;  %v2544_v21 = vadd.f32 %v2524_v13, %v2508_v43 }
 0x38b   :  { %v7946_v53 = vadd.f32 %v3328_v54, %v3307_v34  ;;  %v3359_v30 = vrot.slane %v7937_v3, 3  ;;  %v3451_v0 = vrot.slane %v7812_v61, 7  ;;  %v2543_v50 = vadd.f32 %v2528_v11, %v2507_v20 }
 0x38c   :  { %v3330_v48 = vsel %vm547_vm11, %v9358_v41, %v3329_v17  ;;  %v9359_v63 = vrot.slane %v7780_v7, 6  ;;  %v3438_v34 = vsel %vm659_vm15, %v3433_v58, %v3437_v33  ;;  %v3476_v54 = vrot.slane %v7806_v24, 1  ;;  %v2560_v36 = vpop.permute.xlu1 %2559 }
 0x38d   :  { %v3338_v45 = vadd.f32 %v3330_v48, %v3308_v38  ;;  %v9360_v17 = vrot.slane %v7809_v22, 3  ;;  %v9361_v38 = vrot.slane %v7778_v31, 7  ;;  %vm9362_vm1 = vcmask 1040384   ;;  %v2558_v7 = vpop.permute.xlu0 %2557 }
 0x38e   :  { %v3434_v8 = vsel %vm659_vm15, %v9359_v63, %v3433_v58  ;;  %vm9363_vm2 = vmmov %vm9362_vm1  ;;  %v2580_v61 = vadd.f32 %v2560_v36, %v2544_v21  ;;  %v3477_v56 = vrot.slane %v7912_v47, 1  ;;  %v3498_v33 = vrot.slane %v7803_v18, 2  ;;  %v9397_v47 = vld [vmem:[#allocation202_spill] sm:$0xff] }
 0x38f   :  { %v3360_v39 = vsel %vm578_vm12, %v9360_v17, %v3359_v30  ;;  %v3444_v13 = vadd.f32 %v3434_v8, %v3426_v27  ;;  %v3452_v43 = vsel %vm9362_vm1, %v9361_v38, %v3451_v0  ;;  %v3456_v11 = vsel %vm9363_vm2, %v3451_v0, %v3455_v16 }
 0x390   :  { %v3368_v20 = vadd.f32 %v3360_v39, %v3338_v45  ;;  %v2564_v24 = vsel %vm479_vm9, %v2558_v7, %v2560_v36  ;;  %v3499_v48 = vrot.slane %v7894_v23, 2  ;;  %v7972_v27 = vmul.f32 0.09264482, %v7888_v25  ;;  %v3074_v16 = vpop.permute.xlu1 %3073 }
 0x391   :  { %v3462_v41 = vadd.f32 %v3452_v43, %v3444_v13  ;;  %v2776_v31 = vmul.f32 0.08990675, %v2580_v61  ;;  %v2798_v58 = vmul.f32 0.08638146, %v2580_v61  ;;  %v2579_v30 = vadd.f32 %v2564_v24, %v2543_v50  ;;  %v3072_v39 = vpop.permute.xlu0 %3071 }
 0x392   :  { %v3398_v63 = vadd.f32 %v3390_v42, %v3368_v20  ;;  %v3478_v45 = vsel %vm516_vm10, %v3476_v54, %v3477_v56  ;;  %v3500_v18 = vsel %vm547_vm11, %v3498_v33, %v3499_v48  ;;  %v3357_v0 = vrot.slane %v7972_v27, 3 }
 0x393   :  { %v3466_v21 = vadd.f32 %v3462_v41, %v7809_v22  ;;  %v2787_v8 = vrot.slane %v2776_v31, 1  ;;  %v2809_v25 = vrot.slane %v2798_v58, 2  ;;  %v2775_v36 = vmul.f32 0.08990675, %v2579_v30 }
 0x394   :  { %v2797_v17 = vmul.f32 0.08638146, %v2579_v30  ;;  %v3417_v42 = vrot.slane %v7921_v32, 5  ;;  %v3435_v50 = vrot.slane %v7921_v32, 6  ;;  %v3428_v22 = vadd.f32 %v3420_v57, %v3398_v63  ;;  %v3110_v41 = vpop.permute.xlu1 %3109 }
 0x395   :  { %v3488_v13 = vadd.f32 %v3478_v45, %v3466_v21  ;;  %v9364_v38 = vrot.slane %v7393_v44, 1  ;;  %v9365_v43 = vrot.slane %v7386_v46, 2  ;;  %v2785_v7 = vrot.slane %v2775_v36, 1  ;;  %v3108_v63 = vpop.permute.xlu0 %3107 }
 0x396   :  { %v2807_v20 = vrot.slane %v2797_v17, 2  ;;  %v2989_v33 = vadd.f32 %v2974_v51, %v7900_v5  ;;  %v3446_v31 = vadd.f32 %v3438_v34, %v3428_v22  ;;  %v3026_v32 = vsel %vm241_vm3, %v3020_v52, %v7935_v6 }
 0x397   :  { %v2788_v54 = vsel %vm516_vm10, %v9364_v38, %v2787_v8  ;;  %v2810_v61 = vsel %vm547_vm11, %v9365_v43, %v2809_v25  ;;  %v3510_v58 = vadd.f32 %v3500_v18, %v3488_v13  ;;  %v9366_v44 = vrot.slane %v7389_v1, 1 }
 0x398   :  { %v2796_v24 = vadd.f32 %v2788_v54, %v7518_v9  ;;  %v9367_v46 = vrot.slane %v7384_v26, 2  ;;  %v9368_v21 = vrot.slane %v7839_v35, 3  ;;  %v3042_v9 = vadd.f32 %v7935_v6, %v7923_v10  ;;  %v3146_v36 = vpop.permute.xlu1 %3145 }
 0x399   :  { %v2786_v57 = vsel %vm516_vm10, %v9366_v44, %v2785_v7  ;;  %v3464_v52 = vadd.f32 %v3456_v11, %v3446_v31  ;;  %vm9369_vm3 = vcmask 1006592   ;;  %v3534_v45 = vsub.f32 %v3510_v58, %v7692_v55  ;;  %v3144_v11 = vpop.permute.xlu0 %3143 }
 0x39a   :  { %v2808_v30 = vsel %vm547_vm11, %v9367_v46, %v2807_v20  ;;  %v3358_v51 = vsel %vm578_vm12, %v9368_v21, %v3357_v0  ;;  %v2818_v5 = vadd.f32 %v2810_v61, %v2796_v24  ;;  %v2795_v34 = vadd.f32 %v2786_v57, %v7571_v19  ;;  %vm9372_vm12 = vmmov %vm9343_vm8  ;;  %v9378_v46 = vld [vmem:[#allocation170_spill] sm:$0xff]  ;;  %v9380_v21 = vld [vmem:[#allocation165_spill] sm:$0xff] }
 0x39b   :  { %v3078_v1 = vsel %vm9369_vm3, %v3072_v39, %v3074_v16  ;;  %v3367_v26 = vadd.f32 %v3358_v51, %v7946_v53  ;;  %v9370_v18 = vrot.slane %v7858_v28, 4  ;;  %v3041_v0 = vadd.f32 %v3026_v32, %v2989_v33  ;;  %v9375_v32 = vld [vmem:[#allocation169_spill] sm:$0xff] }
 0x39c   :  { %v2817_v25 = vadd.f32 %v2808_v30, %v2795_v34  ;;  %v8015_v10 = vadd.f32 %v3464_v52, %v7937_v3  ;;  %v9371_v19 = vrot.slane %v7862_v49, 5  ;;  %v3453_v55 = vrot.slane %v7918_v37, 7  ;;  %v3182_v7 = vpop.permute.xlu1 %3181  ;;  %v9383_v52 = vld [vmem:[#allocation173_spill] sm:$0xff] }
 0x39d   :  { %v3388_v8 = vsel %vm609_vm13, %v9370_v18, %v3387_v4  ;;  %v3546_v53 = vmul.f32 2.0, %v3534_v45  ;;  %v3425_v39 = vadd.f32 %v7881_v15, %v7891_v2  ;;  %v3532_v4 = vsub.f32 %v2818_v5, %v7701_v62  ;;  %vm9377_vm13 = vmmov %vm9362_vm1  ;;  %v3586_v45 = vld [vmem:[#allocation2 + $0x8] sm:$0xff] }
 0x39e   :  { %v3418_v6 = vsel %vm640_vm14, %v9371_v19, %v3417_v42  ;;  %v3397_v17 = vadd.f32 %v3388_v8, %v3367_v26  ;;  %v3094_v22 = vadd.f32 %v3074_v16, %v3042_v9  ;;  %v3093_v13 = vadd.f32 %v3078_v1, %v3041_v0  ;;  %v3180_v16 = vpop.permute.xlu0 %3179 }
 0x39f   :  { %v3430_v38 = vrot.slane %v7862_v49, 6  ;;  %v3114_v3 = vsel %vm9372_vm12, %v3108_v63, %v3110_v41  ;;  %v3550_v54 = vadd.f32 0.0009, %v3546_v53  ;;  %v3448_v42 = vrot.slane %v7858_v28, 7 }
 0x3a0   :  { %v3427_v43 = vadd.f32 %v3418_v6, %v3397_v17  ;;  %v3531_v37 = vsub.f32 %v2817_v25, %v7733_v14  ;;  %v3130_v61 = vadd.f32 %v3110_v41, %v3094_v22  ;;  %v9373_v20 = vrot.slane %v7800_v29, 6  ;;  %v3590_v29 = vld [vmem:[%s8108_s0 + $0x8] sm:$0xff]  ;;  %v3218_v5 = vpop.permute.xlu1 %3217  ;;  %v9384_v25 = vld [vmem:[#allocation172_spill] sm:$0xff] }
 0x3a1   :  { %v3436_v62 = vsel %vm659_vm15, %v3430_v38, %v3435_v50  ;;  %v3150_v2 = vsel %vm368_vm6, %v3144_v11, %v3146_v36  ;;  %v3554_v49 = vmul.f32 %v3550_v54, %v7746_v12  ;;  %v9374_v28 = vsub.f32 %v7715_v59, %v7708_v40  ;;  %vm9379_vm6 = vmmov %vm9362_vm1  ;;  %v9381_v40 = vld [vmem:[#allocation166_spill] sm:$0xff]  ;;  %v9386_v11 = vld [vmem:[#allocation171_spill] sm:$0xff] }
 0x3a2   :  { %v3431_v15 = vsel %vm659_vm15, %v9373_v20, %v3430_v38  ;;  %v3445_v24 = vadd.f32 %v3436_v62, %v3427_v43  ;;  %v3129_v58 = vadd.f32 %v3114_v3, %v3093_v13  ;;  %v3166_v41 = vadd.f32 %v3146_v36, %v3130_v61  ;;  %v3216_v18 = vpop.permute.xlu0 %3215  ;;  %v9389_v3 = vld [vmem:[#allocation75_spill] sm:$0xff] }
 0x3a3   :  { %v3443_v33 = vadd.f32 %v3431_v15, %v3425_v39  ;;  %v3568_v31 = vadd.f32 %v3532_v4, %v9374_v28  ;;  %v9376_v44 = vrot.slane %v9375_v32, 7  ;;  %v3186_v57 = vsel %vm405_vm7, %v3180_v16, %v3182_v7  ;;  %vm9385_vm7 = vmmov %vm9355_vm0 }
 0x3a4   :  { %v3580_v12 = vmul.f32 %v9378_v46, %v3554_v49  ;;  %v3454_v30 = vsel %vm9379_vm6, %v3448_v42, %v3453_v55  ;;  %v9382_v59 = vsub.f32 %v9380_v21, %v9381_v40  ;;  %v3165_v9 = vadd.f32 %v3150_v2, %v3129_v58  ;;  %v9394_v21 = vld [vmem:[#allocation73_spill] sm:$0xff] }
 0x3a5   :  { %v3449_v50 = vsel %vm9377_vm13, %v9376_v44, %v3448_v42  ;;  %v3463_v34 = vadd.f32 %v3454_v30, %v3445_v24  ;;  %v3474_v1 = vrot.slane %v9383_v52, 1  ;;  %v3202_v26 = vadd.f32 %v3182_v7, %v3166_v41  ;;  %v9396_v52 = vld [vmem:[#allocation204_spill] sm:$0xff] }
 0x3a6   :  { %v3461_v63 = vadd.f32 %v3449_v50, %v3443_v33  ;;  %v3567_v51 = vadd.f32 %v3531_v37, %v9382_v59  ;;  %v3594_v8 = vmul.f32 %v3590_v29, %v3580_v12  ;;  %v3496_v36 = vrot.slane %v9384_v25, 2  ;;  %v3254_v37 = vpop.permute.xlu1 %3253  ;;  %v3252_v15 = vpop.permute.xlu0 %3251 }
 0x3a7   :  { %v3201_v19 = vadd.f32 %v3186_v57, %v3165_v9  ;;  %v3222_v6 = vsel %vm9385_vm7, %v3216_v18, %v3218_v5  ;;  %v3467_v55 = vadd.f32 %v3463_v34, %v7972_v27  ;;  %v9387_v53 = vrot.slane %v9386_v11, 1  ;;  %v9391_v27 = vld [vmem:[#allocation168_spill] sm:$0xff] }
 0x3a8   :  { %v3465_v0 = vadd.f32 %v3461_v63, %v7839_v35  ;;  %v3238_v39 = vadd.f32 %v3218_v5, %v3202_v26  ;;  %v9388_v22 = vrot.slane %v7823_v60, 2  ;;  %v3598_v38 = vadd.f32 %v3594_v8, %v3586_v45  ;;  %v9390_v35 = vld [vmem:[#allocation157_spill] sm:$0xff]  ;;  %v9393_v60 = vld [vmem:[#allocation167_spill] sm:$0xff] }
 0x3a9   :  { %v3475_v17 = vsel %vm516_vm10, %v9387_v53, %v3474_v1  ;;  %v3521_v54 = vmul.f32 %v9390_v35, %v9389_v3  ;;  %v3559_v43 = vadd.f32 %v7733_v14, %v9381_v40  ;;  %v3572_v42 = vadd.f32 0.0009, %v3568_v31  ;;  %v9395_v40 = vld [vmem:[#allocation164_spill] sm:$0xff] }
 0x3aa   :  { %v3487_v4 = vadd.f32 %v3475_v17, %v3465_v0  ;;  %v3497_v13 = vsel %vm547_vm11, %v9388_v22, %v3496_v36  ;;  %3663 = vrcp.f32 %v9391_v27  ;;  %v3237_v61 = vadd.f32 %v3222_v6, %v3201_v19  ;;  %v3592_v3 = vld [vmem:[%s8108_s0 + $0x18] sm:$0xff] }
 0x3ab   :  { %v3274_v7 = vadd.f32 %v3254_v37, %v3238_v39  ;;  %vm9392_vm14 = vcmask 572416   ;;  %v3564_v62 = vadd.f32 0.0001, %v9393_v60  ;;  %v3571_v2 = vadd.f32 0.0009, %v3567_v51 }
 0x3ac   :  { %v3509_v20 = vadd.f32 %v3497_v13, %v3487_v4  ;;  %3603 = vst.msk [vmem:[#allocation2 + $0x8] sm:$0xff] %vm9392_vm14, %v3598_v38  ;;  %v3258_v16 = vsel %vm479_vm9, %v3252_v15, %v3254_v37  ;;  %v3537_v14 = vmul.f32 2.0, %v3521_v54  ;;  %v3563_v31 = vadd.f32 0.0001, %v3559_v43  ;;  %v3588_v37 = vld [vmem:[#allocation2 + $0x18] sm:$0xff]  ;;  %vm9398_vm9 = vmmov %vm9392_vm14 }
 0x3ad   :  { %v3470_v49 = vmul.f32 0.08990675, %v3274_v7  ;;  %v3492_v33 = vmul.f32 0.08638146, %v3274_v7  ;;  %v3273_v24 = vadd.f32 %v3258_v16, %v3237_v61  ;;  %v3576_v58 = vmul.f32 %v3572_v42, %v3564_v62  ;;  %v3591_v42 = vld [vmem:[%s8108_s0 + $0x10] sm:$0xff] }
 0x3ae   :  { %v3533_v28 = vsub.f32 %v3509_v20, %v3521_v54  ;;  %v3575_v57 = vmul.f32 %v3571_v2, %v3563_v31  ;;  %v3541_v63 = vadd.f32 0.0001, %v3537_v14  ;;  %v3524_v59 = vmul.f32 %v9395_v40, %v9394_v21 }
 0x3af   :  { %v3481_v41 = vrot.slane %v3470_v49, 1  ;;  %v3503_v29 = vrot.slane %v3492_v33, 2  ;;  %v3469_v32 = vmul.f32 0.08990675, %v3273_v24  ;;  %v3491_v44 = vmul.f32 0.08638146, %v3273_v24 }
 0x3b0   :  { %v3545_v50 = vmul.f32 2.0, %v3533_v28  ;;  %3665 = vrcp.f32 %v3576_v58  ;;  %v3523_v45 = vmul.f32 %v9397_v47, %v9396_v52  ;;  %v3540_v25 = vmul.f32 2.0, %v3524_v59 }
 0x3b1   :  { %v3482_v46 = vsel %vm516_vm10, %v3477_v56, %v3481_v41  ;;  %v3479_v12 = vrot.slane %v3469_v32, 1  ;;  %v3501_v30 = vrot.slane %v3491_v44, 2  ;;  %v3504_v5 = vsel %vm547_vm11, %v3499_v48, %v3503_v29 }
 0x3b2   :  { %v3490_v51 = vadd.f32 %v3482_v46, %v8015_v10  ;;  %v3549_v9 = vadd.f32 0.0009, %v3545_v50  ;;  %3667 = vrcp.f32 %v3575_v57  ;;  %v3589_v10 = vld [vmem:[%s8108_s0] sm:$0xff]  ;;  %v3539_v6 = vmul.f32 2.0, %v3523_v45 }
 0x3b3   :  { %v3480_v34 = vsel %vm516_vm10, %v3474_v1, %v3479_v12  ;;  %v3502_v0 = vsel %vm547_vm11, %v3496_v36, %v3501_v30  ;;  %v3544_v17 = vadd.f32 0.0001, %v3540_v25  ;;  %v3611_v54 = vld [vmem:[#allocation2 + $0x8] sm:$0xff]  ;;  %vm9399_vm10 = vmmov %vm9398_vm9  ;;  %vm24_vm15 = vcmask 0  }
 0x3b4   :  { %v3512_v56 = vadd.f32 %v3504_v5, %v3490_v51  ;;  %v3489_v26 = vadd.f32 %v3480_v34, %v3467_v55  ;;  %v3553_v18 = vmul.f32 %v3549_v9, %v3541_v63  ;;  %v3664_v8 = vpop.eup %3663  ;;  %v3543_v4 = vadd.f32 0.0001, %v3539_v6  ;;  %vm9400_vm11 = vmmov %vm9398_vm9 }
 0x3b5   :  { %v3614_v7 = vsel %vm9398_vm9, %v3611_v54, 0.0  ;;  %v9401_v33 = vmov 0.0  }
 0x3b6   :  { %v3536_v23 = vsub.f32 %v3512_v56, %v3524_v59  ;;  %v3511_v19 = vadd.f32 %v3502_v0, %v3489_v26  ;;  %v3578_v48 = vmul.f32 %v3664_v8, %v3553_v18  ;;  %25 = vst.msk [vmem:[#allocation3] sm:$0x1] %vm24_vm15, %v9401_v33 }
 0x3b8   :  { %v3548_v1 = vmul.f32 2.0, %v3536_v23  ;;  %v3535_v11 = vsub.f32 %v3511_v19, %v3523_v45  ;;  %v3593_v53 = vmul.f32 %v3589_v10, %v3578_v48 }
 0x3ba   :  { %v3552_v39 = vadd.f32 0.0009, %v3548_v1  ;;  %v3547_v55 = vmul.f32 2.0, %v3535_v11  ;;  %v3666_v38 = vpop.eup %3665  ;;  %v3615_v60 = vadd.f32 %v3614_v7, %v3593_v53 }
 0x3bc   :  { %v3556_v22 = vmul.f32 %v3552_v39, %v3544_v17  ;;  %v3551_v13 = vadd.f32 0.0009, %v3547_v55  ;;  %v3668_v43 = vpop.eup %3667 }
 0x3bd   :  { %v3609_v32 = vld [vmem:[#allocation3] sm:$0x1] }
 0x3be   :  { %v3584_v36 = vmul.f32 %v3666_v38, %v3556_v22  ;;  %v3555_v35 = vmul.f32 %v3551_v13, %v3543_v4 }
 0x3c0   :  { %v3596_v27 = vmul.f32 %v3592_v3, %v3584_v36  ;;  %v3582_v61 = vmul.f32 %v3668_v43, %v3555_v35 }
 0x3c2   :  { %v3595_v20 = vmul.f32 %v3591_v42, %v3582_v61  ;;  %v3600_v15 = vadd.f32 %v3596_v27, %v3588_v37 }
 0x3c4   :  { %3605 = vst.msk [vmem:[#allocation2 + $0x18] sm:$0xff] %vm9399_vm10, %v3600_v15  ;;  %v3616_v62 = vadd.f32 %v3615_v60, %v3595_v20 }
 0x3cb   :  { %v3613_v2 = vld [vmem:[#allocation2 + $0x18] sm:$0xff] }
 0x3cc   :  { %v3617_v16 = vsel %vm9400_vm11, %v3613_v2, 0.0 }
 0x3cd   :  { %v3618_v49 = vadd.f32 %v3617_v16, %v3616_v62 }
 0x3cf   :  { %3619 = vadd.xlane.f32.xlu0 %v3618_v49 }
 0x45c   :  { %v3620_v24 = vpop.xlane.xlu0 %3619 }
 0x45d   :  { %v3621_v28 = vrot.slane %v3620_v24, 4 }
 0x45f   :  { %v3622_v14 = vadd.f32 %v3621_v28, %v3620_v24 }
 0x461   :  { %v3623_v31 = vrot.slane %v3622_v14, 2 }
 0x463   :  { %v3624_v58 = vadd.f32 %v3623_v31, %v3622_v14 }
 0x465   :  { %v3625_v41 = vrot.slane %v3624_v58, 1 }
 0x467   :  { %v3626_v29 = vadd.f32 %v3625_v41, %v3624_v58 }
 0x469   :  { %3647 = vpush %v3626_v29 }
 0x49a   :  { %s3648_s0 = spop %3647 }
 0x49b   :  { %s3628_s7 = smul.f32 0.00048828125, %s3648_s0 }
 0x49d   :  { %v3629_v44 = vstv %s3628_s7 }
 0x49e   :  { %v3630_v50 = vadd.f32 %v3629_v44, %v3609_v32 }
 0x4a0   :  { %3632 = vst.msk [vmem:[#allocation3] sm:$0x1] %vm24_vm15, %v3630_v50 }
 0x4a1   :  { %3700 = shalt.err (!%p3697_p4)
}
 0x4a2   :  { %s3701_s19 = scalar_lea.hbm %s8111_s3, 16 }
 0x4a3   :  { %p3702_p5 = scmp.ne.s32.totalorder %s8111_s3, %s3701_s19  ;;  %p3705_p6 = scmp.lt.u32.totalorder %s3701_s19, %s8111_s3 }
 0x4a5   :  { %p3707_p7 = pnand %p3705_p6, %p3702_p5 }
 0x4a7   :  { %3710 = shalt.err (!%p3707_p7)
}
 0x4a8   :  { %3642 = dma.vmem_to_hbm [thread:$0]  %s3640_s9, 16, %s8111_s3, [#allocation4]  }
 0x4a9   :  { %3711 = dma.done.wait [#allocation4], 16  }
 0x4aa   :  { %3712 = vsyncadd [#allocation4], 4294967280 }
 0x4ab   :  { %3646 = vsyncpa [#allocation4], 1 }

</bundles_post_ra>
